<compile_context>
chip_gen: v7x
topology: tpu7x:2x2x1
jax: 0.10.0
libtpu: 0.0.40
codegen_flags: <defaults>
</compile_context>

<pallas_src>
import numpy as np
import jax
import jax.numpy as jnp
from jax import lax
from jax.experimental import pallas as pl
from jax.experimental.pallas import tpu as pltpu


# ----------------------------------------------------------------------------- kernel helpers

def _layer_norm(h, gamma, beta):
    mu = jnp.mean(h, axis=-1, keepdims=True)
    var = jnp.mean((h - mu) ** 2, axis=-1, keepdims=True)
    return (h - mu) * lax.rsqrt(var + 1e-5) * gamma + beta


def _ffn(h, w1_ref, b1_ref, w2_ref, b2_row):
    """hidden -> dim_ff -> hidden, chunked over dim_ff to bound live vregs.

    w1/w2 are bf16 refs; bias/accumulation in f32; ReLU in f32.
    """
    dim_ff = w1_ref.shape[1]
    chunk = 512 if (dim_ff % 512 == 0 and dim_ff > 512) else dim_ff
    h_bf = h.astype(jnp.bfloat16)
    out = None
    for c in range(dim_ff // chunk):
        lo = c * chunk
        f = jnp.dot(h_bf, w1_ref[:, lo:lo + chunk],
                    preferred_element_type=jnp.float32) + b1_ref[:, lo:lo + chunk]
        f = jnp.maximum(f, 0.0).astype(jnp.bfloat16)
        part = jnp.dot(f, w2_ref[lo:lo + chunk, :], preferred_element_type=jnp.float32)
        out = part if out is None else out + part
    return out + b2_row


def _transformer_layer(x, wq_ref, wk_ref, wv_ref, wo_ref, vec_ref,
                       w1_ref, b1_ref, w2_ref, attn_mask):
    """Post-norm nn.TransformerEncoderLayer (single head, eval mode).

    x: (rows, hidden) f32, rows = B_blk * seq_len (batch flattened into rows).
    attn_mask: (rows, rows) f32 block-diagonal additive mask (0 within a batch
    element, -1e30 across) — exact isolation of the per-element attention.
    Weights (in, out) bf16; vec rows: [bq, bk, bv, bo, g1, be1, b2, g2, be2] f32.
    """
    vec = vec_ref[...]
    scale = 1.0 / float(np.sqrt(x.shape[-1]))
    x_bf = x.astype(jnp.bfloat16)

    q = jnp.dot(x_bf, wq_ref[...], preferred_element_type=jnp.float32) + vec[0:1]
    k = jnp.dot(x_bf, wk_ref[...], preferred_element_type=jnp.float32) + vec[1:2]
    v = jnp.dot(x_bf, wv_ref[...], preferred_element_type=jnp.float32) + vec[2:3]

    # q @ k^T without materializing k^T; scores kept f32, softmax in f32
    s = lax.dot_general(q, k, (((1,), (1,)), ((), ())),
                        preferred_element_type=jnp.float32) * scale + attn_mask
    s = s - jnp.max(s, axis=-1, keepdims=True)
    p = jnp.exp(s)
    p = p * pl.reciprocal(jnp.sum(p, axis=-1, keepdims=True), approx=True)

    a = jnp.dot(p, v, preferred_element_type=jnp.float32)
    a = jnp.dot(a.astype(jnp.bfloat16), wo_ref[...],
                preferred_element_type=jnp.float32) + vec[3:4]

    h = _layer_norm(x + a, vec[4:5], vec[5:6])
    f = _ffn(h, w1_ref, b1_ref, w2_ref, vec[6:7])
    return _layer_norm(h + f, vec[7:8], vec[8:9])


def _fused_kernel(x_ref, addpre_ref, prew_ref, prevec_ref, c1w_ref, c2w_ref, emask_ref,
                  ewq, ewk, ewv, ewo, evec, ew1, eb1, ew2,
                  scat_ref, adddec_ref, dmask_ref,
                  dwq, dwk, dwv, dwo, dvec, dw1, db1, dw2,
                  postw_ref, postb_ref, o_ref):
    """Full forward for one block of batch elements, entirely in VMEM."""
    prevec = prevec_ref[...]                                            # (3, pre_dims)

    # ---- pre stage: 1x1 conv (= matmul) + pos/mask emb + ResNet block (BN folded) ----
    x = x_ref[...]                                                      # (B*M, 2H) f32
    x = jnp.dot(x.astype(jnp.bfloat16), prew_ref[...],
                preferred_element_type=jnp.float32) + prevec[0:1]
    x = x + addpre_ref[...]                                             # + pos emb + mask emb
    h = jnp.dot(x.astype(jnp.bfloat16), c1w_ref[...],
                preferred_element_type=jnp.float32) + prevec[1:2]
    h = jnp.maximum(h, 0.0)
    h = jnp.dot(h.astype(jnp.bfloat16), c2w_ref[...],
                preferred_element_type=jnp.float32) + prevec[2:3]
    h = jnp.maximum(h, 0.0)
    x = jnp.maximum(x + h, 0.0)                                         # (B*M, hidden)

    # ---- encoder transformer layer ----
    enc = _transformer_layer(x, ewq, ewk, ewv, ewo, evec, ew1, eb1, ew2,
                             emask_ref[...])                            # (B*M, hidden)

    # ---- decoder input: exact f32 block-diagonal one-hot scatter + masked_token/pos-emb addend
    dec_in = jnp.dot(scat_ref[...], enc, preferred_element_type=jnp.float32) \
             + adddec_ref[...]                                          # (B*W, hidden)

    # ---- decoder transformer layer ----
    dec = _transformer_layer(dec_in, dwq, dwk, dwv, dwo, dvec, dw1, db1, dw2,
                             dmask_ref[...])                            # (B*W, hidden)

    # ---- post conv (1x1 conv = matmul), full f32 to avoid truncating decoder output ----
    o_ref[...] = jnp.dot(dec, postw_ref[...],
                         preferred_element_type=jnp.float32) + postb_ref[...]


# ----------------------------------------------------------------------------- wrapper

def forward(kspace, mask_np, params, *, max_batch_per_block=8):
    """kspace: (N, 2, H, W) float32; mask_np: numpy bool (W,)."""
    N, _, H, W = kspace.shape
    hidden = params["dec_pos_emb"].shape[1]
    pre_dims = params["pre_pos_emb"].shape[1]
    assert pre_dims == hidden, "pre_conv_project is Identity only when pre_dims == hidden_size"

    mask_np = np.asarray(mask_np, dtype=bool)
    cols = np.nonzero(mask_np)[0]
    M = int(cols.shape[0])

    # grid / per-block batching: 2 blocks feed both v7x TensorCores, each block carries
    # B_blk batch elements flattened into the matmul row dimension (capped to bound
    # the (B*W)^2 attention score matrices).
    num_blocks = 1 if N <= 1 else 2
    B_blk = -(-N // num_blocks)
    if B_blk > max_batch_per_block:
        B_blk = max_batch_per_block
        num_blocks = -(-N // B_blk)
    N_pad = num_blocks * B_blk

    # column filter + flatten: (N,2,H,W) -> channels-last rows (N_pad*M, 2H)
    fk = kspace[:, :, :, cols].reshape(N, 2 * H, M)
    x_cl = jnp.transpose(fk, (0, 2, 1)).astype(jnp.float32)            # (N, M, 2H)
    if N_pad != N:
        x_cl = jnp.concatenate(
            [x_cl, jnp.zeros((N_pad - N, M, 2 * H), jnp.float32)], axis=0)
    x_flat = x_cl.reshape(N_pad * M, 2 * H)

    # pre-stage addend: position + mask embeddings at sampled cols, tiled per block
    mask_ids = jnp.asarray(mask_np.astype(np.int32))
    mask_emb = params["mask_embedding"][mask_ids]                       # (W, hidden)
    addend_pre = params["pre_pos_emb"][cols] + mask_emb[cols]           # (M, pre_dims)
    addend_pre = jnp.tile(addend_pre, (B_blk, 1))                       # (B*M, pre_dims)

    # decoder-input addend: masked_token on not-sampled cols + decoder pos emb
    not_mask = jnp.asarray((~mask_np).astype(np.float32))[:, None]      # (W, 1)
    addend_dec = not_mask * params["masked_token"][None, :] + params["dec_pos_emb"]
    addend_dec = jnp.tile(addend_dec, (B_blk, 1))                       # (B*W, hidden)

    # exact f32 one-hot scatter (block-diagonal across the B_blk batch elements)
    scat_wm = np.zeros((W, M), np.float32)
    scat_wm[cols, np.arange(M)] = 1.0
    scat = jnp.asarray(np.kron(np.eye(B_blk, dtype=np.float32), scat_wm))

    # block-diagonal additive attention masks (all-zero when B_blk == 1)
    def _block_mask(rows):
        same = np.kron(np.eye(B_blk, dtype=np.float32),
                       np.ones((rows, rows), np.float32))
        return jnp.asarray((1.0 - same) * np.float32(-1e30))
    enc_mask = _block_mask(M)                                           # (B*M, B*M)
    dec_mask = _block_mask(W)                                           # (B*W, B*W)

    enc_p, dec_p = params["encoder"], params["decoder"]
    shared = [
        addend_pre, params["pre_w"], params["prevec"],
        params["res_c1w"], params["res_c2w"], enc_mask,
        enc_p["wq"], enc_p["wk"], enc_p["wv"], enc_p["wo"], enc_p["vec"],
        enc_p["w1"], enc_p["b1"], enc_p["w2"],
        scat, addend_dec, dec_mask,
        dec_p["wq"], dec_p["wk"], dec_p["wv"], dec_p["wo"], dec_p["vec"],
        dec_p["w1"], dec_p["b1"], dec_p["w2"],
        params["post_w"], params["post_b"],
    ]

    def shared_spec(a):
        # constant across the grid -> single-buffered, stays resident in VMEM
        return pl.BlockSpec(a.shape, lambda i: (0, 0),
                            pipeline_mode=pl.Buffered(1))

    # advisory cost estimate so XLA schedules the surrounding gather/transpose around us
    rows_e, rows_d = B_blk * M, B_blk * W
    dim_ff = enc_p["w1"].shape[1]
    flops_block = 2 * (
        rows_e * (2 * H) * pre_dims + 2 * rows_e * pre_dims * pre_dims
        + 4 * rows_e * hidden * hidden + 2 * rows_e * hidden * dim_ff
        + 2 * rows_e * rows_e * hidden
        + rows_d * rows_e * hidden
        + 4 * rows_d * hidden * hidden + 2 * rows_d * hidden * dim_ff
        + 2 * rows_d * rows_d * hidden
        + rows_d * hidden * (2 * H))
    bytes_accessed = (sum(int(a.size) * a.dtype.itemsize for a in shared)
                      + int(x_flat.size) * 4 + N_pad * W * 2 * H * 4)
    cost = pl.CostEstimate(
        flops=int(num_blocks * flops_block),
        transcendentals=int(num_blocks * (rows_e * rows_e + rows_d * rows_d)),
        bytes_accessed=int(bytes_accessed))

    out = pl.pallas_call(
        _fused_kernel,
        out_shape=jax.ShapeDtypeStruct((N_pad * W, 2 * H), jnp.float32),
        grid=(num_blocks,),
        in_specs=[pl.BlockSpec((B_blk * M, 2 * H), lambda i: (i, 0))]
                 + [shared_spec(a) for a in shared],
        out_specs=pl.BlockSpec((B_blk * W, 2 * H), lambda i: (i, 0)),
        compiler_params=pltpu.CompilerParams(
            dimension_semantics=("parallel",),
            vmem_limit_bytes=32 * 1024 * 1024),
        cost_estimate=cost,
    )(x_flat, *shared)                                                  # (N_pad*W, 2H)

    out = out.reshape(N_pad, W, 2 * H)[:N]                              # (N, W, 2H)
    return jnp.transpose(out, (0, 2, 1)).reshape(N, 2, H, W)


# ----------------------------------------------------------------------------- params

def init_params(key, H, W, pre_dims, hidden, dim_ff):
    """Weights stored pre-transposed as (in_features, out_features); big matrices in bf16."""
    assert pre_dims == hidden
    ks = iter(jax.random.split(key, 64))
    bf = jnp.bfloat16

    def nrm(shape, dtype=jnp.float32):
        return (0.02 * jax.random.normal(next(ks), shape, dtype=jnp.float32)).astype(dtype)

    def tlayer():
        # vec rows: [bq, bk, bv, bo, g1, be1, b2, g2, be2]
        vec = jnp.concatenate([
            jnp.zeros((4, hidden), jnp.float32),
            jnp.ones((1, hidden), jnp.float32),
            jnp.zeros((2, hidden), jnp.float32),
            jnp.ones((1, hidden), jnp.float32),
            jnp.zeros((1, hidden), jnp.float32),
        ], axis=0)
        return {
            "wq": nrm((hidden, hidden), bf), "wk": nrm((hidden, hidden), bf),
            "wv": nrm((hidden, hidden), bf), "wo": nrm((hidden, hidden), bf),
            "vec": vec,
            "w1": nrm((hidden, dim_ff), bf), "b1": jnp.zeros((1, dim_ff), jnp.float32),
            "w2": nrm((dim_ff, hidden), bf),
        }

    # eval-mode BatchNorm1d (running_mean=0, running_var=1, weight=1, bias=0)
    # folded into the preceding 1x1 convs: w' = w * scale, b' = b * scale + shift
    eps = 1e-5
    bn_scale = np.float32(1.0 / np.sqrt(1.0 + eps))

    return {
        "mask_embedding": nrm((2, hidden)),
        "pre_w": nrm((2 * H, pre_dims), bf),
        "prevec": jnp.zeros((3, pre_dims), jnp.float32),   # [pre_b, c1b_folded, c2b_folded]
        "pre_pos_emb": nrm((W, pre_dims)),
        "res_c1w": (nrm((pre_dims, pre_dims)) * bn_scale).astype(bf),
        "res_c2w": (nrm((pre_dims, pre_dims)) * bn_scale).astype(bf),
        "encoder": tlayer(),
        "decoder": tlayer(),
        "dec_pos_emb": nrm((W, hidden)),
        "post_w": nrm((hidden, 2 * H)),                    # post conv kept f32 (exactness)
        "post_b": jnp.zeros((1, 2 * H), jnp.float32),
        "masked_token": nrm((hidden,)),
    }


# ----------------------------------------------------------------------------- main

if __name__ == "__main__":
    N, H, W = 2, 16, 16
    pre_dims = hidden = 32      # pre_dims == hidden_size (required, see semantics notes)
    dim_ff = 2048               # nn.TransformerEncoderLayer default dim_feedforward

    key = jax.random.PRNGKey(0)
    kp, kw = jax.random.split(key)

    kspace = jax.random.normal(kp, (N, 2, H, W), dtype=jnp.float32)
    mask_np = np.zeros((W,), dtype=bool)
    mask_np[[0, 2, 3, 5, 8, 9, 12, 15]] = True      # M = 8 sampled columns

    params = init_params(kw, H, W, pre_dims, hidden, dim_ff)

    out = jax.block_until_ready(forward(kspace, mask_np, params))

    assert out.shape == (N, 2, H, W), out.shape
    assert bool(jnp.all(jnp.isfinite(out)))
    print("KERNEL_OK")
</pallas_src>

<mosaic_0001>
module attributes {stable_mosaic.version = 11 : i64} {
  func.func @_fused_kernel(%arg0: i32, %arg1: memref<8x32xf32, #tpu.memory_space<vmem>>, %arg2: memref<8x32xf32, #tpu.memory_space<vmem>>, %arg3: memref<32x32xbf16, #tpu.memory_space<vmem>>, %arg4: memref<3x32xf32, #tpu.memory_space<vmem>>, %arg5: memref<32x32xbf16, #tpu.memory_space<vmem>>, %arg6: memref<32x32xbf16, #tpu.memory_space<vmem>>, %arg7: memref<8x8xf32, #tpu.memory_space<vmem>>, %arg8: memref<32x32xbf16, #tpu.memory_space<vmem>>, %arg9: memref<32x32xbf16, #tpu.memory_space<vmem>>, %arg10: memref<32x32xbf16, #tpu.memory_space<vmem>>, %arg11: memref<32x32xbf16, #tpu.memory_space<vmem>>, %arg12: memref<9x32xf32, #tpu.memory_space<vmem>>, %arg13: memref<32x2048xbf16, #tpu.memory_space<vmem>>, %arg14: memref<1x2048xf32, #tpu.memory_space<vmem>>, %arg15: memref<2048x32xbf16, #tpu.memory_space<vmem>>, %arg16: memref<16x8xf32, #tpu.memory_space<vmem>>, %arg17: memref<16x32xf32, #tpu.memory_space<vmem>>, %arg18: memref<16x16xf32, #tpu.memory_space<vmem>>, %arg19: memref<32x32xbf16, #tpu.memory_space<vmem>>, %arg20: memref<32x32xbf16, #tpu.memory_space<vmem>>, %arg21: memref<32x32xbf16, #tpu.memory_space<vmem>>, %arg22: memref<32x32xbf16, #tpu.memory_space<vmem>>, %arg23: memref<9x32xf32, #tpu.memory_space<vmem>>, %arg24: memref<32x2048xbf16, #tpu.memory_space<vmem>>, %arg25: memref<1x2048xf32, #tpu.memory_space<vmem>>, %arg26: memref<2048x32xbf16, #tpu.memory_space<vmem>>, %arg27: memref<32x32xf32, #tpu.memory_space<vmem>>, %arg28: memref<1x32xf32, #tpu.memory_space<vmem>>, %arg29: memref<16x32xf32, #tpu.memory_space<vmem>>) attributes {dimension_semantics = [#tpu.dimension_semantics<parallel>], iteration_bounds = array<i64: 2>, scalar_prefetch = 0 : i64, scratch_operands = 0 : i64, tpu.core_type = #tpu.core_type<tc>, window_params = [{transform_indices = @transform_0, window_bounds = array<i64: 8, 32>}, {pipeline_mode = #tpu.pipeline_mode<synchronous>, transform_indices = @transform_1, window_bounds = array<i64: 8, 32>}, {pipeline_mode = #tpu.pipeline_mode<synchronous>, transform_indices = @transform_2, window_bounds = array<i64: 32, 32>}, {pipeline_mode = #tpu.pipeline_mode<synchronous>, transform_indices = @transform_3, window_bounds = array<i64: 3, 32>}, {pipeline_mode = #tpu.pipeline_mode<synchronous>, transform_indices = @transform_4, window_bounds = array<i64: 32, 32>}, {pipeline_mode = #tpu.pipeline_mode<synchronous>, transform_indices = @transform_5, window_bounds = array<i64: 32, 32>}, {pipeline_mode = #tpu.pipeline_mode<synchronous>, transform_indices = @transform_6, window_bounds = array<i64: 8, 8>}, {pipeline_mode = #tpu.pipeline_mode<synchronous>, transform_indices = @transform_7, window_bounds = array<i64: 32, 32>}, {pipeline_mode = #tpu.pipeline_mode<synchronous>, transform_indices = @transform_8, window_bounds = array<i64: 32, 32>}, {pipeline_mode = #tpu.pipeline_mode<synchronous>, transform_indices = @transform_9, window_bounds = array<i64: 32, 32>}, {pipeline_mode = #tpu.pipeline_mode<synchronous>, transform_indices = @transform_10, window_bounds = array<i64: 32, 32>}, {pipeline_mode = #tpu.pipeline_mode<synchronous>, transform_indices = @transform_11, window_bounds = array<i64: 9, 32>}, {pipeline_mode = #tpu.pipeline_mode<synchronous>, transform_indices = @transform_12, window_bounds = array<i64: 32, 2048>}, {pipeline_mode = #tpu.pipeline_mode<synchronous>, transform_indices = @transform_13, window_bounds = array<i64: 1, 2048>}, {pipeline_mode = #tpu.pipeline_mode<synchronous>, transform_indices = @transform_14, window_bounds = array<i64: 2048, 32>}, {pipeline_mode = #tpu.pipeline_mode<synchronous>, transform_indices = @transform_15, window_bounds = array<i64: 16, 8>}, {pipeline_mode = #tpu.pipeline_mode<synchronous>, transform_indices = @transform_16, window_bounds = array<i64: 16, 32>}, {pipeline_mode = #tpu.pipeline_mode<synchronous>, transform_indices = @transform_17, window_bounds = array<i64: 16, 16>}, {pipeline_mode = #tpu.pipeline_mode<synchronous>, transform_indices = @transform_18, window_bounds = array<i64: 32, 32>}, {pipeline_mode = #tpu.pipeline_mode<synchronous>, transform_indices = @transform_19, window_bounds = array<i64: 32, 32>}, {pipeline_mode = #tpu.pipeline_mode<synchronous>, transform_indices = @transform_20, window_bounds = array<i64: 32, 32>}, {pipeline_mode = #tpu.pipeline_mode<synchronous>, transform_indices = @transform_21, window_bounds = array<i64: 32, 32>}, {pipeline_mode = #tpu.pipeline_mode<synchronous>, transform_indices = @transform_22, window_bounds = array<i64: 9, 32>}, {pipeline_mode = #tpu.pipeline_mode<synchronous>, transform_indices = @transform_23, window_bounds = array<i64: 32, 2048>}, {pipeline_mode = #tpu.pipeline_mode<synchronous>, transform_indices = @transform_24, window_bounds = array<i64: 1, 2048>}, {pipeline_mode = #tpu.pipeline_mode<synchronous>, transform_indices = @transform_25, window_bounds = array<i64: 2048, 32>}, {pipeline_mode = #tpu.pipeline_mode<synchronous>, transform_indices = @transform_26, window_bounds = array<i64: 32, 32>}, {pipeline_mode = #tpu.pipeline_mode<synchronous>, transform_indices = @transform_27, window_bounds = array<i64: 1, 32>}, {transform_indices = @transform_28, window_bounds = array<i64: 16, 32>}]} {
    %c0 = arith.constant 0 : index
    %c0_0 = arith.constant 0 : index
    %0 = vector.load %arg4[%c0, %c0_0] : memref<3x32xf32, #tpu.memory_space<vmem>>, vector<3x32xf32>
    %c0_1 = arith.constant 0 : index
    %c0_2 = arith.constant 0 : index
    %1 = vector.load %arg1[%c0_1, %c0_2] : memref<8x32xf32, #tpu.memory_space<vmem>>, vector<8x32xf32>
    %2 = arith.truncf %1 : vector<8x32xf32> to vector<8x32xbf16>
    %c0_3 = arith.constant 0 : index
    %c0_4 = arith.constant 0 : index
    %3 = vector.load %arg3[%c0_3, %c0_4] : memref<32x32xbf16, #tpu.memory_space<vmem>>, vector<32x32xbf16>
    %cst = arith.constant dense<0.000000e+00> : vector<8x32xf32>
    %4 = tpu.matmul %2, %3, %cst {dimension_numbers = #tpu.dot_dimension_numbers<[1], [0], [0], [1], [0, 0, 1, 1], [], []>} : vector<8x32xbf16>, vector<32x32xbf16>, vector<8x32xf32> -> vector<8x32xf32>
    %5 = vector.extract_strided_slice %0 {offsets = [0, 0], sizes = [1, 32], strides = [1, 1]} : vector<3x32xf32> to vector<1x32xf32>
    %6 = vector.broadcast %5 : vector<1x32xf32> to vector<8x32xf32>
    %7 = arith.addf %4, %6 : vector<8x32xf32>
    %c0_5 = arith.constant 0 : index
    %c0_6 = arith.constant 0 : index
    %8 = vector.load %arg2[%c0_5, %c0_6] : memref<8x32xf32, #tpu.memory_space<vmem>>, vector<8x32xf32>
    %9 = arith.addf %7, %8 : vector<8x32xf32>
    %10 = arith.truncf %9 : vector<8x32xf32> to vector<8x32xbf16>
    %c0_7 = arith.constant 0 : index
    %c0_8 = arith.constant 0 : index
    %11 = vector.load %arg5[%c0_7, %c0_8] : memref<32x32xbf16, #tpu.memory_space<vmem>>, vector<32x32xbf16>
    %cst_9 = arith.constant dense<0.000000e+00> : vector<8x32xf32>
    %12 = tpu.matmul %10, %11, %cst_9 {dimension_numbers = #tpu.dot_dimension_numbers<[1], [0], [0], [1], [0, 0, 1, 1], [], []>} : vector<8x32xbf16>, vector<32x32xbf16>, vector<8x32xf32> -> vector<8x32xf32>
    %13 = vector.extract_strided_slice %0 {offsets = [1, 0], sizes = [1, 32], strides = [1, 1]} : vector<3x32xf32> to vector<1x32xf32>
    %14 = vector.broadcast %13 : vector<1x32xf32> to vector<8x32xf32>
    %15 = arith.addf %12, %14 : vector<8x32xf32>
    %cst_10 = arith.constant 0.000000e+00 : f32
    %16 = vector.broadcast %cst_10 : f32 to vector<8x32xf32>
    %17 = arith.maximumf %15, %16 : vector<8x32xf32>
    %18 = arith.truncf %17 : vector<8x32xf32> to vector<8x32xbf16>
    %c0_11 = arith.constant 0 : index
    %c0_12 = arith.constant 0 : index
    %19 = vector.load %arg6[%c0_11, %c0_12] : memref<32x32xbf16, #tpu.memory_space<vmem>>, vector<32x32xbf16>
    %cst_13 = arith.constant dense<0.000000e+00> : vector<8x32xf32>
    %20 = tpu.matmul %18, %19, %cst_13 {dimension_numbers = #tpu.dot_dimension_numbers<[1], [0], [0], [1], [0, 0, 1, 1], [], []>} : vector<8x32xbf16>, vector<32x32xbf16>, vector<8x32xf32> -> vector<8x32xf32>
    %21 = vector.extract_strided_slice %0 {offsets = [2, 0], sizes = [1, 32], strides = [1, 1]} : vector<3x32xf32> to vector<1x32xf32>
    %22 = vector.broadcast %21 : vector<1x32xf32> to vector<8x32xf32>
    %23 = arith.addf %20, %22 : vector<8x32xf32>
    %cst_14 = arith.constant 0.000000e+00 : f32
    %24 = vector.broadcast %cst_14 : f32 to vector<8x32xf32>
    %25 = arith.maximumf %23, %24 : vector<8x32xf32>
    %26 = arith.addf %9, %25 : vector<8x32xf32>
    %cst_15 = arith.constant 0.000000e+00 : f32
    %27 = vector.broadcast %cst_15 : f32 to vector<8x32xf32>
    %28 = arith.maximumf %26, %27 : vector<8x32xf32>
    %c0_16 = arith.constant 0 : index
    %c0_17 = arith.constant 0 : index
    %29 = vector.load %arg7[%c0_16, %c0_17] : memref<8x8xf32, #tpu.memory_space<vmem>>, vector<8x8xf32>
    %c0_18 = arith.constant 0 : index
    %c0_19 = arith.constant 0 : index
    %30 = vector.load %arg12[%c0_18, %c0_19] : memref<9x32xf32, #tpu.memory_space<vmem>>, vector<9x32xf32>
    %31 = arith.truncf %28 : vector<8x32xf32> to vector<8x32xbf16>
    %c0_20 = arith.constant 0 : index
    %c0_21 = arith.constant 0 : index
    %32 = vector.load %arg8[%c0_20, %c0_21] : memref<32x32xbf16, #tpu.memory_space<vmem>>, vector<32x32xbf16>
    %cst_22 = arith.constant dense<0.000000e+00> : vector<8x32xf32>
    %33 = tpu.matmul %31, %32, %cst_22 {dimension_numbers = #tpu.dot_dimension_numbers<[1], [0], [0], [1], [0, 0, 1, 1], [], []>} : vector<8x32xbf16>, vector<32x32xbf16>, vector<8x32xf32> -> vector<8x32xf32>
    %34 = vector.extract_strided_slice %30 {offsets = [0, 0], sizes = [1, 32], strides = [1, 1]} : vector<9x32xf32> to vector<1x32xf32>
    %35 = vector.broadcast %34 : vector<1x32xf32> to vector<8x32xf32>
    %36 = arith.addf %33, %35 : vector<8x32xf32>
    %c0_23 = arith.constant 0 : index
    %c0_24 = arith.constant 0 : index
    %37 = vector.load %arg9[%c0_23, %c0_24] : memref<32x32xbf16, #tpu.memory_space<vmem>>, vector<32x32xbf16>
    %cst_25 = arith.constant dense<0.000000e+00> : vector<8x32xf32>
    %38 = tpu.matmul %31, %37, %cst_25 {dimension_numbers = #tpu.dot_dimension_numbers<[1], [0], [0], [1], [0, 0, 1, 1], [], []>} : vector<8x32xbf16>, vector<32x32xbf16>, vector<8x32xf32> -> vector<8x32xf32>
    %39 = vector.extract_strided_slice %30 {offsets = [1, 0], sizes = [1, 32], strides = [1, 1]} : vector<9x32xf32> to vector<1x32xf32>
    %40 = vector.broadcast %39 : vector<1x32xf32> to vector<8x32xf32>
    %41 = arith.addf %38, %40 : vector<8x32xf32>
    %c0_26 = arith.constant 0 : index
    %c0_27 = arith.constant 0 : index
    %42 = vector.load %arg10[%c0_26, %c0_27] : memref<32x32xbf16, #tpu.memory_space<vmem>>, vector<32x32xbf16>
    %cst_28 = arith.constant dense<0.000000e+00> : vector<8x32xf32>
    %43 = tpu.matmul %31, %42, %cst_28 {dimension_numbers = #tpu.dot_dimension_numbers<[1], [0], [0], [1], [0, 0, 1, 1], [], []>} : vector<8x32xbf16>, vector<32x32xbf16>, vector<8x32xf32> -> vector<8x32xf32>
    %44 = vector.extract_strided_slice %30 {offsets = [2, 0], sizes = [1, 32], strides = [1, 1]} : vector<9x32xf32> to vector<1x32xf32>
    %45 = vector.broadcast %44 : vector<1x32xf32> to vector<8x32xf32>
    %46 = arith.addf %43, %45 : vector<8x32xf32>
    %cst_29 = arith.constant dense<0.000000e+00> : vector<8x8xf32>
    %47 = tpu.matmul %36, %41, %cst_29 {dimension_numbers = #tpu.dot_dimension_numbers<[1], [1], [0], [0], [0, 0, 1, 0], [], []>} : vector<8x32xf32>, vector<8x32xf32>, vector<8x8xf32> -> vector<8x8xf32>
    %cst_30 = arith.constant 0.176776692 : f32
    %48 = vector.broadcast %cst_30 : f32 to vector<8x8xf32>
    %49 = arith.mulf %47, %48 : vector<8x8xf32>
    %50 = arith.addf %49, %29 : vector<8x8xf32>
    %cst_31 = arith.constant dense<0xFF800000> : vector<8xf32>
    %51 = vector.multi_reduction <maximumf>, %50, %cst_31 [1] : vector<8x8xf32> to vector<8xf32>
    %52 = vector.shape_cast %51 : vector<8xf32> to vector<8x1xf32>
    %53 = vector.broadcast %52 : vector<8x1xf32> to vector<8x8xf32>
    %54 = arith.subf %50, %53 : vector<8x8xf32>
    %55 = math.exp %54 : vector<8x8xf32>
    %cst_32 = arith.constant dense<0.000000e+00> : vector<8xf32>
    %56 = vector.multi_reduction <add>, %55, %cst_32 [1] : vector<8x8xf32> to vector<8xf32>
    %57 = vector.shape_cast %56 : vector<8xf32> to vector<8x1xf32>
    %58 = tpu.reciprocal %57 {approx = true} : vector<8x1xf32> -> vector<8x1xf32>
    %59 = vector.broadcast %58 : vector<8x1xf32> to vector<8x8xf32>
    %60 = arith.mulf %55, %59 : vector<8x8xf32>
    %cst_33 = arith.constant dense<0.000000e+00> : vector<8x32xf32>
    %61 = tpu.matmul %60, %46, %cst_33 {dimension_numbers = #tpu.dot_dimension_numbers<[1], [0], [0], [1], [0, 0, 1, 1], [], []>} : vector<8x8xf32>, vector<8x32xf32>, vector<8x32xf32> -> vector<8x32xf32>
    %62 = arith.truncf %61 : vector<8x32xf32> to vector<8x32xbf16>
    %c0_34 = arith.constant 0 : index
    %c0_35 = arith.constant 0 : index
    %63 = vector.load %arg11[%c0_34, %c0_35] : memref<32x32xbf16, #tpu.memory_space<vmem>>, vector<32x32xbf16>
    %cst_36 = arith.constant dense<0.000000e+00> : vector<8x32xf32>
    %64 = tpu.matmul %62, %63, %cst_36 {dimension_numbers = #tpu.dot_dimension_numbers<[1], [0], [0], [1], [0, 0, 1, 1], [], []>} : vector<8x32xbf16>, vector<32x32xbf16>, vector<8x32xf32> -> vector<8x32xf32>
    %65 = vector.extract_strided_slice %30 {offsets = [3, 0], sizes = [1, 32], strides = [1, 1]} : vector<9x32xf32> to vector<1x32xf32>
    %66 = vector.broadcast %65 : vector<1x32xf32> to vector<8x32xf32>
    %67 = arith.addf %64, %66 : vector<8x32xf32>
    %68 = arith.addf %28, %67 : vector<8x32xf32>
    %69 = vector.extract_strided_slice %30 {offsets = [4, 0], sizes = [1, 32], strides = [1, 1]} : vector<9x32xf32> to vector<1x32xf32>
    %70 = vector.extract_strided_slice %30 {offsets = [5, 0], sizes = [1, 32], strides = [1, 1]} : vector<9x32xf32> to vector<1x32xf32>
    %cst_37 = arith.constant dense<0.000000e+00> : vector<8xf32>
    %71 = vector.multi_reduction <add>, %68, %cst_37 [1] : vector<8x32xf32> to vector<8xf32>
    %72 = vector.shape_cast %71 : vector<8xf32> to vector<8x1xf32>
    %cst_38 = arith.constant 3.200000e+01 : f32
    %73 = vector.broadcast %cst_38 : f32 to vector<8x1xf32>
    %74 = arith.divf %72, %73 : vector<8x1xf32>
    %75 = vector.broadcast %74 : vector<8x1xf32> to vector<8x32xf32>
    %76 = arith.subf %68, %75 : vector<8x32xf32>
    %77 = arith.mulf %76, %76 : vector<8x32xf32>
    %cst_39 = arith.constant dense<0.000000e+00> : vector<8xf32>
    %78 = vector.multi_reduction <add>, %77, %cst_39 [1] : vector<8x32xf32> to vector<8xf32>
    %79 = vector.shape_cast %78 : vector<8xf32> to vector<8x1xf32>
    %cst_40 = arith.constant 3.200000e+01 : f32
    %80 = vector.broadcast %cst_40 : f32 to vector<8x1xf32>
    %81 = arith.divf %79, %80 : vector<8x1xf32>
    %82 = vector.broadcast %74 : vector<8x1xf32> to vector<8x32xf32>
    %83 = arith.subf %68, %82 : vector<8x32xf32>
    %cst_41 = arith.constant 9.99999974E-6 : f32
    %84 = vector.broadcast %cst_41 : f32 to vector<8x1xf32>
    %85 = arith.addf %81, %84 : vector<8x1xf32>
    %86 = math.rsqrt %85 : vector<8x1xf32>
    %87 = vector.broadcast %86 : vector<8x1xf32> to vector<8x32xf32>
    %88 = arith.mulf %83, %87 : vector<8x32xf32>
    %89 = vector.broadcast %69 : vector<1x32xf32> to vector<8x32xf32>
    %90 = arith.mulf %88, %89 : vector<8x32xf32>
    %91 = vector.broadcast %70 : vector<1x32xf32> to vector<8x32xf32>
    %92 = arith.addf %90, %91 : vector<8x32xf32>
    %93 = vector.extract_strided_slice %30 {offsets = [6, 0], sizes = [1, 32], strides = [1, 1]} : vector<9x32xf32> to vector<1x32xf32>
    %94 = arith.truncf %92 : vector<8x32xf32> to vector<8x32xbf16>
    %c0_42 = arith.constant 0 : index
    %c0_43 = arith.constant 0 : index
    %95 = vector.load %arg13[%c0_42, %c0_43] : memref<32x2048xbf16, #tpu.memory_space<vmem>>, vector<32x512xbf16>
    %cst_44 = arith.constant dense<0.000000e+00> : vector<8x512xf32>
    %96 = tpu.matmul %94, %95, %cst_44 {dimension_numbers = #tpu.dot_dimension_numbers<[1], [0], [0], [1], [0, 0, 1, 1], [], []>} : vector<8x32xbf16>, vector<32x512xbf16>, vector<8x512xf32> -> vector<8x512xf32>
    %c0_45 = arith.constant 0 : index
    %c0_46 = arith.constant 0 : index
    %97 = vector.load %arg14[%c0_45, %c0_46] : memref<1x2048xf32, #tpu.memory_space<vmem>>, vector<1x512xf32>
    %98 = vector.broadcast %97 : vector<1x512xf32> to vector<8x512xf32>
    %99 = arith.addf %96, %98 : vector<8x512xf32>
    %cst_47 = arith.constant 0.000000e+00 : f32
    %100 = vector.broadcast %cst_47 : f32 to vector<8x512xf32>
    %101 = arith.maximumf %99, %100 : vector<8x512xf32>
    %102 = arith.truncf %101 : vector<8x512xf32> to vector<8x512xbf16>
    %c0_48 = arith.constant 0 : index
    %c0_49 = arith.constant 0 : index
    %103 = vector.load %arg15[%c0_48, %c0_49] : memref<2048x32xbf16, #tpu.memory_space<vmem>>, vector<512x32xbf16>
    %cst_50 = arith.constant dense<0.000000e+00> : vector<8x32xf32>
    %104 = tpu.matmul %102, %103, %cst_50 {dimension_numbers = #tpu.dot_dimension_numbers<[1], [0], [0], [1], [0, 0, 1, 1], [], []>} : vector<8x512xbf16>, vector<512x32xbf16>, vector<8x32xf32> -> vector<8x32xf32>
    %c0_51 = arith.constant 0 : index
    %c512 = arith.constant 512 : index
    %105 = vector.load %arg13[%c0_51, %c512] : memref<32x2048xbf16, #tpu.memory_space<vmem>>, vector<32x512xbf16>
    %cst_52 = arith.constant dense<0.000000e+00> : vector<8x512xf32>
    %106 = tpu.matmul %94, %105, %cst_52 {dimension_numbers = #tpu.dot_dimension_numbers<[1], [0], [0], [1], [0, 0, 1, 1], [], []>} : vector<8x32xbf16>, vector<32x512xbf16>, vector<8x512xf32> -> vector<8x512xf32>
    %c0_53 = arith.constant 0 : index
    %c512_54 = arith.constant 512 : index
    %107 = vector.load %arg14[%c0_53, %c512_54] : memref<1x2048xf32, #tpu.memory_space<vmem>>, vector<1x512xf32>
    %108 = vector.broadcast %107 : vector<1x512xf32> to vector<8x512xf32>
    %109 = arith.addf %106, %108 : vector<8x512xf32>
    %cst_55 = arith.constant 0.000000e+00 : f32
    %110 = vector.broadcast %cst_55 : f32 to vector<8x512xf32>
    %111 = arith.maximumf %109, %110 : vector<8x512xf32>
    %112 = arith.truncf %111 : vector<8x512xf32> to vector<8x512xbf16>
    %c512_56 = arith.constant 512 : index
    %c0_57 = arith.constant 0 : index
    %113 = vector.load %arg15[%c512_56, %c0_57] : memref<2048x32xbf16, #tpu.memory_space<vmem>>, vector<512x32xbf16>
    %cst_58 = arith.constant dense<0.000000e+00> : vector<8x32xf32>
    %114 = tpu.matmul %112, %113, %cst_58 {dimension_numbers = #tpu.dot_dimension_numbers<[1], [0], [0], [1], [0, 0, 1, 1], [], []>} : vector<8x512xbf16>, vector<512x32xbf16>, vector<8x32xf32> -> vector<8x32xf32>
    %115 = arith.addf %104, %114 : vector<8x32xf32>
    %c0_59 = arith.constant 0 : index
    %c1024 = arith.constant 1024 : index
    %116 = vector.load %arg13[%c0_59, %c1024] : memref<32x2048xbf16, #tpu.memory_space<vmem>>, vector<32x512xbf16>
    %cst_60 = arith.constant dense<0.000000e+00> : vector<8x512xf32>
    %117 = tpu.matmul %94, %116, %cst_60 {dimension_numbers = #tpu.dot_dimension_numbers<[1], [0], [0], [1], [0, 0, 1, 1], [], []>} : vector<8x32xbf16>, vector<32x512xbf16>, vector<8x512xf32> -> vector<8x512xf32>
    %c0_61 = arith.constant 0 : index
    %c1024_62 = arith.constant 1024 : index
    %118 = vector.load %arg14[%c0_61, %c1024_62] : memref<1x2048xf32, #tpu.memory_space<vmem>>, vector<1x512xf32>
    %119 = vector.broadcast %118 : vector<1x512xf32> to vector<8x512xf32>
    %120 = arith.addf %117, %119 : vector<8x512xf32>
    %cst_63 = arith.constant 0.000000e+00 : f32
    %121 = vector.broadcast %cst_63 : f32 to vector<8x512xf32>
    %122 = arith.maximumf %120, %121 : vector<8x512xf32>
    %123 = arith.truncf %122 : vector<8x512xf32> to vector<8x512xbf16>
    %c1024_64 = arith.constant 1024 : index
    %c0_65 = arith.constant 0 : index
    %124 = vector.load %arg15[%c1024_64, %c0_65] : memref<2048x32xbf16, #tpu.memory_space<vmem>>, vector<512x32xbf16>
    %cst_66 = arith.constant dense<0.000000e+00> : vector<8x32xf32>
    %125 = tpu.matmul %123, %124, %cst_66 {dimension_numbers = #tpu.dot_dimension_numbers<[1], [0], [0], [1], [0, 0, 1, 1], [], []>} : vector<8x512xbf16>, vector<512x32xbf16>, vector<8x32xf32> -> vector<8x32xf32>
    %126 = arith.addf %115, %125 : vector<8x32xf32>
    %c0_67 = arith.constant 0 : index
    %c1536 = arith.constant 1536 : index
    %127 = vector.load %arg13[%c0_67, %c1536] : memref<32x2048xbf16, #tpu.memory_space<vmem>>, vector<32x512xbf16>
    %cst_68 = arith.constant dense<0.000000e+00> : vector<8x512xf32>
    %128 = tpu.matmul %94, %127, %cst_68 {dimension_numbers = #tpu.dot_dimension_numbers<[1], [0], [0], [1], [0, 0, 1, 1], [], []>} : vector<8x32xbf16>, vector<32x512xbf16>, vector<8x512xf32> -> vector<8x512xf32>
    %c0_69 = arith.constant 0 : index
    %c1536_70 = arith.constant 1536 : index
    %129 = vector.load %arg14[%c0_69, %c1536_70] : memref<1x2048xf32, #tpu.memory_space<vmem>>, vector<1x512xf32>
    %130 = vector.broadcast %129 : vector<1x512xf32> to vector<8x512xf32>
    %131 = arith.addf %128, %130 : vector<8x512xf32>
    %cst_71 = arith.constant 0.000000e+00 : f32
    %132 = vector.broadcast %cst_71 : f32 to vector<8x512xf32>
    %133 = arith.maximumf %131, %132 : vector<8x512xf32>
    %134 = arith.truncf %133 : vector<8x512xf32> to vector<8x512xbf16>
    %c1536_72 = arith.constant 1536 : index
    %c0_73 = arith.constant 0 : index
    %135 = vector.load %arg15[%c1536_72, %c0_73] : memref<2048x32xbf16, #tpu.memory_space<vmem>>, vector<512x32xbf16>
    %cst_74 = arith.constant dense<0.000000e+00> : vector<8x32xf32>
    %136 = tpu.matmul %134, %135, %cst_74 {dimension_numbers = #tpu.dot_dimension_numbers<[1], [0], [0], [1], [0, 0, 1, 1], [], []>} : vector<8x512xbf16>, vector<512x32xbf16>, vector<8x32xf32> -> vector<8x32xf32>
    %137 = arith.addf %126, %136 : vector<8x32xf32>
    %138 = vector.broadcast %93 : vector<1x32xf32> to vector<8x32xf32>
    %139 = arith.addf %137, %138 : vector<8x32xf32>
    %140 = arith.addf %92, %139 : vector<8x32xf32>
    %141 = vector.extract_strided_slice %30 {offsets = [7, 0], sizes = [1, 32], strides = [1, 1]} : vector<9x32xf32> to vector<1x32xf32>
    %142 = vector.extract_strided_slice %30 {offsets = [8, 0], sizes = [1, 32], strides = [1, 1]} : vector<9x32xf32> to vector<1x32xf32>
    %cst_75 = arith.constant dense<0.000000e+00> : vector<8xf32>
    %143 = vector.multi_reduction <add>, %140, %cst_75 [1] : vector<8x32xf32> to vector<8xf32>
    %144 = vector.shape_cast %143 : vector<8xf32> to vector<8x1xf32>
    %cst_76 = arith.constant 3.200000e+01 : f32
    %145 = vector.broadcast %cst_76 : f32 to vector<8x1xf32>
    %146 = arith.divf %144, %145 : vector<8x1xf32>
    %147 = vector.broadcast %146 : vector<8x1xf32> to vector<8x32xf32>
    %148 = arith.subf %140, %147 : vector<8x32xf32>
    %149 = arith.mulf %148, %148 : vector<8x32xf32>
    %cst_77 = arith.constant dense<0.000000e+00> : vector<8xf32>
    %150 = vector.multi_reduction <add>, %149, %cst_77 [1] : vector<8x32xf32> to vector<8xf32>
    %151 = vector.shape_cast %150 : vector<8xf32> to vector<8x1xf32>
    %cst_78 = arith.constant 3.200000e+01 : f32
    %152 = vector.broadcast %cst_78 : f32 to vector<8x1xf32>
    %153 = arith.divf %151, %152 : vector<8x1xf32>
    %154 = vector.broadcast %146 : vector<8x1xf32> to vector<8x32xf32>
    %155 = arith.subf %140, %154 : vector<8x32xf32>
    %cst_79 = arith.constant 9.99999974E-6 : f32
    %156 = vector.broadcast %cst_79 : f32 to vector<8x1xf32>
    %157 = arith.addf %153, %156 : vector<8x1xf32>
    %158 = math.rsqrt %157 : vector<8x1xf32>
    %159 = vector.broadcast %158 : vector<8x1xf32> to vector<8x32xf32>
    %160 = arith.mulf %155, %159 : vector<8x32xf32>
    %161 = vector.broadcast %141 : vector<1x32xf32> to vector<8x32xf32>
    %162 = arith.mulf %160, %161 : vector<8x32xf32>
    %163 = vector.broadcast %142 : vector<1x32xf32> to vector<8x32xf32>
    %164 = arith.addf %162, %163 : vector<8x32xf32>
    %c0_80 = arith.constant 0 : index
    %c0_81 = arith.constant 0 : index
    %165 = vector.load %arg16[%c0_80, %c0_81] : memref<16x8xf32, #tpu.memory_space<vmem>>, vector<16x8xf32>
    %cst_82 = arith.constant dense<0.000000e+00> : vector<16x32xf32>
    %166 = tpu.matmul %165, %164, %cst_82 {dimension_numbers = #tpu.dot_dimension_numbers<[1], [0], [0], [1], [0, 0, 1, 1], [], []>} : vector<16x8xf32>, vector<8x32xf32>, vector<16x32xf32> -> vector<16x32xf32>
    %c0_83 = arith.constant 0 : index
    %c0_84 = arith.constant 0 : index
    %167 = vector.load %arg17[%c0_83, %c0_84] : memref<16x32xf32, #tpu.memory_space<vmem>>, vector<16x32xf32>
    %168 = arith.addf %166, %167 : vector<16x32xf32>
    %c0_85 = arith.constant 0 : index
    %c0_86 = arith.constant 0 : index
    %169 = vector.load %arg18[%c0_85, %c0_86] : memref<16x16xf32, #tpu.memory_space<vmem>>, vector<16x16xf32>
    %c0_87 = arith.constant 0 : index
    %c0_88 = arith.constant 0 : index
    %170 = vector.load %arg23[%c0_87, %c0_88] : memref<9x32xf32, #tpu.memory_space<vmem>>, vector<9x32xf32>
    %171 = arith.truncf %168 : vector<16x32xf32> to vector<16x32xbf16>
    %c0_89 = arith.constant 0 : index
    %c0_90 = arith.constant 0 : index
    %172 = vector.load %arg19[%c0_89, %c0_90] : memref<32x32xbf16, #tpu.memory_space<vmem>>, vector<32x32xbf16>
    %cst_91 = arith.constant dense<0.000000e+00> : vector<16x32xf32>
    %173 = tpu.matmul %171, %172, %cst_91 {dimension_numbers = #tpu.dot_dimension_numbers<[1], [0], [0], [1], [0, 0, 1, 1], [], []>} : vector<16x32xbf16>, vector<32x32xbf16>, vector<16x32xf32> -> vector<16x32xf32>
    %174 = vector.extract_strided_slice %170 {offsets = [0, 0], sizes = [1, 32], strides = [1, 1]} : vector<9x32xf32> to vector<1x32xf32>
    %175 = vector.broadcast %174 : vector<1x32xf32> to vector<16x32xf32>
    %176 = arith.addf %173, %175 : vector<16x32xf32>
    %c0_92 = arith.constant 0 : index
    %c0_93 = arith.constant 0 : index
    %177 = vector.load %arg20[%c0_92, %c0_93] : memref<32x32xbf16, #tpu.memory_space<vmem>>, vector<32x32xbf16>
    %cst_94 = arith.constant dense<0.000000e+00> : vector<16x32xf32>
    %178 = tpu.matmul %171, %177, %cst_94 {dimension_numbers = #tpu.dot_dimension_numbers<[1], [0], [0], [1], [0, 0, 1, 1], [], []>} : vector<16x32xbf16>, vector<32x32xbf16>, vector<16x32xf32> -> vector<16x32xf32>
    %179 = vector.extract_strided_slice %170 {offsets = [1, 0], sizes = [1, 32], strides = [1, 1]} : vector<9x32xf32> to vector<1x32xf32>
    %180 = vector.broadcast %179 : vector<1x32xf32> to vector<16x32xf32>
    %181 = arith.addf %178, %180 : vector<16x32xf32>
    %c0_95 = arith.constant 0 : index
    %c0_96 = arith.constant 0 : index
    %182 = vector.load %arg21[%c0_95, %c0_96] : memref<32x32xbf16, #tpu.memory_space<vmem>>, vector<32x32xbf16>
    %cst_97 = arith.constant dense<0.000000e+00> : vector<16x32xf32>
    %183 = tpu.matmul %171, %182, %cst_97 {dimension_numbers = #tpu.dot_dimension_numbers<[1], [0], [0], [1], [0, 0, 1, 1], [], []>} : vector<16x32xbf16>, vector<32x32xbf16>, vector<16x32xf32> -> vector<16x32xf32>
    %184 = vector.extract_strided_slice %170 {offsets = [2, 0], sizes = [1, 32], strides = [1, 1]} : vector<9x32xf32> to vector<1x32xf32>
    %185 = vector.broadcast %184 : vector<1x32xf32> to vector<16x32xf32>
    %186 = arith.addf %183, %185 : vector<16x32xf32>
    %cst_98 = arith.constant dense<0.000000e+00> : vector<16x16xf32>
    %187 = tpu.matmul %176, %181, %cst_98 {dimension_numbers = #tpu.dot_dimension_numbers<[1], [1], [0], [0], [0, 0, 1, 0], [], []>} : vector<16x32xf32>, vector<16x32xf32>, vector<16x16xf32> -> vector<16x16xf32>
    %cst_99 = arith.constant 0.176776692 : f32
    %188 = vector.broadcast %cst_99 : f32 to vector<16x16xf32>
    %189 = arith.mulf %187, %188 : vector<16x16xf32>
    %190 = arith.addf %189, %169 : vector<16x16xf32>
    %cst_100 = arith.constant dense<0xFF800000> : vector<16xf32>
    %191 = vector.multi_reduction <maximumf>, %190, %cst_100 [1] : vector<16x16xf32> to vector<16xf32>
    %192 = vector.shape_cast %191 : vector<16xf32> to vector<16x1xf32>
    %193 = vector.broadcast %192 : vector<16x1xf32> to vector<16x16xf32>
    %194 = arith.subf %190, %193 : vector<16x16xf32>
    %195 = math.exp %194 : vector<16x16xf32>
    %cst_101 = arith.constant dense<0.000000e+00> : vector<16xf32>
    %196 = vector.multi_reduction <add>, %195, %cst_101 [1] : vector<16x16xf32> to vector<16xf32>
    %197 = vector.shape_cast %196 : vector<16xf32> to vector<16x1xf32>
    %198 = tpu.reciprocal %197 {approx = true} : vector<16x1xf32> -> vector<16x1xf32>
    %199 = vector.broadcast %198 : vector<16x1xf32> to vector<16x16xf32>
    %200 = arith.mulf %195, %199 : vector<16x16xf32>
    %cst_102 = arith.constant dense<0.000000e+00> : vector<16x32xf32>
    %201 = tpu.matmul %200, %186, %cst_102 {dimension_numbers = #tpu.dot_dimension_numbers<[1], [0], [0], [1], [0, 0, 1, 1], [], []>} : vector<16x16xf32>, vector<16x32xf32>, vector<16x32xf32> -> vector<16x32xf32>
    %202 = arith.truncf %201 : vector<16x32xf32> to vector<16x32xbf16>
    %c0_103 = arith.constant 0 : index
    %c0_104 = arith.constant 0 : index
    %203 = vector.load %arg22[%c0_103, %c0_104] : memref<32x32xbf16, #tpu.memory_space<vmem>>, vector<32x32xbf16>
    %cst_105 = arith.constant dense<0.000000e+00> : vector<16x32xf32>
    %204 = tpu.matmul %202, %203, %cst_105 {dimension_numbers = #tpu.dot_dimension_numbers<[1], [0], [0], [1], [0, 0, 1, 1], [], []>} : vector<16x32xbf16>, vector<32x32xbf16>, vector<16x32xf32> -> vector<16x32xf32>
    %205 = vector.extract_strided_slice %170 {offsets = [3, 0], sizes = [1, 32], strides = [1, 1]} : vector<9x32xf32> to vector<1x32xf32>
    %206 = vector.broadcast %205 : vector<1x32xf32> to vector<16x32xf32>
    %207 = arith.addf %204, %206 : vector<16x32xf32>
    %208 = arith.addf %168, %207 : vector<16x32xf32>
    %209 = vector.extract_strided_slice %170 {offsets = [4, 0], sizes = [1, 32], strides = [1, 1]} : vector<9x32xf32> to vector<1x32xf32>
    %210 = vector.extract_strided_slice %170 {offsets = [5, 0], sizes = [1, 32], strides = [1, 1]} : vector<9x32xf32> to vector<1x32xf32>
    %cst_106 = arith.constant dense<0.000000e+00> : vector<16xf32>
    %211 = vector.multi_reduction <add>, %208, %cst_106 [1] : vector<16x32xf32> to vector<16xf32>
    %212 = vector.shape_cast %211 : vector<16xf32> to vector<16x1xf32>
    %cst_107 = arith.constant 3.200000e+01 : f32
    %213 = vector.broadcast %cst_107 : f32 to vector<16x1xf32>
    %214 = arith.divf %212, %213 : vector<16x1xf32>
    %215 = vector.broadcast %214 : vector<16x1xf32> to vector<16x32xf32>
    %216 = arith.subf %208, %215 : vector<16x32xf32>
    %217 = arith.mulf %216, %216 : vector<16x32xf32>
    %cst_108 = arith.constant dense<0.000000e+00> : vector<16xf32>
    %218 = vector.multi_reduction <add>, %217, %cst_108 [1] : vector<16x32xf32> to vector<16xf32>
    %219 = vector.shape_cast %218 : vector<16xf32> to vector<16x1xf32>
    %cst_109 = arith.constant 3.200000e+01 : f32
    %220 = vector.broadcast %cst_109 : f32 to vector<16x1xf32>
    %221 = arith.divf %219, %220 : vector<16x1xf32>
    %222 = vector.broadcast %214 : vector<16x1xf32> to vector<16x32xf32>
    %223 = arith.subf %208, %222 : vector<16x32xf32>
    %cst_110 = arith.constant 9.99999974E-6 : f32
    %224 = vector.broadcast %cst_110 : f32 to vector<16x1xf32>
    %225 = arith.addf %221, %224 : vector<16x1xf32>
    %226 = math.rsqrt %225 : vector<16x1xf32>
    %227 = vector.broadcast %226 : vector<16x1xf32> to vector<16x32xf32>
    %228 = arith.mulf %223, %227 : vector<16x32xf32>
    %229 = vector.broadcast %209 : vector<1x32xf32> to vector<16x32xf32>
    %230 = arith.mulf %228, %229 : vector<16x32xf32>
    %231 = vector.broadcast %210 : vector<1x32xf32> to vector<16x32xf32>
    %232 = arith.addf %230, %231 : vector<16x32xf32>
    %233 = vector.extract_strided_slice %170 {offsets = [6, 0], sizes = [1, 32], strides = [1, 1]} : vector<9x32xf32> to vector<1x32xf32>
    %234 = arith.truncf %232 : vector<16x32xf32> to vector<16x32xbf16>
    %c0_111 = arith.constant 0 : index
    %c0_112 = arith.constant 0 : index
    %235 = vector.load %arg24[%c0_111, %c0_112] : memref<32x2048xbf16, #tpu.memory_space<vmem>>, vector<32x512xbf16>
    %cst_113 = arith.constant dense<0.000000e+00> : vector<16x512xf32>
    %236 = tpu.matmul %234, %235, %cst_113 {dimension_numbers = #tpu.dot_dimension_numbers<[1], [0], [0], [1], [0, 0, 1, 1], [], []>} : vector<16x32xbf16>, vector<32x512xbf16>, vector<16x512xf32> -> vector<16x512xf32>
    %c0_114 = arith.constant 0 : index
    %c0_115 = arith.constant 0 : index
    %237 = vector.load %arg25[%c0_114, %c0_115] : memref<1x2048xf32, #tpu.memory_space<vmem>>, vector<1x512xf32>
    %238 = vector.broadcast %237 : vector<1x512xf32> to vector<16x512xf32>
    %239 = arith.addf %236, %238 : vector<16x512xf32>
    %cst_116 = arith.constant 0.000000e+00 : f32
    %240 = vector.broadcast %cst_116 : f32 to vector<16x512xf32>
    %241 = arith.maximumf %239, %240 : vector<16x512xf32>
    %242 = arith.truncf %241 : vector<16x512xf32> to vector<16x512xbf16>
    %c0_117 = arith.constant 0 : index
    %c0_118 = arith.constant 0 : index
    %243 = vector.load %arg26[%c0_117, %c0_118] : memref<2048x32xbf16, #tpu.memory_space<vmem>>, vector<512x32xbf16>
    %cst_119 = arith.constant dense<0.000000e+00> : vector<16x32xf32>
    %244 = tpu.matmul %242, %243, %cst_119 {dimension_numbers = #tpu.dot_dimension_numbers<[1], [0], [0], [1], [0, 0, 1, 1], [], []>} : vector<16x512xbf16>, vector<512x32xbf16>, vector<16x32xf32> -> vector<16x32xf32>
    %c0_120 = arith.constant 0 : index
    %c512_121 = arith.constant 512 : index
    %245 = vector.load %arg24[%c0_120, %c512_121] : memref<32x2048xbf16, #tpu.memory_space<vmem>>, vector<32x512xbf16>
    %cst_122 = arith.constant dense<0.000000e+00> : vector<16x512xf32>
    %246 = tpu.matmul %234, %245, %cst_122 {dimension_numbers = #tpu.dot_dimension_numbers<[1], [0], [0], [1], [0, 0, 1, 1], [], []>} : vector<16x32xbf16>, vector<32x512xbf16>, vector<16x512xf32> -> vector<16x512xf32>
    %c0_123 = arith.constant 0 : index
    %c512_124 = arith.constant 512 : index
    %247 = vector.load %arg25[%c0_123, %c512_124] : memref<1x2048xf32, #tpu.memory_space<vmem>>, vector<1x512xf32>
    %248 = vector.broadcast %247 : vector<1x512xf32> to vector<16x512xf32>
    %249 = arith.addf %246, %248 : vector<16x512xf32>
    %cst_125 = arith.constant 0.000000e+00 : f32
    %250 = vector.broadcast %cst_125 : f32 to vector<16x512xf32>
    %251 = arith.maximumf %249, %250 : vector<16x512xf32>
    %252 = arith.truncf %251 : vector<16x512xf32> to vector<16x512xbf16>
    %c512_126 = arith.constant 512 : index
    %c0_127 = arith.constant 0 : index
    %253 = vector.load %arg26[%c512_126, %c0_127] : memref<2048x32xbf16, #tpu.memory_space<vmem>>, vector<512x32xbf16>
    %cst_128 = arith.constant dense<0.000000e+00> : vector<16x32xf32>
    %254 = tpu.matmul %252, %253, %cst_128 {dimension_numbers = #tpu.dot_dimension_numbers<[1], [0], [0], [1], [0, 0, 1, 1], [], []>} : vector<16x512xbf16>, vector<512x32xbf16>, vector<16x32xf32> -> vector<16x32xf32>
    %255 = arith.addf %244, %254 : vector<16x32xf32>
    %c0_129 = arith.constant 0 : index
    %c1024_130 = arith.constant 1024 : index
    %256 = vector.load %arg24[%c0_129, %c1024_130] : memref<32x2048xbf16, #tpu.memory_space<vmem>>, vector<32x512xbf16>
    %cst_131 = arith.constant dense<0.000000e+00> : vector<16x512xf32>
    %257 = tpu.matmul %234, %256, %cst_131 {dimension_numbers = #tpu.dot_dimension_numbers<[1], [0], [0], [1], [0, 0, 1, 1], [], []>} : vector<16x32xbf16>, vector<32x512xbf16>, vector<16x512xf32> -> vector<16x512xf32>
    %c0_132 = arith.constant 0 : index
    %c1024_133 = arith.constant 1024 : index
    %258 = vector.load %arg25[%c0_132, %c1024_133] : memref<1x2048xf32, #tpu.memory_space<vmem>>, vector<1x512xf32>
    %259 = vector.broadcast %258 : vector<1x512xf32> to vector<16x512xf32>
    %260 = arith.addf %257, %259 : vector<16x512xf32>
    %cst_134 = arith.constant 0.000000e+00 : f32
    %261 = vector.broadcast %cst_134 : f32 to vector<16x512xf32>
    %262 = arith.maximumf %260, %261 : vector<16x512xf32>
    %263 = arith.truncf %262 : vector<16x512xf32> to vector<16x512xbf16>
    %c1024_135 = arith.constant 1024 : index
    %c0_136 = arith.constant 0 : index
    %264 = vector.load %arg26[%c1024_135, %c0_136] : memref<2048x32xbf16, #tpu.memory_space<vmem>>, vector<512x32xbf16>
    %cst_137 = arith.constant dense<0.000000e+00> : vector<16x32xf32>
    %265 = tpu.matmul %263, %264, %cst_137 {dimension_numbers = #tpu.dot_dimension_numbers<[1], [0], [0], [1], [0, 0, 1, 1], [], []>} : vector<16x512xbf16>, vector<512x32xbf16>, vector<16x32xf32> -> vector<16x32xf32>
    %266 = arith.addf %255, %265 : vector<16x32xf32>
    %c0_138 = arith.constant 0 : index
    %c1536_139 = arith.constant 1536 : index
    %267 = vector.load %arg24[%c0_138, %c1536_139] : memref<32x2048xbf16, #tpu.memory_space<vmem>>, vector<32x512xbf16>
    %cst_140 = arith.constant dense<0.000000e+00> : vector<16x512xf32>
    %268 = tpu.matmul %234, %267, %cst_140 {dimension_numbers = #tpu.dot_dimension_numbers<[1], [0], [0], [1], [0, 0, 1, 1], [], []>} : vector<16x32xbf16>, vector<32x512xbf16>, vector<16x512xf32> -> vector<16x512xf32>
    %c0_141 = arith.constant 0 : index
    %c1536_142 = arith.constant 1536 : index
    %269 = vector.load %arg25[%c0_141, %c1536_142] : memref<1x2048xf32, #tpu.memory_space<vmem>>, vector<1x512xf32>
    %270 = vector.broadcast %269 : vector<1x512xf32> to vector<16x512xf32>
    %271 = arith.addf %268, %270 : vector<16x512xf32>
    %cst_143 = arith.constant 0.000000e+00 : f32
    %272 = vector.broadcast %cst_143 : f32 to vector<16x512xf32>
    %273 = arith.maximumf %271, %272 : vector<16x512xf32>
    %274 = arith.truncf %273 : vector<16x512xf32> to vector<16x512xbf16>
    %c1536_144 = arith.constant 1536 : index
    %c0_145 = arith.constant 0 : index
    %275 = vector.load %arg26[%c1536_144, %c0_145] : memref<2048x32xbf16, #tpu.memory_space<vmem>>, vector<512x32xbf16>
    %cst_146 = arith.constant dense<0.000000e+00> : vector<16x32xf32>
    %276 = tpu.matmul %274, %275, %cst_146 {dimension_numbers = #tpu.dot_dimension_numbers<[1], [0], [0], [1], [0, 0, 1, 1], [], []>} : vector<16x512xbf16>, vector<512x32xbf16>, vector<16x32xf32> -> vector<16x32xf32>
    %277 = arith.addf %266, %276 : vector<16x32xf32>
    %278 = vector.broadcast %233 : vector<1x32xf32> to vector<16x32xf32>
    %279 = arith.addf %277, %278 : vector<16x32xf32>
    %280 = arith.addf %232, %279 : vector<16x32xf32>
    %281 = vector.extract_strided_slice %170 {offsets = [7, 0], sizes = [1, 32], strides = [1, 1]} : vector<9x32xf32> to vector<1x32xf32>
    %282 = vector.extract_strided_slice %170 {offsets = [8, 0], sizes = [1, 32], strides = [1, 1]} : vector<9x32xf32> to vector<1x32xf32>
    %cst_147 = arith.constant dense<0.000000e+00> : vector<16xf32>
    %283 = vector.multi_reduction <add>, %280, %cst_147 [1] : vector<16x32xf32> to vector<16xf32>
    %284 = vector.shape_cast %283 : vector<16xf32> to vector<16x1xf32>
    %cst_148 = arith.constant 3.200000e+01 : f32
    %285 = vector.broadcast %cst_148 : f32 to vector<16x1xf32>
    %286 = arith.divf %284, %285 : vector<16x1xf32>
    %287 = vector.broadcast %286 : vector<16x1xf32> to vector<16x32xf32>
    %288 = arith.subf %280, %287 : vector<16x32xf32>
    %289 = arith.mulf %288, %288 : vector<16x32xf32>
    %cst_149 = arith.constant dense<0.000000e+00> : vector<16xf32>
    %290 = vector.multi_reduction <add>, %289, %cst_149 [1] : vector<16x32xf32> to vector<16xf32>
    %291 = vector.shape_cast %290 : vector<16xf32> to vector<16x1xf32>
    %cst_150 = arith.constant 3.200000e+01 : f32
    %292 = vector.broadcast %cst_150 : f32 to vector<16x1xf32>
    %293 = arith.divf %291, %292 : vector<16x1xf32>
    %294 = vector.broadcast %286 : vector<16x1xf32> to vector<16x32xf32>
    %295 = arith.subf %280, %294 : vector<16x32xf32>
    %cst_151 = arith.constant 9.99999974E-6 : f32
    %296 = vector.broadcast %cst_151 : f32 to vector<16x1xf32>
    %297 = arith.addf %293, %296 : vector<16x1xf32>
    %298 = math.rsqrt %297 : vector<16x1xf32>
    %299 = vector.broadcast %298 : vector<16x1xf32> to vector<16x32xf32>
    %300 = arith.mulf %295, %299 : vector<16x32xf32>
    %301 = vector.broadcast %281 : vector<1x32xf32> to vector<16x32xf32>
    %302 = arith.mulf %300, %301 : vector<16x32xf32>
    %303 = vector.broadcast %282 : vector<1x32xf32> to vector<16x32xf32>
    %304 = arith.addf %302, %303 : vector<16x32xf32>
    %c0_152 = arith.constant 0 : index
    %c0_153 = arith.constant 0 : index
    %305 = vector.load %arg27[%c0_152, %c0_153] : memref<32x32xf32, #tpu.memory_space<vmem>>, vector<32x32xf32>
    %cst_154 = arith.constant dense<0.000000e+00> : vector<16x32xf32>
    %306 = tpu.matmul %304, %305, %cst_154 {dimension_numbers = #tpu.dot_dimension_numbers<[1], [0], [0], [1], [0, 0, 1, 1], [], []>} : vector<16x32xf32>, vector<32x32xf32>, vector<16x32xf32> -> vector<16x32xf32>
    %c0_155 = arith.constant 0 : index
    %c0_156 = arith.constant 0 : index
    %307 = vector.load %arg28[%c0_155, %c0_156] : memref<1x32xf32, #tpu.memory_space<vmem>>, vector<1x32xf32>
    %308 = vector.broadcast %307 : vector<1x32xf32> to vector<16x32xf32>
    %309 = arith.addf %306, %308 : vector<16x32xf32>
    %c0_157 = arith.constant 0 : index
    %c0_158 = arith.constant 0 : index
    %310 = vector.load %arg29[%c0_157, %c0_158] : memref<16x32xf32, #tpu.memory_space<vmem>>, vector<16x32xf32>
    tpu.vector_store %arg29[%c0_157, %c0_158], %309 {strides = array<i32>} : memref<16x32xf32, #tpu.memory_space<vmem>>, vector<16x32xf32>,
    return
  }
  func.func @transform_0(%arg0: i32) -> (i32, i32) {
    %c0_i32 = arith.constant 0 : i32
    %c0_i32_0 = arith.constant 0 : i32
    return %arg0, %c0_i32 : i32, i32
  }
  func.func @transform_1(%arg0: i32) -> (i32, i32) {
    %c0_i32 = arith.constant 0 : i32
    %c0_i32_0 = arith.constant 0 : i32
    %c0_i32_1 = arith.constant 0 : i32
    return %c0_i32, %c0_i32_0 : i32, i32
  }
  func.func @transform_2(%arg0: i32) -> (i32, i32) {
    %c0_i32 = arith.constant 0 : i32
    %c0_i32_0 = arith.constant 0 : i32
    %c0_i32_1 = arith.constant 0 : i32
    return %c0_i32, %c0_i32_0 : i32, i32
  }
  func.func @transform_3(%arg0: i32) -> (i32, i32) {
    %c0_i32 = arith.constant 0 : i32
    %c0_i32_0 = arith.constant 0 : i32
    %c0_i32_1 = arith.constant 0 : i32
    return %c0_i32, %c0_i32_0 : i32, i32
  }
  func.func @transform_4(%arg0: i32) -> (i32, i32) {
    %c0_i32 = arith.constant 0 : i32
    %c0_i32_0 = arith.constant 0 : i32
    %c0_i32_1 = arith.constant 0 : i32
    return %c0_i32, %c0_i32_0 : i32, i32
  }
  func.func @transform_5(%arg0: i32) -> (i32, i32) {
    %c0_i32 = arith.constant 0 : i32
    %c0_i32_0 = arith.constant 0 : i32
    %c0_i32_1 = arith.constant 0 : i32
    return %c0_i32, %c0_i32_0 : i32, i32
  }
  func.func @transform_6(%arg0: i32) -> (i32, i32) {
    %c0_i32 = arith.constant 0 : i32
    %c0_i32_0 = arith.constant 0 : i32
    %c0_i32_1 = arith.constant 0 : i32
    return %c0_i32, %c0_i32_0 : i32, i32
  }
  func.func @transform_7(%arg0: i32) -> (i32, i32) {
    %c0_i32 = arith.constant 0 : i32
    %c0_i32_0 = arith.constant 0 : i32
    %c0_i32_1 = arith.constant 0 : i32
    return %c0_i32, %c0_i32_0 : i32, i32
  }
  func.func @transform_8(%arg0: i32) -> (i32, i32) {
    %c0_i32 = arith.constant 0 : i32
    %c0_i32_0 = arith.constant 0 : i32
    %c0_i32_1 = arith.constant 0 : i32
    return %c0_i32, %c0_i32_0 : i32, i32
  }
  func.func @transform_9(%arg0: i32) -> (i32, i32) {
    %c0_i32 = arith.constant 0 : i32
    %c0_i32_0 = arith.constant 0 : i32
    %c0_i32_1 = arith.constant 0 : i32
    return %c0_i32, %c0_i32_0 : i32, i32
  }
  func.func @transform_10(%arg0: i32) -> (i32, i32) {
    %c0_i32 = arith.constant 0 : i32
    %c0_i32_0 = arith.constant 0 : i32
    %c0_i32_1 = arith.constant 0 : i32
    return %c0_i32, %c0_i32_0 : i32, i32
  }
  func.func @transform_11(%arg0: i32) -> (i32, i32) {
    %c0_i32 = arith.constant 0 : i32
    %c0_i32_0 = arith.constant 0 : i32
    %c0_i32_1 = arith.constant 0 : i32
    return %c0_i32, %c0_i32_0 : i32, i32
  }
  func.func @transform_12(%arg0: i32) -> (i32, i32) {
    %c0_i32 = arith.constant 0 : i32
    %c0_i32_0 = arith.constant 0 : i32
    %c0_i32_1 = arith.constant 0 : i32
    return %c0_i32, %c0_i32_0 : i32, i32
  }
  func.func @transform_13(%arg0: i32) -> (i32, i32) {
    %c0_i32 = arith.constant 0 : i32
    %c0_i32_0 = arith.constant 0 : i32
    %c0_i32_1 = arith.constant 0 : i32
    return %c0_i32, %c0_i32_0 : i32, i32
  }
  func.func @transform_14(%arg0: i32) -> (i32, i32) {
    %c0_i32 = arith.constant 0 : i32
    %c0_i32_0 = arith.constant 0 : i32
    %c0_i32_1 = arith.constant 0 : i32
    return %c0_i32, %c0_i32_0 : i32, i32
  }
  func.func @transform_15(%arg0: i32) -> (i32, i32) {
    %c0_i32 = arith.constant 0 : i32
    %c0_i32_0 = arith.constant 0 : i32
    %c0_i32_1 = arith.constant 0 : i32
    return %c0_i32, %c0_i32_0 : i32, i32
  }
  func.func @transform_16(%arg0: i32) -> (i32, i32) {
    %c0_i32 = arith.constant 0 : i32
    %c0_i32_0 = arith.constant 0 : i32
    %c0_i32_1 = arith.constant 0 : i32
    return %c0_i32, %c0_i32_0 : i32, i32
  }
  func.func @transform_17(%arg0: i32) -> (i32, i32) {
    %c0_i32 = arith.constant 0 : i32
    %c0_i32_0 = arith.constant 0 : i32
    %c0_i32_1 = arith.constant 0 : i32
    return %c0_i32, %c0_i32_0 : i32, i32
  }
  func.func @transform_18(%arg0: i32) -> (i32, i32) {
    %c0_i32 = arith.constant 0 : i32
    %c0_i32_0 = arith.constant 0 : i32
    %c0_i32_1 = arith.constant 0 : i32
    return %c0_i32, %c0_i32_0 : i32, i32
  }
  func.func @transform_19(%arg0: i32) -> (i32, i32) {
    %c0_i32 = arith.constant 0 : i32
    %c0_i32_0 = arith.constant 0 : i32
    %c0_i32_1 = arith.constant 0 : i32
    return %c0_i32, %c0_i32_0 : i32, i32
  }
  func.func @transform_20(%arg0: i32) -> (i32, i32) {
    %c0_i32 = arith.constant 0 : i32
    %c0_i32_0 = arith.constant 0 : i32
    %c0_i32_1 = arith.constant 0 : i32
    return %c0_i32, %c0_i32_0 : i32, i32
  }
  func.func @transform_21(%arg0: i32) -> (i32, i32) {
    %c0_i32 = arith.constant 0 : i32
    %c0_i32_0 = arith.constant 0 : i32
    %c0_i32_1 = arith.constant 0 : i32
    return %c0_i32, %c0_i32_0 : i32, i32
  }
  func.func @transform_22(%arg0: i32) -> (i32, i32) {
    %c0_i32 = arith.constant 0 : i32
    %c0_i32_0 = arith.constant 0 : i32
    %c0_i32_1 = arith.constant 0 : i32
    return %c0_i32, %c0_i32_0 : i32, i32
  }
  func.func @transform_23(%arg0: i32) -> (i32, i32) {
    %c0_i32 = arith.constant 0 : i32
    %c0_i32_0 = arith.constant 0 : i32
    %c0_i32_1 = arith.constant 0 : i32
    return %c0_i32, %c0_i32_0 : i32, i32
  }
  func.func @transform_24(%arg0: i32) -> (i32, i32) {
    %c0_i32 = arith.constant 0 : i32
    %c0_i32_0 = arith.constant 0 : i32
    %c0_i32_1 = arith.constant 0 : i32
    return %c0_i32, %c0_i32_0 : i32, i32
  }
  func.func @transform_25(%arg0: i32) -> (i32, i32) {
    %c0_i32 = arith.constant 0 : i32
    %c0_i32_0 = arith.constant 0 : i32
    %c0_i32_1 = arith.constant 0 : i32
    return %c0_i32, %c0_i32_0 : i32, i32
  }
  func.func @transform_26(%arg0: i32) -> (i32, i32) {
    %c0_i32 = arith.constant 0 : i32
    %c0_i32_0 = arith.constant 0 : i32
    %c0_i32_1 = arith.constant 0 : i32
    return %c0_i32, %c0_i32_0 : i32, i32
  }
  func.func @transform_27(%arg0: i32) -> (i32, i32) {
    %c0_i32 = arith.constant 0 : i32
    %c0_i32_0 = arith.constant 0 : i32
    %c0_i32_1 = arith.constant 0 : i32
    return %c0_i32, %c0_i32_0 : i32, i32
  }
  func.func @transform_28(%arg0: i32) -> (i32, i32) {
    %c0_i32 = arith.constant 0 : i32
    %c0_i32_0 = arith.constant 0 : i32
    return %arg0, %c0_i32 : i32, i32
  }
}

</mosaic_0001>

<bundles_post_ra>
// kernel: tpu_custom_call.1
= control target key start
LH: loop header
LB: loop body
LE: loop exit
PB: predicated region body
PF: predicated region fallthrough
CT: control target
= control target key end

     0   :  { %s9381_s0 = inlined_call_operand.vmem [shape: f32[16,32], index: 0, kind: input, shape index: {}]   ;;  %s9382_s1 = inlined_call_operand.vmem [shape: f32[8,32], index: 1, kind: input, shape index: {}]   ;;  %s9383_s2 = inlined_call_operand.vmem [shape: bf16[32,32], index: 2, kind: input, shape index: {}]   ;;  %s9384_s3 = inlined_call_operand.vmem [shape: f32[3,32], index: 3, kind: input, shape index: {}]   ;;  %s9385_s4 = inlined_call_operand.vmem [shape: bf16[32,32], index: 4, kind: input, shape index: {}]   ;;  %s9386_s5 = inlined_call_operand.vmem [shape: bf16[32,32], index: 5, kind: input, shape index: {}]   ;;  %s9387_s6 = inlined_call_operand.vmem [shape: f32[8,8], index: 6, kind: input, shape index: {}]   ;;  %s9388_s7 = inlined_call_operand.vmem [shape: bf16[32,32], index: 7, kind: input, shape index: {}]   ;;  %s9389_s8 = inlined_call_operand.vmem [shape: bf16[32,32], index: 8, kind: input, shape index: {}]   ;;  %s9390_s9 = inlined_call_operand.vmem [shape: bf16[32,32], index: 9, kind: input, shape index: {}]   ;;  %s9391_s10 = inlined_call_operand.vmem [shape: bf16[32,32], index: 10, kind: input, shape index: {}]   ;;  %s9392_s11 = inlined_call_operand.vmem [shape: f32[9,32], index: 11, kind: input, shape index: {}]   ;;  %s9393_s12 = inlined_call_operand.vmem [shape: bf16[32,2048], index: 12, kind: input, shape index: {}]   ;;  %s9394_s13 = inlined_call_operand.vmem [shape: f32[1,2048], index: 13, kind: input, shape index: {}]   ;;  %s9395_s14 = inlined_call_operand.vmem [shape: bf16[2048,32], index: 14, kind: input, shape index: {}]   ;;  %s9396_s15 = inlined_call_operand.vmem [shape: f32[16,8], index: 15, kind: input, shape index: {}]   ;;  %s9397_s16 = inlined_call_operand.vmem [shape: f32[16,32], index: 16, kind: input, shape index: {}]   ;;  %s9398_s17 = inlined_call_operand.vmem [shape: f32[16,16], index: 17, kind: input, shape index: {}]   ;;  %s9399_s18 = inlined_call_operand.vmem [shape: bf16[32,32], index: 18, kind: input, shape index: {}]   ;;  %s9400_s19 = inlined_call_operand.vmem [shape: bf16[32,32], index: 19, kind: input, shape index: {}]   ;;  %s9401_s20 = inlined_call_operand.vmem [shape: bf16[32,32], index: 20, kind: input, shape index: {}]   ;;  %s9402_s21 = inlined_call_operand.vmem [shape: bf16[32,32], index: 21, kind: input, shape index: {}]   ;;  %s9403_s22 = inlined_call_operand.vmem [shape: f32[9,32], index: 22, kind: input, shape index: {}]   ;;  %s9404_s23 = inlined_call_operand.vmem [shape: bf16[32,2048], index: 23, kind: input, shape index: {}]   ;;  %s9405_s24 = inlined_call_operand.vmem [shape: f32[1,2048], index: 24, kind: input, shape index: {}]   ;;  %s9406_s25 = inlined_call_operand.vmem [shape: bf16[2048,32], index: 25, kind: input, shape index: {}]   ;;  %s9407_s26 = inlined_call_operand.vmem [shape: f32[32,32], index: 26, kind: input, shape index: {}]   ;;  %s9408_s27 = inlined_call_operand.vmem [shape: f32[1,32], index: 27, kind: input, shape index: {}]   ;;  %s9409_s28 = inlined_call_operand.hbm [shape: f32[32,32], index: 28, kind: output, shape index: {}]  }
   0x1   :  { %9436 = sst [smem:[#allocation12_spill]] %s9381_s0 }
   0x2   :  { %9437 = sst [smem:[#allocation13_spill]] %s9382_s1 }
   0x3   :  { %9438 = sst [smem:[#allocation14_spill]] %s9383_s2 }
   0x4   :  { %9439 = sst [smem:[#allocation15_spill]] %s9384_s3 }
   0x5   :  { %9440 = sst [smem:[#allocation16_spill]] %s9385_s4 }
   0x6   :  { %9441 = sst [smem:[#allocation17_spill]] %s9386_s5 }
   0x7   :  { %9442 = sst [smem:[#allocation18_spill]] %s9387_s6 }
   0x8   :  { %9443 = sst [smem:[#allocation19_spill]] %s9388_s7 }
   0x9   :  { %9444 = sst [smem:[#allocation20_spill]] %s9389_s8 }
   0xa   :  { %9445 = sst [smem:[#allocation21_spill]] %s9390_s9 }
   0xb   :  { %9446 = sst [smem:[#allocation22_spill]] %s9391_s10 }
   0xc   :  { %9447 = sst [smem:[#allocation23_spill]] %s9392_s11 }
   0xd   :  { %9448 = sst [smem:[#allocation24_spill]] %s9393_s12 }
   0xe   :  { %9449 = sst [smem:[#allocation25_spill]] %s9394_s13 }
   0xf   :  { %9450 = sst [smem:[#allocation26_spill]] %s9409_s28 }
  0x10   :  { %33 = vsyncpa [#allocation3], 0 }
  0x11   :  { %35 = vsyncpa [#allocation3 + $0x1], 0  ;;  %s7838_s8 = smov 0   ;;  %s7840_s5 = smov 0  }
  0x12   :  { %s7842_s9 = smov 0   ;;  %s7844_s30 = smov 0  }
  0x13 LB: > { %9451 = sst [smem:[#allocation5_spill]] %s7673_s8  ;;  %s7859_s3 = sadd.s32 4294967295, %s7685_s30   ;;  %s7685_s30 = sphi %s7844_s30, %s9482_s30   ;;  %s7681_s9 = sphi %s7842_s9, %s9484_s9   ;;  %s7677_s5 = sphi %s7840_s5, %s9486_s5   ;;  %s7673_s8 = sphi %s7838_s8, %s9485_s8  }
  0x14   : > { %9452 = sst [smem:[#allocation6_spill]] %s7681_s9  ;;  %s6326_s6 = sadd.s32 4294967294, %s7685_s30  }
  0x15   : > { %9453 = sst [smem:[#allocation7_spill]] %s7685_s30  ;;  %s7863_s10 = sadd.s32 1, %s7685_s30  }
  0x16   : > { %9454 = sst [smem:[#allocation8_spill]] %s7863_s10  ;;  %s641_s0 = sadd.s32 1, %s7681_s9 }
  0x17   : > { %s638_s11 = ssub.s32 %s7685_s30, %s7863_s10  ;;  %p651_p0 = scmp.ne.s32.totalorder %s7681_s9, %s7677_s5 }
  0x18   : > { %p639_p1 = scmp.eq.s32.totalorder %s638_s11, 0  ;;  %p652_p2 = scmp.eq.s32.totalorder %s7859_s3, 1 }
  0x19   : > { %p657_p3 = scmp.ne.s32.totalorder %s7677_s5, %s7673_s8  ;;  %p658_p4 = scmp.eq.s32.totalorder %s6326_s6, 1 }
  0x1a   : > { %s7874_s29 = scalar_select %p639_p1, %s7681_s9, %s641_s0  }
  0x1b   : > { %p7876_p5 = por %p652_p2, %p651_p0  ;;  %p7880_p6 = por %p658_p4, %p657_p3 }
  0x1c   : > { %9455 = sst [smem:[#allocation9_spill]] %s7874_s29  ;;  %p6329_p7 = scmp.ge.s32.totalorder %s7685_s30, 1 }
  0x1d   : > { %s9456_s2 = scalar_select %p7876_p5, 1, 0 }
  0x1e   : > { %s9458_s7 = scalar_select %p7880_p6, 1, 0 }
  0x1f   : > { %9457 = sst [smem:[#allocation10_spill]] %s9456_s2  ;;  %p764_p8 = scmp.lt.s32.totalorder %s7685_s30, 3 }
  0x20   : > { %9459 = sst [smem:[#allocation11_spill]] %s9458_s7 }
  0x21   : > { %p765_p9 = pnand %p6329_p7, %p764_p8 }
  0x22   : > { %s9460_s4 = sld [smem:[#allocation14_spill]] (!%p765_p9)  ;;  %v7687_v1 = vmov (!%p765_p9), 0.0   ;;  %vm7688_vm0 = vmmov (!%p765_p9), 0   ;;  %p837_p10 = scmp.lt.s32.totalorder (!%p765_p9), %s7859_s3, 1  ;;  %vm866_vm1 = vcmask (!%p765_p9), 261120   ;;  %v850_v7 = vlaneseq (!%p765_p9) }
  0x23   : > { %768 = sbr.rel (%p765_p9) target bundleno = 6666 (0x1a0a), region = 132  ;;  %7129 = vmatprep.subr.bf16.mxu0 (!%p765_p9), %v7687_v1  ;;  %7137 = vmatprep.subr.bf16.mxu1 (!%p765_p9), %v7687_v1  ;;  %s9461_s9 = sld [smem:[#allocation12_spill]] (!%p765_p9)  ;;  %vm1309_vm2 = vcmask (!%p765_p9), 64512   ;;  %vm7258_vm3 = vmpackc.low (!%p765_p9), %vm866_vm1, %vm866_vm1  ;;  %vm3869_vm4 = vcmask (!%p765_p9), 130048  }
  0x24   : > { %7133 = vmatprep.mubr.msk.bf16.mxu0 (!%p765_p9), %vm7688_vm0, %v7687_v1  ;;  %7141 = vmatprep.mubr.msk.bf16.mxu1 (!%p765_p9), %vm7688_vm0, %v7687_v1  ;;  %v7916_v8 = vshrl.u32 (!%p765_p9), %v850_v7, 7  ;;  %s9464_s0 = sld [smem:[#allocation13_spill]] (!%p765_p9)  ;;  %s9470_s1 = sld [smem:[#allocation23_spill]] (!%p765_p9) }
  0x25   : > { %s9471_s6 = sld [smem:[#allocation18_spill]] (!%p765_p9)  ;;  %s9474_s29 = sld [smem:[#allocation24_spill]] (!%p765_p9) }
  0x26   : > { %v7919_v9 = vsub.s32 (!%p765_p9), 0, %v7916_v8  ;;  %v7940_v22 = vsub.s32 (!%p765_p9), 1, %v7916_v8  ;;  %v7963_v35 = vsub.s32 (!%p765_p9), 2, %v7916_v8  ;;  %s9475_s13 = sld [smem:[#allocation25_spill]] (!%p765_p9)  ;;  %s834_s28 = sand.u32 (!%p765_p9), 1, %s7677_s5  }
  0x27   : > { %s6330_s2 = sshll.u32 (!%p765_p9), %s834_s28, 4  ;;  %s7690_s8 = smov (!%p765_p9), [#allocation2]  }
  0x28   : > { %v7319_v0 = vld [vmem:[%s9460_s4] sm:$0xff] (!%p765_p9)   ;;  %v7320_v2 = vld [vmem:[%s9460_s4 + $0x8] sm:$0xff] (!%p765_p9)   ;;  %s9462_s4 = sld [smem:[#allocation16_spill]] (!%p765_p9)  ;;  %s7627_s30 = sshll.u32 (!%p765_p9), %s7690_s8, 4  ;;  %s7628_s30 = int_to_ptr.vmem [resolvable:$false] %s7627_s30 }
  0x29   : > { %7130 = vmatpush3.bf16.msra.mxu0 (!%p765_p9), %v7319_v0 }
  0x2a   : > { %7131 = vmatprep.subr.bf16.mxu0 %v7687_v1  ;;  %s838_s11 = scalar_select %p837_p10, %s7859_s3, 1  ;;  %v910_v13 = vld [vmem:[%s9464_s0] sm:$0xff] }
  0x2b   : > { %v7990_v48 = vld [vmem:[%s9470_s1] sm:$0xff] }
  0x2c   : > { %s6331_s12 = sshll.u32 %s838_s11, 3  ;;  %s9467_s11 = sld [smem:[#allocation19_spill]]  ;;  %v1118_v49 = vrot.slane %v7990_v48, %v7940_v22  ;;  %v1055_v50 = vrot.slane %v7990_v48, %v7919_v9  ;;  %v1178_v61 = vrot.slane %v7990_v48, %v7963_v35 }
  0x2d   : > { %7132 = vmatpush3.bf16.msra.mxu0 %v7320_v2  ;;  %s840_s10 = scalar_lea.vmem %s9461_s9, %s6331_s12  ;;  %s9463_s12 = sld [smem:[#allocation15_spill]] }
  0x2e   : > { %7145 = vmatprep.subr.bf16.mxu0 %v7687_v1  ;;  %v844_v3 = vld [vmem:[%s840_s10] sm:$0xff]  ;;  %v7322_v6 = vld [vmem:[%s9462_s4 + $0x8] sm:$0xff]   ;;  %s9465_s9 = sld [smem:[#allocation17_spill]] }
  0x2f   : > { %v845_v4 = vpack.c.bf16 %v844_v3, %v844_v3  ;;  %v7321_v5 = vld [vmem:[%s9462_s4] sm:$0xff]   ;;  %s836_s4 = scalar_lea.vmem [#allocation2], %s6330_s2  ;;  %s9340_s2 = scalar_lea.sflag [#allocation3], %s834_s28 }
  0x30   : > { %7138 = vmatpush3.bf16.msra.mxu1 %v7321_v5  ;;  %v1044_v5 = vld [vmem:[%s9471_s6] sm:$0xff] }
  0x31   : > { %7134 = vmatmul.mubr.msk.bf16.vlgmr.msra.gmra.mrb[0].mxu0 %vm866_vm1, %v845_v4  ;;  %7139 = vmatprep.subr.bf16.mxu1 %v7687_v1 }
  0x32   : > { %7149 = vmatprep.mubr.msk.bf16.mxu0 %vm7688_vm0, %v7687_v1  ;;  %v7325_v31 = vld [vmem:[%s9467_s11] sm:$0xff]   ;;  %v7327_v33 = vld [vmem:[%s9467_s11 + $0x8] sm:$0xff]   ;;  %s6264_s11 = sshll.u32 %s836_s4, 4  ;;  %s9331_s11 = int_to_ptr.vmem [resolvable:$true] %s6264_s11 }
  0x33   : > { %v843_v10 = vld [vmem:[%s9463_s12] sm:$0x7]  ;;  %s9468_s12 = sld [smem:[#allocation20_spill]]  ;;  %p7630_p0 = scmp.lt.s32.totalorder %s9331_s11, %s7628_s30 }
  0x34   : > { %7140 = vmatpush3.bf16.msra.mxu1 %v7322_v6  ;;  %v853_v11 = vrot.slane %v843_v10, %v7919_v9  ;;  %s9466_s10 = smov %s9465_s9  ;;  %v7323_v20 = vld [vmem:[%s9465_s9] sm:$0xff]   ;;  %v920_v23 = vrot.slane %v843_v10, %v7940_v22  ;;  %v985_v36 = vrot.slane %v843_v10, %v7963_v35  ;;  %s9472_s9 = sld [smem:[#allocation22_spill]] }
  0x35   : > { %7153 = vmatprep.subr.bf16.mxu1 %v7687_v1  ;;  %7146 = vmatpush3.bf16.msra.mxu0 %v7323_v20  ;;  %v7324_v21 = vld [vmem:[%s9466_s10 + $0x8] sm:$0xff]   ;;  %s9469_s10 = sld [smem:[#allocation21_spill]] }
  0x36   : > { %7147 = vmatprep.subr.bf16.mxu0 %v7687_v1 }
  0x39   : > { %7148 = vmatpush3.bf16.msra.mxu0 %v7324_v21  ;;  %v7326_v32 = vld [vmem:[%s9468_s12] sm:$0xff]   ;;  %v7328_v34 = vld [vmem:[%s9468_s12 + $0x8] sm:$0xff]   ;;  %s6722_s12 = sshll.u32 %s7859_s3, 8  ;;  %s7623_s3 = scalar_lea.vmem %s9331_s11, 256 }
  0x3a   : > { %7161 = vmatprep.subr.bf16.mxu0 %v7687_v1  ;;  %p7624_p11 = scmp.ne.s32.totalorder %s9331_s11, %s7623_s3 }
  0x3b   : > { %v7329_v45 = vld [vmem:[%s9469_s10] sm:$0xff]   ;;  %v7330_v47 = vld [vmem:[%s9469_s10 + $0x8] sm:$0xff]   ;;  %s9473_s10 = smov %s9472_s9 }
  0x3c   : > { %v7332_v21 = vld [vmem:[%s9473_s10 + $0x8] sm:$0xff]   ;;  %p7625_p12 = pnand %p7624_p11, %p7876_p5 }
  0x3e   : > { %p7626_p13 = pneg %p7625_p12 }
 0x104   : > { %v904_v12 = vpop.f32.mrb[0].mxu0 }
 0x105   : > { %v905_v14 = vadd.f32 %v904_v12, %v853_v11  ;;  %v7135_v15 = vpop.f32.mrb[1].mxu0 }
 0x106   : > { %v907_v16 = vpop.f32.mrb[2].mxu0 }
 0x107   : > { %v911_v17 = vadd.f32 %v910_v13, %v905_v14  ;;  %v7136_v18 = vpop.f32.mrb[3].mxu0 }
 0x109   : > { %v912_v19 = vpack.c.bf16 %v911_v17, %v911_v17 }
 0x10b   : > { %7142 = vmatmul.mubr.msk.bf16.vlgmr.msra.gmra.mrb[0].mxu1 %vm866_vm1, %v912_v19 }
 0x10c   : > { %7157 = vmatprep.mubr.msk.bf16.mxu1 %vm7688_vm0, %v7687_v1  ;;  %7154 = vmatpush3.bf16.msra.mxu1 %v7325_v31 }
 0x10d   : > { %7155 = vmatprep.subr.bf16.mxu1 %v7687_v1 }
 0x110   : > { %7156 = vmatpush3.bf16.msra.mxu1 %v7327_v33 }
 0x111   : > { %7169 = vmatprep.subr.bf16.mxu1 %v7687_v1 }
 0x1de   : > { %v970_v24 = vpop.f32.mrb[0].mxu1 }
 0x1df   : > { %v971_v25 = vadd.f32 %v970_v24, %v920_v23  ;;  %v7143_v26 = vpop.f32.mrb[1].mxu1 }
 0x1e0   : > { %v973_v27 = vpop.f32.mrb[2].mxu1  ;;  %v8018_v26 = vsub.s32 3, %v7916_v8 }
 0x1e1   : > { %v976_v28 = vmax.f32 %v971_v25, 0.0  ;;  %v7144_v29 = vpop.f32.mrb[3].mxu1 }
 0x1e2   : > { %v1402_v27 = vrot.slane %v7990_v48, %v8018_v26 }
 0x1e3   : > { %v977_v30 = vpack.c.bf16 %v976_v28, %v976_v28 }
 0x1e5   : > { %7150 = vmatmul.mubr.msk.bf16.vlgmr.msra.gmra.mrb[4].mxu0 %vm866_vm1, %v977_v30 }
 0x1e6   : > { %7165 = vmatprep.mubr.msk.bf16.mxu0 %vm7688_vm0, %v7687_v1  ;;  %7162 = vmatpush3.bf16.msra.mxu0 %v7326_v32 }
 0x1e7   : > { %7163 = vmatprep.subr.bf16.mxu0 %v7687_v1 }
 0x1ea   : > { %7164 = vmatpush3.bf16.msra.mxu0 %v7328_v34 }
 0x1eb   : > { %7177 = vmatprep.subr.mxu0 %v7687_v1 }
 0x2b8   : > { %v1035_v37 = vpop.f32.mrb[4].mxu0 }
 0x2b9   : > { %v1036_v38 = vadd.f32 %v1035_v37, %v985_v36  ;;  %v7151_v39 = vpop.f32.mrb[5].mxu0 }
 0x2ba   : > { %v1038_v40 = vpop.f32.mrb[6].mxu0 }
 0x2bb   : > { %v1041_v41 = vmax.f32 %v1036_v38, 0.0  ;;  %v7152_v42 = vpop.f32.mrb[7].mxu0 }
 0x2bc   : > { %v1486_v42 = vld [vmem:[%s9474_s29 + $0x40] sm:$0xff] }
 0x2bd   : > { %v1042_v43 = vadd.f32 %v1041_v41, %v911_v17  ;;  %v7331_v17 = vld [vmem:[%s9472_s9] sm:$0xff]   ;;  %s9477_s9 = sld [smem:[#allocation26_spill]] }
 0x2be   : > { %v1484_v41 = vld [vmem:[%s9474_s29] sm:$0xff] }
 0x2bf   : > { %v7966_v44 = vmax.f32 %v1042_v43, 0.0  ;;  %v1485_v43 = vld [vmem:[%s9474_s29 + $0x8] sm:$0xff] }
 0x2c1   : > { %v1047_v46 = vpack.c.bf16 %v7966_v44, %v7966_v44 }
 0x2c3   : > { %7158 = vmatmul.mubr.msk.bf16.vlgmr.msra.gmra.mrb[4].mxu1 %vm866_vm1, %v1047_v46  ;;  %7166 = vmatmul.mubr.msk.bf16.vlgmr.msra.gmra.mrb[8].mxu0 %vm866_vm1, %v1047_v46  ;;  %s9478_s7 = smov %s9477_s9 }
 0x2c4   : > { %7170 = vmatpush3.bf16.msra.mxu1 %v7329_v45  ;;  %7173 = vmatprep.mubr.msk.bf16.mxu1 %vm7688_vm0, %v7687_v1  ;;  %v1487_v45 = vld [vmem:[%s9474_s29 + $0x48] sm:$0xff] }
 0x2c5   : > { %7171 = vmatprep.subr.bf16.mxu1 %v7687_v1  ;;  %7179 = vmatprep.mubr.msk.f32.mxu0 %vm7688_vm0, %v7687_v1 }
 0x2c8   : > { %7172 = vmatpush3.bf16.msra.mxu1 %v7330_v47  ;;  %v6358_v47 = vcombine.low %v1485_v43, %v1487_v45 }
 0x2c9   : > { %7182 = vmatprep.subr.mxu1 %v7687_v1 }
 0x2cb   : > { %7174 = vmatmul.mubr.msk.bf16.vlgmr.msra.gmra.mrb[8].mxu1 %vm866_vm1, %v1047_v46  ;;  %v6356_v46 = vcombine.low %v1484_v41, %v1486_v42 }
 0x2cc   : > { %7184 = vmatprep.mubr.msk.f32.mxu1 %vm7688_vm0, %v7687_v1 }
 0x396   : > { %v1105_v51 = vpop.f32.mrb[4].mxu1  ;;  %v1165_v52 = vpop.f32.mrb[8].mxu0 }
 0x397   : > { %v1166_v53 = vadd.f32 %v1165_v52, %v1118_v49  ;;  %v7159_v54 = vpop.f32.mrb[5].mxu1  ;;  %v7167_v55 = vpop.f32.mrb[9].mxu0  ;;  %v1106_v60 = vadd.f32 %v1105_v51, %v1055_v50  ;;  %v6359_v49 = vcombine.high %v1485_v43, %v1487_v45  ;;  %v1488_v50 = vld [vmem:[%s9474_s29 + $0x80] sm:$0xff]  ;;  %v1489_v52 = vld [vmem:[%s9474_s29 + $0x88] sm:$0xff]  ;;  %v7348_v43 = vld [vmem:[%s9395_s14 + $0x198] sm:$0xff]  }
 0x398   : > { %v1108_v56 = vpop.f32.mrb[6].mxu1  ;;  %v1168_v57 = vpop.f32.mrb[10].mxu0  ;;  %v1490_v51 = vld [vmem:[%s9474_s29 + $0xc0] sm:$0xff]  ;;  %v1491_v54 = vld [vmem:[%s9474_s29 + $0xc8] sm:$0xff] }
 0x399   : > { %v7160_v58 = vpop.f32.mrb[7].mxu1  ;;  %v7168_v59 = vpop.f32.mrb[11].mxu0  ;;  %7178 = vmatpush3.xpose.msk.msra.mxu0 %vm866_vm1, %v1166_v53  ;;  %v6361_v53 = vcombine.high %v1488_v50, %v1490_v51  ;;  %v6360_v55 = vcombine.low %v1488_v50, %v1490_v51  ;;  %v6362_v56 = vcombine.low %v1489_v52, %v1491_v54  ;;  %v6363_v57 = vcombine.high %v1489_v52, %v1491_v54  ;;  %v7350_v45 = vld [vmem:[%s9395_s14 + $0x1e0] sm:$0xff]   ;;  %v7354_v50 = vld [vmem:[%s9395_s14 + $0x1e8] sm:$0xff]   ;;  %v7358_v54 = vld [vmem:[%s9395_s14 + $0x1f0] sm:$0xff]  }
 0x39a   : > { %7187 = vmatprep.subr.bf16.mxu0 %v7687_v1  ;;  %v1711_v58 = vld [vmem:[%s9474_s29 + $0x10] sm:$0xff]  ;;  %v7355_v51 = vld [vmem:[%s9395_s14 + $0x128] sm:$0xff]  }
 0x39b   : > { %v1713_v59 = vld [vmem:[%s9474_s29 + $0x50] sm:$0xff]  ;;  %v7356_v52 = vld [vmem:[%s9395_s14 + $0x1a8] sm:$0xff]  }
 0x39c   : > { %7180 = vmatmul.mubr.msk.f32.vlgmr.msra.gmra.mrb[12].mxu0 %vm866_vm1, %v1106_v60  ;;  %v1712_v60 = vld [vmem:[%s9474_s29 + $0x18] sm:$0xff] }
 0x39d   : > { %7191 = vmatprep.mubr.msk.bf16.mxu0 %vm7688_vm0, %v7687_v1  ;;  %7188 = vmatpush3.bf16.msra.mxu0 %v7331_v17  ;;  %v1717_v17 = vld [vmem:[%s9474_s29 + $0xd0] sm:$0xff] }
 0x39e   : > { %v1225_v62 = vpop.f32.mrb[8].mxu1  ;;  %7189 = vmatprep.subr.bf16.mxu0 %v7687_v1 }
 0x39f   : > { %v1226_v63 = vadd.f32 %v1225_v62, %v1178_v61  ;;  %v7175_v0 = vpop.f32.mrb[9].mxu1  ;;  %v6367_v61 = vcombine.high %v1711_v58, %v1713_v59  ;;  %v1714_v62 = vld [vmem:[%s9474_s29 + $0x58] sm:$0xff] }
 0x3a0   : > { %v1228_v2 = vpop.f32.mrb[10].mxu1  ;;  %v6366_v0 = vcombine.low %v1711_v58, %v1713_v59  ;;  %v7362_v58 = vld [vmem:[%s9395_s14 + $0x1f8] sm:$0xff]  }
 0x3a1   : > { %v7176_v3 = vpop.f32.mrb[11].mxu1  ;;  %7183 = vmatpush3.msra.mxu1 %v1226_v63  ;;  %7190 = vmatpush3.bf16.msra.mxu0 %v7332_v21  ;;  %v7689_v63 = vmov 0   ;;  %v6368_v2 = vcombine.low %v1712_v60, %v1714_v62  ;;  %v7363_v59 = vld [vmem:[%s9395_s14 + $0x138] sm:$0xff]  }
 0x3a2   : > { %1598 = vmatprep.subr.bf16.mxu0 %v6359_v49  ;;  %v6369_v3 = vcombine.high %v1712_v60, %v1714_v62  ;;  %v7353_v49 = vld [vmem:[%s9395_s14 + $0x168] sm:$0xff]   ;;  %v7364_v60 = vld [vmem:[%s9395_s14 + $0x1b8] sm:$0xff]   ;;  %v7366_v62 = vld [vmem:[%s9395_s14 + $0xc0] sm:$0xff]  }
 0x46f   : > { %v1303_v4 = vpop.f32.mrb[12].mxu0 }
 0x470   : > { %v1307_v6 = vmul.f32 0.17677669, %v1303_v4  ;;  %v7181_v7 = vpop.f32.mrb[13].mxu0 }
 0x471   : > { %v1475_v7 = vsub.s32 4, %v7916_v8 }
 0x472   : > { %v1308_v10 = vadd.f32 %v1307_v6, %v1044_v5 }
 0x474   : > { %v1310_v11 = vsel %vm1309_vm2, %v1308_v10, -inf }
 0x475   : > { %1311 = vmax.xlane.f32.xlu0 %v1310_v11  ;;  %v1476_v11 = vrot.slane %v7990_v48, %v1475_v7 }
 0x502   : > { %v1312_v12 = vpop.xlane.xlu0 %1311 }
 0x503   : > { %v1313_v13 = vsub.f32 %v1308_v10, %v1312_v12  ;;  %v1480_v10 = vsub.s32 5, %v7916_v8 }
 0x505   : > { %v1314_v14 = vmul.f32 1.442695, %v1313_v13  ;;  %v1481_v13 = vrot.slane %v7990_v48, %v1480_v10 }
 0x507   : > { %7597 = vpow2.f32 %v1314_v14 }
 0x511   : > { %v7598_v15 = vpop.eup %7597 }
 0x512   : > { %v1316_v16 = vsel %vm1309_vm2, %v7598_v15, 0.0 }
 0x513   : > { %1317 = vadd.xlane.f32.xlu0 %v1316_v16  ;;  %v1715_v16 = vld [vmem:[%s9474_s29 + $0x90] sm:$0xff] }
 0x514   : > { %v6371_v21 = vcombine.high %v1715_v16, %v1717_v17 }
 0x5a0   : > { %v1318_v18 = vpop.xlane.xlu0 %1317 }
 0x5a1   : > { %7599 = vrcp.f32 %v1318_v18  ;;  %v1716_v18 = vld [vmem:[%s9474_s29 + $0x98] sm:$0xff] }
 0x5ab   : > { %v7600_v19 = vpop.eup %7599 }
 0x5ac   : > { %v1320_v20 = vmul.f32 %v7600_v19, %v7598_v15  ;;  %v1718_v19 = vld [vmem:[%s9474_s29 + $0xd8] sm:$0xff] }
 0x5ae   : > { %7185 = vmatmul.mubr.msk.f32.vlgmr.msra.gmra.mrb[12].mxu1 %vm1309_vm2, %v1320_v20 }
 0x5af   : > { %1589 = vmatprep.mubr.bf16.mxu1 %v7689_v63 }
 0x681   : > { %v1390_v23 = vpop.f32.mrb[12].mxu1 }
 0x682   : > { %v1394_v24 = vpack.c.bf16 %v1390_v23, %v1390_v23  ;;  %v7186_v25 = vpop.f32.mrb[13].mxu1  ;;  %v6373_v23 = vcombine.high %v1716_v18, %v1718_v19 }
 0x683   : > { %v6372_v25 = vcombine.low %v1716_v18, %v1718_v19 }
 0x684   : > { %7192 = vmatmul.mubr.msk.bf16.vlgmr.msra.gmra.mrb[16].mxu0 %vm866_vm1, %v1394_v24  ;;  %v6370_v24 = vcombine.low %v1715_v16, %v1717_v17 }
 0x685   : > { %1599 = vmatpush1.bf16.msra.mxu0 %v6358_v47  ;;  %1630 = vmatprep.mubr.bf16.mxu0 %v7689_v63  ;;  %v7352_v47 = vld [vmem:[%s9395_s14 + $0x1a0] sm:$0xff]  }
 0x686   : > { %1600 = vmatprep.subr.bf16.mxu0 %v6363_v57  ;;  %v7361_v57 = vld [vmem:[%s9395_s14 + $0x178] sm:$0xff]  }
 0x689   : > { %1601 = vmatpush1.bf16.msra.mxu0 %v6362_v56  ;;  %v7360_v56 = vld [vmem:[%s9395_s14 + $0x1b0] sm:$0xff]  }
 0x68a   : > { %1822 = vmatprep.subr.bf16.mxu0 %v6369_v3 }
 0x757   : > { %v1452_v28 = vpop.f32.mrb[16].mxu0 }
 0x758   : > { %v1453_v29 = vadd.f32 %v1452_v28, %v1402_v27  ;;  %v7193_v30 = vpop.f32.mrb[17].mxu0  ;;  %v7333_v27 = vld [vmem:[%s9395_s14 + $0x140] sm:$0xff]  }
 0x759   : > { %v1455_v31 = vpop.f32.mrb[18].mxu0  ;;  %v7334_v28 = vld [vmem:[%s9395_s14 + $0x1c0] sm:$0xff]  }
 0x75a   : > { %v7194_v32 = vpop.f32.mrb[19].mxu0  ;;  %v1458_v33 = vadd.f32 %v1453_v29, %v7966_v44  ;;  %v6357_v44 = vcombine.high %v1484_v41, %v1486_v42  ;;  %v7335_v29 = vld [vmem:[%s9395_s14 + $0x100] sm:$0xff]   ;;  %v7337_v31 = vld [vmem:[%s9395_s14 + $0x148] sm:$0xff]   ;;  %v7346_v41 = vld [vmem:[%s9395_s14 + $0x1d8] sm:$0xff]  }
 0x75b   : > { %v7336_v30 = vld [vmem:[%s9395_s14 + $0x180] sm:$0xff]   ;;  %v7338_v32 = vld [vmem:[%s9395_s14 + $0x1c8] sm:$0xff]   ;;  %v7347_v42 = vld [vmem:[%s9395_s14 + $0x118] sm:$0xff]  }
 0x75c   : > { %v1459_v34 = vsel %vm866_vm1, %v1458_v33, 0.0  ;;  %1557 = vmatprep.subr.bf16.mxu1 %v6357_v44  ;;  %v7349_v44 = vld [vmem:[%s9395_s14 + $0x160] sm:$0xff]  }
 0x75d   : > { %1460 = vadd.xlane.f32.xlu1 %v1459_v34  ;;  %1558 = vmatpush1.bf16.msra.mxu1 %v6356_v46  ;;  %v7340_v34 = vld [vmem:[%s9395_s14 + $0x188] sm:$0xff]   ;;  %v7351_v46 = vld [vmem:[%s9395_s14 + $0x120] sm:$0xff]  }
 0x75e   : > { %1559 = vmatprep.subr.bf16.mxu1 %v6361_v53  ;;  %v7357_v53 = vld [vmem:[%s9395_s14 + $0x170] sm:$0xff]  }
 0x761   : > { %1560 = vmatpush1.bf16.msra.mxu1 %v6360_v55  ;;  %v7359_v55 = vld [vmem:[%s9395_s14 + $0x130] sm:$0xff]  }
 0x762   : > { %1781 = vmatprep.subr.bf16.mxu1 %v6367_v61  ;;  %v7365_v61 = vld [vmem:[%s9395_s14 + $0x40] sm:$0xff]  }
 0x7ea   : > { %v1461_v36 = vpop.xlane.xlu1 %1460 }
 0x7eb   : > { %v1463_v37 = vmul.f32 0.03125, %v1461_v36  ;;  %v7341_v36 = vld [vmem:[%s9395_s14 + $0x150] sm:$0xff]  }
 0x7ed   : > { %v1464_v38 = vsub.f32 %v1458_v33, %v1463_v37  ;;  %v7339_v33 = vld [vmem:[%s9395_s14 + $0x108] sm:$0xff]   ;;  %v7342_v37 = vld [vmem:[%s9395_s14 + $0x1d0] sm:$0xff]  }
 0x7ef   : > { %v1465_v39 = vmul.f32 %v1464_v38, %v1464_v38 }
 0x7f1   : > { %v1466_v40 = vsel %vm866_vm1, %v1465_v39, 0.0  ;;  %v7344_v39 = vld [vmem:[%s9395_s14 + $0x190] sm:$0xff]  }
 0x7f2   : > { %1467 = vadd.xlane.f32.xlu1 %v1466_v40  ;;  %v7345_v40 = vld [vmem:[%s9395_s14 + $0x158] sm:$0xff]  }
 0x87f   : > { %v1468_v4 = vpop.xlane.xlu1 %1467 }
 0x880   : > { %v1469_v5 = vmul.f32 0.03125, %v1468_v4 }
 0x882   : > { %v1470_v6 = vadd.f32 1e-05, %v1469_v5  ;;  %v8208_v5 = vld [vmem:[%s9475_s13] sm:$0xf] }
 0x883   : > { %v1509_v16 = vrot.slane %v8208_v5, %v8018_v26 }
 0x884   : > { %7601 = vrsqrt.f32 %v1470_v6 }
 0x88e   : > { %v7602_v12 = vpop.eup %7601 }
 0x88f   : > { %v1472_v14 = vmul.f32 %v7602_v12, %v1464_v38  ;;  %v7343_v38 = vld [vmem:[%s9395_s14 + $0x110] sm:$0xff]   ;;  %v1719_v12 = vld [vmem:[%s9475_s13 + $0x4] sm:$0xf] }
 0x890   : > { %v1724_v17 = vrot.slane %v1719_v12, %v7919_v9  ;;  %v1732_v18 = vrot.slane %v1719_v12, %v7963_v35  ;;  %v1728_v19 = vrot.slane %v1719_v12, %v7940_v22 }
 0x891   : > { %v1477_v15 = vmul.f32 %v1476_v11, %v1472_v14 }
 0x893   : > { %v8083_v20 = vadd.f32 %v1481_v13, %v1477_v15  ;;  %v1501_v15 = vrot.slane %v8208_v5, %v7940_v22 }
 0x895   : > { %v8087_v48 = vpack.c.bf16 %v8083_v20, %v8083_v20 }
 0x897   : > { %6364 = vmatmul.mubr.msk.bf16.vlgmr.msra.gmra.mrb[16].mxu1 %vm866_vm1, %v8087_v48  ;;  %6365 = vmatmul.mubr.msk.bf16.vlgmr.msra.gmra.mrb[20].mxu0 %vm866_vm1, %v8087_v48 }
 0x898   : > { %1782 = vmatpush1.bf16.msra.mxu1 %v6366_v0  ;;  %1823 = vmatpush1.bf16.msra.mxu0 %v6368_v2 }
 0x899   : > { %1783 = vmatprep.subr.bf16.mxu1 %v6371_v21  ;;  %1824 = vmatprep.subr.bf16.mxu0 %v6373_v23  ;;  %v1736_v21 = vrot.slane %v1719_v12, %v8018_v26  ;;  %v7382_v12 = vld [vmem:[%s9395_s14 + $0xe0] sm:$0xff]  }
 0x89a   : > { %1813 = vmatprep.mubr.bf16.mxu1 %v7689_v63  ;;  %1854 = vmatprep.mubr.bf16.mxu0 %v7689_v63 }
 0x89c   : > { %1784 = vmatpush1.bf16.msra.mxu1 %v6370_v24  ;;  %1825 = vmatpush1.bf16.msra.mxu0 %v6372_v25 }
 0x89d   : > { %6748 = vmatprep.subr.bf16.mxu1 %v7333_v27  ;;  %6770 = vmatprep.subr.bf16.mxu0 %v7334_v28 }
 0x89f   : > { %6374 = vmatmul.mubr.msk.bf16.vlgmr.msra.gmra.mrb[20].mxu1 %vm866_vm1, %v8087_v48  ;;  %6375 = vmatmul.mubr.msk.bf16.vlgmr.msra.gmra.mrb[24].mxu0 %vm866_vm1, %v8087_v48 }
 0x8a0   : > { %6749 = vmatpush3.bf16.msra.mxu1 %v7335_v29  ;;  %6771 = vmatpush3.bf16.msra.mxu0 %v7336_v30 }
 0x8a1   : > { %6750 = vmatprep.subr.bf16.mxu1 %v7337_v31  ;;  %6772 = vmatprep.subr.bf16.mxu0 %v7338_v32 }
 0x8a4   : > { %6751 = vmatpush3.bf16.msra.mxu1 %v7339_v33  ;;  %6773 = vmatpush3.bf16.msra.mxu0 %v7340_v34 }
 0x8a5   : > { %6752 = vmatprep.subr.bf16.mxu1 %v7341_v36  ;;  %6774 = vmatprep.subr.bf16.mxu0 %v7342_v37 }
 0x8a8   : > { %6753 = vmatpush3.bf16.msra.mxu1 %v7343_v38  ;;  %6775 = vmatpush3.bf16.msra.mxu0 %v7344_v39 }
 0x8a9   : > { %6754 = vmatprep.subr.bf16.mxu1 %v7345_v40  ;;  %6776 = vmatprep.subr.bf16.mxu0 %v7346_v41 }
 0x8ac   : > { %6755 = vmatpush3.bf16.msra.mxu1 %v7347_v42  ;;  %6777 = vmatpush3.bf16.msra.mxu0 %v7348_v43 }
 0x8ad   : > { %6756 = vmatprep.subr.bf16.mxu1 %v7349_v44  ;;  %6778 = vmatprep.subr.bf16.mxu0 %v7350_v45 }
 0x8b0   : > { %6757 = vmatpush3.bf16.msra.mxu1 %v7351_v46  ;;  %6779 = vmatpush3.bf16.msra.mxu0 %v7352_v47  ;;  %v7367_v47 = vld [vmem:[%s9395_s14] sm:$0xff]  }
 0x8b1   : > { %6758 = vmatprep.subr.bf16.mxu1 %v7353_v49  ;;  %6780 = vmatprep.subr.bf16.mxu0 %v7354_v50  ;;  %v7368_v49 = vld [vmem:[%s9395_s14 + $0x80] sm:$0xff]  }
 0x8b4   : > { %6759 = vmatpush3.bf16.msra.mxu1 %v7355_v51  ;;  %6781 = vmatpush3.bf16.msra.mxu0 %v7356_v52  ;;  %v7369_v52 = vld [vmem:[%s9395_s14 + $0x48] sm:$0xff]  }
 0x8b5   : > { %6760 = vmatprep.subr.bf16.mxu1 %v7357_v53  ;;  %6782 = vmatprep.subr.bf16.mxu0 %v7358_v54  ;;  %v7370_v53 = vld [vmem:[%s9395_s14 + $0xc8] sm:$0xff]  }
 0x8b8   : > { %6761 = vmatpush3.bf16.msra.mxu1 %v7359_v55  ;;  %6783 = vmatpush3.bf16.msra.mxu0 %v7360_v56  ;;  %v7371_v56 = vld [vmem:[%s9395_s14 + $0x8] sm:$0xff]  }
 0x8b9   : > { %6762 = vmatprep.subr.bf16.mxu1 %v7361_v57  ;;  %6784 = vmatprep.subr.bf16.mxu0 %v7362_v58  ;;  %v7372_v57 = vld [vmem:[%s9395_s14 + $0x88] sm:$0xff]   ;;  %v7373_v58 = vld [vmem:[%s9395_s14 + $0x50] sm:$0xff]  }
 0x8bc   : > { %6763 = vmatpush3.bf16.msra.mxu1 %v7363_v59  ;;  %6785 = vmatpush3.bf16.msra.mxu0 %v7364_v60  ;;  %v7374_v59 = vld [vmem:[%s9395_s14 + $0xd0] sm:$0xff]  }
 0x8bd   : > { %6792 = vmatprep.subr.bf16.mxu1 %v7365_v61  ;;  %6814 = vmatprep.subr.bf16.mxu0 %v7366_v62  ;;  %v7375_v60 = vld [vmem:[%s9395_s14 + $0x10] sm:$0xff]   ;;  %v7377_v62 = vld [vmem:[%s9395_s14 + $0x58] sm:$0xff]  }
 0x8be   : > { %v7376_v61 = vld [vmem:[%s9395_s14 + $0x90] sm:$0xff]  }
 0x96a   : > { %v8201_v0 = vpop.f32.mrb[16].mxu1  ;;  %v8203_v2 = vpop.f32.mrb[20].mxu0 }
 0x96b   : > { %v1593_v3 = vpop.f32.mrb[17].mxu1  ;;  %v1634_v4 = vpop.f32.mrb[21].mxu0 }
 0x96c   : > { %v1595_v6 = vpop.f32.mrb[18].mxu1  ;;  %v1636_v11 = vpop.f32.mrb[22].mxu0  ;;  %v1594_v25 = vadd.f32 %v1593_v3, %v1501_v15  ;;  %v1635_v27 = vadd.f32 %v1634_v4, %v1509_v16  ;;  %v7378_v3 = vld [vmem:[%s9395_s14 + $0xd8] sm:$0xff]   ;;  %v7385_v15 = vld [vmem:[%s9395_s14 + $0x68] sm:$0xff]  }
 0x96d   : > { %v1596_v13 = vpop.f32.mrb[19].mxu1  ;;  %v1637_v14 = vpop.f32.mrb[23].mxu0  ;;  %v7379_v4 = vld [vmem:[%s9395_s14 + $0x18] sm:$0xff]   ;;  %v7381_v11 = vld [vmem:[%s9395_s14 + $0x60] sm:$0xff]   ;;  %v7386_v16 = vld [vmem:[%s9395_s14 + $0xe8] sm:$0xff]  }
 0x96e   : > { %v1640_v43 = vmax.f32 %v1594_v25, 0.0  ;;  %v1642_v44 = vmax.f32 %v1635_v27, 0.0  ;;  %v7380_v6 = vld [vmem:[%s9395_s14 + $0x98] sm:$0xff]   ;;  %v7383_v13 = vld [vmem:[%s9395_s14 + $0x20] sm:$0xff]   ;;  %v7391_v25 = vld [vmem:[%s9395_s14 + $0x30] sm:$0xff]  }
 0x96f   : > { %v7384_v14 = vld [vmem:[%s9395_s14 + $0xa0] sm:$0xff]  }
 0x970   : > { %v1644_v54 = vpack.c.bf16 %v1640_v43, %v1640_v43  ;;  %v1646_v55 = vpack.c.bf16 %v1642_v44, %v1642_v44  ;;  %v2486_v43 = vld [vmem:[%s9474_s29 + $0xe8] sm:$0xff] }
 0x972   : > { %v1815_v23 = vpop.f32.mrb[20].mxu1  ;;  %v1856_v24 = vpop.f32.mrb[24].mxu0 }
 0x973   : > { %v1816_v28 = vadd.f32 %v1815_v23, %v1724_v17  ;;  %v1857_v29 = vadd.f32 %v1856_v24, %v1732_v18  ;;  %v1817_v30 = vpop.f32.mrb[21].mxu1  ;;  %v1858_v31 = vpop.f32.mrb[25].mxu0  ;;  %v7387_v17 = vld [vmem:[%s9395_s14 + $0x28] sm:$0xff]   ;;  %v7389_v23 = vld [vmem:[%s9395_s14 + $0x70] sm:$0xff]  }
 0x974   : > { %v1818_v32 = vadd.f32 %v1817_v30, %v1728_v19  ;;  %v1859_v33 = vadd.f32 %v1858_v31, %v1736_v21  ;;  %v1819_v34 = vpop.f32.mrb[22].mxu1  ;;  %v1860_v36 = vpop.f32.mrb[26].mxu0  ;;  %v7388_v18 = vld [vmem:[%s9395_s14 + $0xa8] sm:$0xff]   ;;  %v1497_v19 = vrot.slane %v8208_v5, %v7919_v9  ;;  %v1505_v21 = vrot.slane %v8208_v5, %v7963_v35  ;;  %v7390_v24 = vld [vmem:[%s9395_s14 + $0xf0] sm:$0xff]   ;;  %v7394_v30 = vld [vmem:[%s9395_s14 + $0xf8] sm:$0xff]  }
 0x975   : > { %v1863_v37 = vmax.f32 %v1816_v28, 0.0  ;;  %v1865_v38 = vmax.f32 %v1857_v29, 0.0  ;;  %v1820_v39 = vpop.f32.mrb[23].mxu1  ;;  %v1861_v40 = vpop.f32.mrb[27].mxu0  ;;  %v7392_v5 = vld [vmem:[%s9395_s14 + $0xb0] sm:$0xff]   ;;  %v7393_v29 = vld [vmem:[%s9395_s14 + $0x78] sm:$0xff]  }
 0x976   : > { %v1864_v41 = vmax.f32 %v1818_v32, 0.0  ;;  %v1866_v42 = vmax.f32 %v1859_v33, 0.0  ;;  %v1592_v27 = vadd.f32 %v8201_v0, %v1497_v19  ;;  %v1633_v28 = vadd.f32 %v8203_v2, %v1505_v21  ;;  %v2479_v31 = vld [vmem:[%s9474_s29 + $0x20] sm:$0xff]  ;;  %v2480_v2 = vld [vmem:[%s9474_s29 + $0x28] sm:$0xff]  ;;  %v7395_v33 = vld [vmem:[%s9395_s14 + $0x38] sm:$0xff]  }
 0x977   : > { %v1867_v50 = vpack.c.bf16 %v1863_v37, %v1863_v37  ;;  %v1869_v51 = vpack.c.bf16 %v1865_v38, %v1865_v38  ;;  %v2481_v0 = vld [vmem:[%s9474_s29 + $0x60] sm:$0xff]  ;;  %v2482_v32 = vld [vmem:[%s9474_s29 + $0x68] sm:$0xff]  ;;  %v7396_v34 = vld [vmem:[%s9395_s14 + $0xb8] sm:$0xff]  }
 0x978   : > { %v1868_v45 = vpack.c.bf16 %v1864_v41, %v1864_v41  ;;  %v1870_v46 = vpack.c.bf16 %v1866_v42, %v1866_v42  ;;  %v1639_v36 = vmax.f32 %v1592_v27, 0.0  ;;  %v1641_v37 = vmax.f32 %v1633_v28, 0.0  ;;  %v2483_v40 = vld [vmem:[%s9474_s29 + $0xa0] sm:$0xff]  ;;  %v2484_v42 = vld [vmem:[%s9474_s29 + $0xa8] sm:$0xff]  ;;  %v7424_v27 = vld [vmem:[%s9395_s14 + $0x2b0] sm:$0xff]  }
 0x979   : > { %v6441_v38 = vcombine.high %v2479_v31, %v2481_v0  ;;  %v6443_v39 = vcombine.high %v2480_v2, %v2482_v32  ;;  %v2485_v41 = vld [vmem:[%s9474_s29 + $0xe0] sm:$0xff]  ;;  %v6440_v44 = vcombine.low %v2479_v31, %v2481_v0  ;;  %v7418_v19 = vld [vmem:[%s9395_s14 + $0x2e8] sm:$0xff]   ;;  %v7425_v28 = vld [vmem:[%s9395_s14 + $0x278] sm:$0xff]  }
 0x97a   : > { %2159 = vmatprep.mubr.bf16.mxu1 %v1868_v45  ;;  %2199 = vmatprep.mubr.bf16.mxu0 %v1870_v46  ;;  %v6442_v45 = vcombine.low %v2480_v2, %v2482_v32  ;;  %v6445_v46 = vcombine.high %v2483_v40, %v2485_v41  ;;  %v7419_v21 = vld [vmem:[%s9395_s14 + $0x228] sm:$0xff]   ;;  %v7428_v31 = vld [vmem:[%s9395_s14 + $0x2b8] sm:$0xff]   ;;  %v8446_v0 = vld [vmem:[%s9474_s29 + $0x30] sm:$0xff] }
 0x97b   : > { %2160 = vmatmul.mubr.bf16.vlgmr.msra.gmra.mrb[24].mxu1 %v1867_v50  ;;  %2200 = vmatmul.mubr.bf16.vlgmr.msra.gmra.mrb[28].mxu0 %v1869_v51  ;;  %v6447_v50 = vcombine.high %v2484_v42, %v2486_v43  ;;  %v6444_v51 = vcombine.low %v2483_v40, %v2485_v41  ;;  %v8451_v2 = vld [vmem:[%s9474_s29 + $0x70] sm:$0xff]  ;;  %v8456_v32 = vld [vmem:[%s9474_s29 + $0x38] sm:$0xff] }
 0x97c   : > { %6793 = vmatpush3.bf16.msra.mxu1 %v7367_v47  ;;  %6815 = vmatpush3.bf16.msra.mxu0 %v7368_v49  ;;  %v1643_v47 = vpack.c.bf16 %v1639_v36, %v1639_v36  ;;  %v1645_v49 = vpack.c.bf16 %v1641_v37, %v1641_v37  ;;  %v6482_v36 = vcombine.low %v8446_v0, %v8451_v2 }
 0x97d   : > { %2431 = vmatprep.mubr.bf16.mxu1 %v1644_v54  ;;  %2471 = vmatprep.mubr.bf16.mxu0 %v1646_v55  ;;  %v7398_v54 = vld [vmem:[%s9395_s14 + $0x2c0] sm:$0xff]  }
 0x97e   : > { %6794 = vmatprep.subr.bf16.mxu1 %v7369_v52  ;;  %6816 = vmatprep.subr.bf16.mxu0 %v7370_v53  ;;  %v6446_v52 = vcombine.low %v2484_v42, %v2486_v43  ;;  %v7397_v53 = vld [vmem:[%s9395_s14 + $0x240] sm:$0xff]  }
 0x97f   : > { %v7399_v55 = vld [vmem:[%s9395_s14 + $0x200] sm:$0xff]  }
 0x980   : > { %6795 = vmatpush3.bf16.msra.mxu1 %v7371_v56  ;;  %6817 = vmatpush3.bf16.msra.mxu0 %v7372_v57  ;;  %v7400_v56 = vld [vmem:[%s9395_s14 + $0x280] sm:$0xff]   ;;  %v7401_v57 = vld [vmem:[%s9395_s14 + $0x248] sm:$0xff]  }
 0x981   : > { %6796 = vmatprep.subr.bf16.mxu1 %v7373_v58  ;;  %6818 = vmatprep.subr.bf16.mxu0 %v7374_v59  ;;  %v7402_v58 = vld [vmem:[%s9395_s14 + $0x2c8] sm:$0xff]  }
 0x982   : > { %v7403_v59 = vld [vmem:[%s9395_s14 + $0x208] sm:$0xff]  }
 0x984   : > { %6797 = vmatpush3.bf16.msra.mxu1 %v7375_v60  ;;  %6819 = vmatpush3.bf16.msra.mxu0 %v7376_v61  ;;  %v7404_v60 = vld [vmem:[%s9395_s14 + $0x288] sm:$0xff]   ;;  %v7405_v61 = vld [vmem:[%s9395_s14 + $0x250] sm:$0xff]  }
 0x985   : > { %6798 = vmatprep.subr.bf16.mxu1 %v7377_v62  ;;  %6820 = vmatprep.subr.bf16.mxu0 %v7378_v3  ;;  %v7406_v62 = vld [vmem:[%s9395_s14 + $0x2d0] sm:$0xff]  }
 0x986   : > { %v7407_v3 = vld [vmem:[%s9395_s14 + $0x210] sm:$0xff]  }
 0x988   : > { %6799 = vmatpush3.bf16.msra.mxu1 %v7379_v4  ;;  %6821 = vmatpush3.bf16.msra.mxu0 %v7380_v6  ;;  %v7408_v4 = vld [vmem:[%s9395_s14 + $0x290] sm:$0xff]   ;;  %v7409_v6 = vld [vmem:[%s9395_s14 + $0x258] sm:$0xff]  }
 0x989   : > { %6800 = vmatprep.subr.bf16.mxu1 %v7381_v11  ;;  %6822 = vmatprep.subr.bf16.mxu0 %v7382_v12  ;;  %v7410_v11 = vld [vmem:[%s9395_s14 + $0x2d8] sm:$0xff]  }
 0x98a   : > { %v7411_v12 = vld [vmem:[%s9395_s14 + $0x218] sm:$0xff]  }
 0x98c   : > { %6801 = vmatpush3.bf16.msra.mxu1 %v7383_v13  ;;  %6823 = vmatpush3.bf16.msra.mxu0 %v7384_v14  ;;  %v7412_v13 = vld [vmem:[%s9395_s14 + $0x298] sm:$0xff]   ;;  %v7413_v14 = vld [vmem:[%s9395_s14 + $0x260] sm:$0xff]  }
 0x98d   : > { %6802 = vmatprep.subr.bf16.mxu1 %v7385_v15  ;;  %6824 = vmatprep.subr.bf16.mxu0 %v7386_v16  ;;  %v7414_v15 = vld [vmem:[%s9395_s14 + $0x2e0] sm:$0xff]  }
 0x98e   : > { %v7415_v16 = vld [vmem:[%s9395_s14 + $0x220] sm:$0xff]  }
 0x990   : > { %6803 = vmatpush3.bf16.msra.mxu1 %v7387_v17  ;;  %6825 = vmatpush3.bf16.msra.mxu0 %v7388_v18  ;;  %v7416_v17 = vld [vmem:[%s9395_s14 + $0x2a0] sm:$0xff]   ;;  %v7417_v18 = vld [vmem:[%s9395_s14 + $0x268] sm:$0xff]  }
 0x991   : > { %6804 = vmatprep.subr.bf16.mxu1 %v7389_v23  ;;  %6826 = vmatprep.subr.bf16.mxu0 %v7390_v24  ;;  %v7420_v23 = vld [vmem:[%s9395_s14 + $0x2a8] sm:$0xff]   ;;  %v7421_v24 = vld [vmem:[%s9395_s14 + $0x270] sm:$0xff]  }
 0x994   : > { %6805 = vmatpush3.bf16.msra.mxu1 %v7391_v25  ;;  %6827 = vmatpush3.bf16.msra.mxu0 %v7392_v5  ;;  %v7422_v25 = vld [vmem:[%s9395_s14 + $0x2f0] sm:$0xff]  }
 0x995   : > { %6806 = vmatprep.subr.bf16.mxu1 %v7393_v29  ;;  %6828 = vmatprep.subr.bf16.mxu0 %v7394_v30  ;;  %v7423_v5 = vld [vmem:[%s9395_s14 + $0x230] sm:$0xff]   ;;  %v7426_v29 = vld [vmem:[%s9395_s14 + $0x2f8] sm:$0xff]  }
 0x996   : > { %v7427_v30 = vld [vmem:[%s9395_s14 + $0x238] sm:$0xff]  }
 0x998   : > { %6807 = vmatpush3.bf16.msra.mxu1 %v7395_v33  ;;  %6829 = vmatpush3.bf16.msra.mxu0 %v7396_v34  ;;  %v6483_v33 = vcombine.high %v8446_v0, %v8451_v2  ;;  %v8463_v34 = vld [vmem:[%s9474_s29 + $0x78] sm:$0xff]  ;;  %v2982_v0 = vld [vmem:[%s9474_s29 + $0xf0] sm:$0xff] }
 0x999   : > { %2549 = vmatprep.subr.bf16.mxu1 %v6441_v38  ;;  %2590 = vmatprep.subr.bf16.mxu0 %v6443_v39  ;;  %v6484_v37 = vcombine.low %v8456_v32, %v8463_v34  ;;  %v6485_v38 = vcombine.high %v8456_v32, %v8463_v34  ;;  %v2981_v2 = vld [vmem:[%s9474_s29 + $0xb8] sm:$0xff] }
 0x99a   : > { %v2983_v32 = vld [vmem:[%s9474_s29 + $0xf8] sm:$0xff] }
 0x99b   : > { %2432 = vmatmul.mubr.bf16.vlgmr.msra.gmra.mrb[28].mxu1 %v1643_v47  ;;  %2472 = vmatmul.mubr.bf16.vlgmr.msra.gmra.mrb[32].mxu0 %v1645_v49 }
 0x99c   : > { %2550 = vmatpush1.bf16.msra.mxu1 %v6440_v44  ;;  %2591 = vmatpush1.bf16.msra.mxu0 %v6442_v45 }
 0x99d   : > { %2551 = vmatprep.subr.bf16.mxu1 %v6445_v46  ;;  %2592 = vmatprep.subr.bf16.mxu0 %v6447_v50 }
 0x99e   : > { %2581 = vmatprep.mubr.bf16.mxu1 %v7689_v63  ;;  %2622 = vmatprep.mubr.bf16.mxu0 %v7689_v63 }
 0x9a0   : > { %2552 = vmatpush1.bf16.msra.mxu1 %v6444_v51  ;;  %2593 = vmatpush1.bf16.msra.mxu0 %v6446_v52 }
 0x9a1   : > { %6836 = vmatprep.subr.bf16.mxu1 %v7397_v53  ;;  %6858 = vmatprep.subr.bf16.mxu0 %v7398_v54 }
 0x9a3   : > { %6448 = vmatmul.mubr.msk.bf16.vlgmr.msra.gmra.mrb[32].mxu1 %vm866_vm1, %v8087_v48  ;;  %6449 = vmatmul.mubr.msk.bf16.vlgmr.msra.gmra.mrb[36].mxu0 %vm866_vm1, %v8087_v48 }
 0x9a4   : > { %6837 = vmatpush3.bf16.msra.mxu1 %v7399_v55  ;;  %6859 = vmatpush3.bf16.msra.mxu0 %v7400_v56 }
 0x9a5   : > { %6838 = vmatprep.subr.bf16.mxu1 %v7401_v57  ;;  %6860 = vmatprep.subr.bf16.mxu0 %v7402_v58 }
 0x9a8   : > { %6839 = vmatpush3.bf16.msra.mxu1 %v7403_v59  ;;  %6861 = vmatpush3.bf16.msra.mxu0 %v7404_v60  ;;  %v2487_v59 = vld [vmem:[%s9475_s13 + $0x8] sm:$0xf] }
 0x9a9   : > { %6840 = vmatprep.subr.bf16.mxu1 %v7405_v61  ;;  %6862 = vmatprep.subr.bf16.mxu0 %v7406_v62 }
 0x9ac   : > { %6841 = vmatpush3.bf16.msra.mxu1 %v7407_v3  ;;  %6863 = vmatpush3.bf16.msra.mxu0 %v7408_v4  ;;  %v2492_v3 = vrot.slane %v2487_v59, %v7919_v9  ;;  %v2500_v4 = vrot.slane %v2487_v59, %v7963_v35 }
 0x9ad   : > { %6842 = vmatprep.subr.bf16.mxu1 %v7409_v6  ;;  %6864 = vmatprep.subr.bf16.mxu0 %v7410_v11  ;;  %v2496_v11 = vrot.slane %v2487_v59, %v7940_v22 }
 0x9b0   : > { %6843 = vmatpush3.bf16.msra.mxu1 %v7411_v12  ;;  %6865 = vmatpush3.bf16.msra.mxu0 %v7412_v13  ;;  %v2504_v12 = vrot.slane %v2487_v59, %v8018_v26  ;;  %v7446_v59 = vld [vmem:[%s9395_s14 + $0x3e0] sm:$0xff]  }
 0x9b1   : > { %6844 = vmatprep.subr.bf16.mxu1 %v7413_v14  ;;  %6866 = vmatprep.subr.bf16.mxu0 %v7414_v15 }
 0x9b4   : > { %6845 = vmatpush3.bf16.msra.mxu1 %v7415_v16  ;;  %6867 = vmatpush3.bf16.msra.mxu0 %v7416_v17 }
 0x9b5   : > { %6846 = vmatprep.subr.bf16.mxu1 %v7417_v18  ;;  %6868 = vmatprep.subr.bf16.mxu0 %v7418_v19 }
 0x9b8   : > { %6847 = vmatpush3.bf16.msra.mxu1 %v7419_v21  ;;  %6869 = vmatpush3.bf16.msra.mxu0 %v7420_v23 }
 0x9b9   : > { %6848 = vmatprep.subr.bf16.mxu1 %v7421_v24  ;;  %6870 = vmatprep.subr.bf16.mxu0 %v7422_v25 }
 0x9bc   : > { %6849 = vmatpush3.bf16.msra.mxu1 %v7423_v5  ;;  %6871 = vmatpush3.bf16.msra.mxu0 %v7424_v27 }
 0x9bd   : > { %6850 = vmatprep.subr.bf16.mxu1 %v7425_v28  ;;  %6872 = vmatprep.subr.bf16.mxu0 %v7426_v29  ;;  %v2980_v29 = vld [vmem:[%s9474_s29 + $0xb0] sm:$0xff] }
 0x9c0   : > { %6851 = vmatpush3.bf16.msra.mxu1 %v7427_v30  ;;  %6873 = vmatpush3.bf16.msra.mxu0 %v7428_v31 }
 0x9c1   : > { %3046 = vmatprep.subr.bf16.mxu1 %v6483_v33  ;;  %3087 = vmatprep.subr.bf16.mxu0 %v6485_v38 }
 0xa4e   : > { %v6764_v39 = vpop.f32.mrb[24].mxu1  ;;  %v6786_v40 = vpop.f32.mrb[28].mxu0 }
 0xa4f   : > { %v6765_v41 = vpop.f32.mrb[25].mxu1  ;;  %v6787_v42 = vpop.f32.mrb[29].mxu0 }
 0xa50   : > { %v6766_v43 = vadd.f32 %v6765_v41, %v6764_v39  ;;  %v6788_v44 = vadd.f32 %v6787_v42, %v6786_v40  ;;  %v6767_v45 = vpop.f32.mrb[26].mxu1  ;;  %v6789_v46 = vpop.f32.mrb[30].mxu0  ;;  %v6487_v40 = vcombine.high %v2980_v29, %v2982_v0  ;;  %v6489_v41 = vcombine.high %v2981_v2, %v2983_v32 }
 0xa51   : > { %v6768_v47 = vpop.f32.mrb[27].mxu1  ;;  %v6790_v49 = vpop.f32.mrb[31].mxu0  ;;  %v6486_v42 = vcombine.low %v2980_v29, %v2982_v0  ;;  %v7430_v45 = vld [vmem:[%s9395_s14 + $0x3c0] sm:$0xff]   ;;  %v7433_v46 = vld [vmem:[%s9395_s14 + $0x348] sm:$0xff]  }
 0xa52   : > { %v2202_v50 = vadd.f32 %v6788_v44, %v6766_v43  ;;  %v6488_v43 = vcombine.low %v2981_v2, %v2983_v32  ;;  %v7429_v44 = vld [vmem:[%s9395_s14 + $0x340] sm:$0xff]   ;;  %v7434_v47 = vld [vmem:[%s9395_s14 + $0x3c8] sm:$0xff]  }
 0xa53   : > { %v7435_v49 = vld [vmem:[%s9395_s14 + $0x308] sm:$0xff]  }
 0xa6e   : > { %v6808_v51 = vpop.f32.mrb[28].mxu1  ;;  %v6830_v52 = vpop.f32.mrb[32].mxu0 }
 0xa6f   : > { %v6809_v53 = vpop.f32.mrb[29].mxu1  ;;  %v6831_v54 = vpop.f32.mrb[33].mxu0 }
 0xa70   : > { %v6810_v55 = vadd.f32 %v6809_v53, %v6808_v51  ;;  %v6832_v56 = vadd.f32 %v6831_v54, %v6830_v52  ;;  %v6811_v57 = vpop.f32.mrb[30].mxu1  ;;  %v6833_v58 = vpop.f32.mrb[34].mxu0  ;;  %v7437_v51 = vld [vmem:[%s9395_s14 + $0x350] sm:$0xff]   ;;  %v7441_v54 = vld [vmem:[%s9395_s14 + $0x358] sm:$0xff]  }
 0xa71   : > { %v6812_v60 = vpop.f32.mrb[31].mxu1  ;;  %v6834_v61 = vpop.f32.mrb[35].mxu0  ;;  %v7439_v52 = vld [vmem:[%s9395_s14 + $0x310] sm:$0xff]   ;;  %v7444_v57 = vld [vmem:[%s9395_s14 + $0x398] sm:$0xff]   ;;  %v7445_v58 = vld [vmem:[%s9395_s14 + $0x360] sm:$0xff]  }
 0xa72   : > { %v2434_v62 = vadd.f32 %v6810_v55, %v2202_v50  ;;  %v7436_v50 = vld [vmem:[%s9395_s14 + $0x388] sm:$0xff]   ;;  %v7440_v53 = vld [vmem:[%s9395_s14 + $0x390] sm:$0xff]   ;;  %v7442_v55 = vld [vmem:[%s9395_s14 + $0x3d8] sm:$0xff]  }
 0xa73   : > { %v7447_v60 = vld [vmem:[%s9395_s14 + $0x320] sm:$0xff]  }
 0xa74   : > { %v8476_v6 = vadd.f32 %v6832_v56, %v2434_v62  ;;  %v7443_v56 = vld [vmem:[%s9395_s14 + $0x318] sm:$0xff]   ;;  %v7448_v61 = vld [vmem:[%s9395_s14 + $0x3a0] sm:$0xff]   ;;  %v7449_v62 = vld [vmem:[%s9395_s14 + $0x368] sm:$0xff]  }
 0xa76   : > { %v2583_v13 = vpop.f32.mrb[32].mxu1  ;;  %v2624_v14 = vpop.f32.mrb[36].mxu0 }
 0xa77   : > { %v2584_v15 = vadd.f32 %v2583_v13, %v2492_v3  ;;  %v2625_v16 = vadd.f32 %v2624_v14, %v2500_v4  ;;  %v2585_v17 = vpop.f32.mrb[33].mxu1  ;;  %v2626_v18 = vpop.f32.mrb[37].mxu0  ;;  %v7450_v3 = vld [vmem:[%s9395_s14 + $0x3e8] sm:$0xff]   ;;  %v7454_v13 = vld [vmem:[%s9395_s14 + $0x3f0] sm:$0xff]  }
 0xa78   : > { %v2586_v19 = vadd.f32 %v2585_v17, %v2496_v11  ;;  %v2627_v21 = vadd.f32 %v2626_v18, %v2504_v12  ;;  %v2587_v23 = vpop.f32.mrb[34].mxu1  ;;  %v2628_v24 = vpop.f32.mrb[38].mxu0  ;;  %v7451_v4 = vld [vmem:[%s9395_s14 + $0x328] sm:$0xff]   ;;  %v7453_v12 = vld [vmem:[%s9395_s14 + $0x370] sm:$0xff]   ;;  %v7458_v17 = vld [vmem:[%s9395_s14 + $0x3f8] sm:$0xff]  }
 0xa79   : > { %v2631_v25 = vmax.f32 %v2584_v15, 0.0  ;;  %v2633_v5 = vmax.f32 %v2625_v16, 0.0  ;;  %v2588_v27 = vpop.f32.mrb[35].mxu1  ;;  %v2629_v28 = vpop.f32.mrb[39].mxu0  ;;  %v7452_v11 = vld [vmem:[%s9395_s14 + $0x3a8] sm:$0xff]   ;;  %v7455_v14 = vld [vmem:[%s9395_s14 + $0x330] sm:$0xff]  }
 0xa7a   : > { %v2632_v30 = vmax.f32 %v2586_v19, 0.0  ;;  %v2634_v31 = vmax.f32 %v2627_v21, 0.0  ;;  %v7456_v15 = vld [vmem:[%s9395_s14 + $0x3b0] sm:$0xff]   ;;  %v7457_v16 = vld [vmem:[%s9395_s14 + $0x378] sm:$0xff]  }
 0xa7b   : > { %v2635_v38 = vpack.c.bf16 %v2631_v25, %v2631_v25  ;;  %v2637_v39 = vpack.c.bf16 %v2633_v5, %v2633_v5  ;;  %v7459_v18 = vld [vmem:[%s9395_s14 + $0x338] sm:$0xff]  }
 0xa7c   : > { %v2636_v33 = vpack.c.bf16 %v2632_v30, %v2632_v30  ;;  %v2638_v34 = vpack.c.bf16 %v2634_v31, %v2634_v31  ;;  %v7460_v19 = vld [vmem:[%s9395_s14 + $0x3b8] sm:$0xff]   ;;  %v2984_v30 = vld [vmem:[%s9475_s13 + $0xc] sm:$0xf]  ;;  %s7629_s13 = scalar_lea.vmem %s7628_s30, 512 }
 0xa7d   : > { %v2989_v32 = vrot.slane %v2984_v30, %v7919_v9  ;;  %p7631_p1 = scmp.lt.s32.totalorder %s7629_s13, %s7623_s3 }
 0xa7e   : > { %2927 = vmatprep.mubr.bf16.mxu1 %v2636_v33  ;;  %2967 = vmatprep.mubr.bf16.mxu0 %v2638_v34  ;;  %v2997_v33 = vrot.slane %v2984_v30, %v7963_v35 }
 0xa7f   : > { %2928 = vmatmul.mubr.bf16.vlgmr.msra.gmra.mrb[36].mxu1 %v2635_v38  ;;  %2968 = vmatmul.mubr.bf16.vlgmr.msra.gmra.mrb[40].mxu0 %v2637_v39  ;;  %v2993_v38 = vrot.slane %v2984_v30, %v7940_v22  ;;  %v3001_v39 = vrot.slane %v2984_v30, %v8018_v26  ;;  %p7632_p2 = por %p7631_p1, %p7630_p0 }
 0xa80   : > { %3047 = vmatpush1.bf16.msra.mxu1 %v6482_v36  ;;  %3088 = vmatpush1.bf16.msra.mxu0 %v6484_v37  ;;  %v7431_v36 = vld [vmem:[%s9395_s14 + $0x300] sm:$0xff]  }
 0xa81   : > { %3048 = vmatprep.subr.bf16.mxu1 %v6487_v40  ;;  %3089 = vmatprep.subr.bf16.mxu0 %v6489_v41  ;;  %v7432_v37 = vld [vmem:[%s9395_s14 + $0x380] sm:$0xff]   ;;  %p7633_p3 = pnand %p7632_p2, %p7626_p13 }
 0xa82   : > { %3078 = vmatprep.mubr.bf16.mxu1 %v7689_v63  ;;  %3119 = vmatprep.mubr.bf16.mxu0 %v7689_v63 }
 0xa84   : > { %3049 = vmatpush1.bf16.msra.mxu1 %v6486_v42  ;;  %3090 = vmatpush1.bf16.msra.mxu0 %v6488_v43 }
 0xa85   : > { %6880 = vmatprep.subr.bf16.mxu1 %v7429_v44  ;;  %6902 = vmatprep.subr.bf16.mxu0 %v7430_v45 }
 0xa87   : > { %6490 = vmatmul.mubr.msk.bf16.vlgmr.msra.gmra.mrb[40].mxu1 %vm866_vm1, %v8087_v48  ;;  %6491 = vmatmul.mubr.msk.bf16.vlgmr.msra.gmra.mrb[44].mxu0 %vm866_vm1, %v8087_v48  ;;  %v7438_v48 = vld [vmem:[%s9395_s14 + $0x3d0] sm:$0xff]  }
 0xa88   : > { %6881 = vmatpush3.bf16.msra.mxu1 %v7431_v36  ;;  %6903 = vmatpush3.bf16.msra.mxu0 %v7432_v37 }
 0xa89   : > { %6882 = vmatprep.subr.bf16.mxu1 %v7433_v46  ;;  %6904 = vmatprep.subr.bf16.mxu0 %v7434_v47 }
 0xa8c   : > { %6883 = vmatpush3.bf16.msra.mxu1 %v7435_v49  ;;  %6905 = vmatpush3.bf16.msra.mxu0 %v7436_v50 }
 0xa8d   : > { %6884 = vmatprep.subr.bf16.mxu1 %v7437_v51  ;;  %6906 = vmatprep.subr.bf16.mxu0 %v7438_v48 }
 0xa90   : > { %6885 = vmatpush3.bf16.msra.mxu1 %v7439_v52  ;;  %6907 = vmatpush3.bf16.msra.mxu0 %v7440_v53 }
 0xa91   : > { %6886 = vmatprep.subr.bf16.mxu1 %v7441_v54  ;;  %6908 = vmatprep.subr.bf16.mxu0 %v7442_v55 }
 0xa94   : > { %6887 = vmatpush3.bf16.msra.mxu1 %v7443_v56  ;;  %6909 = vmatpush3.bf16.msra.mxu0 %v7444_v57 }
 0xa95   : > { %6888 = vmatprep.subr.bf16.mxu1 %v7445_v58  ;;  %6910 = vmatprep.subr.bf16.mxu0 %v7446_v59  ;;  %v3475_v59 = vsub.s32 6, %v7916_v8 }
 0xa98   : > { %6889 = vmatpush3.bf16.msra.mxu1 %v7447_v60  ;;  %6911 = vmatpush3.bf16.msra.mxu0 %v7448_v61 }
 0xa99   : > { %6890 = vmatprep.subr.bf16.mxu1 %v7449_v62  ;;  %6912 = vmatprep.subr.bf16.mxu0 %v7450_v3 }
 0xa9c   : > { %6891 = vmatpush3.bf16.msra.mxu1 %v7451_v4  ;;  %6913 = vmatpush3.bf16.msra.mxu0 %v7452_v11 }
 0xa9d   : > { %6892 = vmatprep.subr.bf16.mxu1 %v7453_v12  ;;  %6914 = vmatprep.subr.bf16.mxu0 %v7454_v13 }
 0xaa0   : > { %6893 = vmatpush3.bf16.msra.mxu1 %v7455_v14  ;;  %6915 = vmatpush3.bf16.msra.mxu0 %v7456_v15  ;;  %v7621_v15 = vld [vmem:[%s9470_s1] sm:$0xff] }
 0xaa1   : > { %6894 = vmatprep.subr.bf16.mxu1 %v7457_v16  ;;  %6916 = vmatprep.subr.bf16.mxu0 %v7458_v17  ;;  %v3476_v16 = vrot.slane %v7621_v15, %v3475_v59 }
 0xaa4   : > { %6895 = vmatpush3.bf16.msra.mxu1 %v7459_v18  ;;  %6917 = vmatpush3.bf16.msra.mxu0 %v7460_v19 }
 0xaa5   : > { %7200 = vmatprep.subr.bf16.mxu0 %v7687_v1 }
 0xb52   : > { %v6852_v21 = vpop.f32.mrb[36].mxu1  ;;  %v6874_v23 = vpop.f32.mrb[40].mxu0 }
 0xb53   : > { %v6853_v24 = vpop.f32.mrb[37].mxu1  ;;  %v6875_v25 = vpop.f32.mrb[41].mxu0 }
 0xb54   : > { %v6854_v5 = vadd.f32 %v6853_v24, %v6852_v21  ;;  %v6876_v27 = vadd.f32 %v6875_v25, %v6874_v23  ;;  %v6855_v28 = vpop.f32.mrb[38].mxu1  ;;  %v6877_v29 = vpop.f32.mrb[42].mxu0 }
 0xb55   : > { %v6856_v31 = vpop.f32.mrb[39].mxu1  ;;  %v6878_v0 = vpop.f32.mrb[43].mxu0  ;;  %v3502_v28 = vld [vmem:[%s9396_s15] sm:$0xff] }
 0xb56   : > { %v2970_v2 = vadd.f32 %v6876_v27, %v6854_v5  ;;  %v3494_v0 = vsub.s32 7, %v7916_v8  ;;  %v6714_v8 = vld [vmem:[%s9408_s27] ss:$0 sm:$0xff] }
 0xb58   : > { %v2975_v34 = vadd.f32 %v2970_v2, %v8476_v6  ;;  %v3495_v2 = vrot.slane %v7621_v15, %v3494_v0 }
 0xb5a   : > { %v3080_v40 = vpop.f32.mrb[40].mxu1  ;;  %v3121_v41 = vpop.f32.mrb[44].mxu0 }
 0xb5b   : > { %v3081_v42 = vadd.f32 %v3080_v40, %v2989_v32  ;;  %v3122_v43 = vadd.f32 %v3121_v41, %v2997_v33  ;;  %v3082_v44 = vpop.f32.mrb[41].mxu1  ;;  %v3123_v45 = vpop.f32.mrb[45].mxu0  ;;  %v3503_v40 = vld [vmem:[%s9396_s15 + $0x8] sm:$0xff]  ;;  %v7462_v41 = vld [vmem:[%s9400_s19] sm:$0xff]  }
 0xb5c   : > { %v3083_v36 = vadd.f32 %v3082_v44, %v2993_v38  ;;  %v3124_v37 = vadd.f32 %v3123_v45, %v3001_v39  ;;  %v3084_v46 = vpop.f32.mrb[42].mxu1  ;;  %v3125_v47 = vpop.f32.mrb[46].mxu0  ;;  %v3505_v44 = vld [vmem:[%s9397_s16 + $0x8] sm:$0xff]  ;;  %v3504_v45 = vld [vmem:[%s9397_s16] sm:$0xff] }
 0xb5d   : > { %v3128_v49 = vmax.f32 %v3081_v42, 0.0  ;;  %v3130_v50 = vmax.f32 %v3122_v43, 0.0  ;;  %v3085_v51 = vpop.f32.mrb[43].mxu1  ;;  %v3126_v48 = vpop.f32.mrb[47].mxu0  ;;  %v7463_v42 = vld [vmem:[%s9399_s18 + $0x8] sm:$0xff]  }
 0xb5e   : > { %v3129_v52 = vmax.f32 %v3083_v36, 0.0  ;;  %v3131_v6 = vmax.f32 %v3124_v37, 0.0  ;;  %v7464_v43 = vld [vmem:[%s9400_s19 + $0x8] sm:$0xff]   ;;  %v8676_v48 = vld [vmem:[%s9403_s22] sm:$0xff] }
 0xb5f   : > { %v3132_v55 = vpack.c.bf16 %v3128_v49, %v3128_v49  ;;  %v3134_v56 = vpack.c.bf16 %v3130_v50, %v3130_v50  ;;  %v7465_v49 = vld [vmem:[%s9401_s20] sm:$0xff]   ;;  %v7466_v51 = vld [vmem:[%s9401_s20 + $0x8] sm:$0xff]  }
 0xb60   : > { %v3133_v53 = vpack.c.bf16 %v3129_v52, %v3129_v52  ;;  %v3135_v54 = vpack.c.bf16 %v3131_v6, %v3131_v6  ;;  %v3599_v52 = vrot.slane %v8676_v48, %v7919_v9  ;;  %v3663_v6 = vrot.slane %v8676_v48, %v7940_v22 }
 0xb62   : > { %3424 = vmatprep.mubr.bf16.mxu1 %v3133_v53  ;;  %3464 = vmatprep.mubr.bf16.mxu0 %v3135_v54 }
 0xb63   : > { %3425 = vmatmul.mubr.bf16.vlgmr.msra.gmra.mrb[44].mxu1 %v3132_v55  ;;  %3465 = vmatmul.mubr.bf16.vlgmr.msra.gmra.mrb[48].mxu0 %v3134_v56 }
 0xb64   : > { %7204 = vmatprep.mubr.msk.bf16.mxu0 %vm7688_vm0, %v7687_v1  ;;  %7197 = vmatprep.mubr.msk.f32.mxu1 %vm1309_vm2, %v3502_v28 }
 0xc36   : > { %v6896_v57 = vpop.f32.mrb[44].mxu1  ;;  %v6918_v58 = vpop.f32.mrb[48].mxu0 }
 0xc37   : > { %v6897_v60 = vpop.f32.mrb[45].mxu1  ;;  %v6919_v61 = vpop.f32.mrb[49].mxu0 }
 0xc38   : > { %v6898_v62 = vadd.f32 %v6897_v60, %v6896_v57  ;;  %v6920_v3 = vadd.f32 %v6919_v61, %v6918_v58  ;;  %v6899_v4 = vpop.f32.mrb[46].mxu1  ;;  %v6921_v11 = vpop.f32.mrb[50].mxu0 }
 0xc39   : > { %v6900_v12 = vpop.f32.mrb[47].mxu1  ;;  %v6922_v13 = vpop.f32.mrb[51].mxu0 }
 0xc3a   : > { %v3467_v14 = vadd.f32 %v6920_v3, %v6898_v62  ;;  %v3724_v12 = vrot.slane %v8676_v48, %v7963_v35 }
 0xc3c   : > { %v3472_v17 = vadd.f32 %v3467_v14, %v2975_v34  ;;  %v6524_v34 = vld [vmem:[%s9470_s1 + $0x8] ss:$0 sm:$0xff]  ;;  %s9336_s1 = scalar_lea.hbm %s9477_s9, %s6722_s12 }
 0xc3e   : > { %v3477_v18 = vadd.f32 %v3476_v16, %v3472_v17 }
 0xc40   : > { %v3478_v19 = vadd.f32 %v3477_v18, %v8083_v20  ;;  %v7461_v20 = vld [vmem:[%s9399_s18] sm:$0xff]  }
 0xc41   : > { %7201 = vmatpush3.bf16.msra.mxu0 %v7461_v20 }
 0xc42   : > { %v3479_v21 = vsel %vm866_vm1, %v3478_v19, 0.0  ;;  %7202 = vmatprep.subr.bf16.mxu0 %v7687_v1 }
 0xc43   : > { %3480 = vadd.xlane.f32.xlu0 %v3479_v21 }
 0xc45   : > { %7203 = vmatpush3.bf16.msra.mxu0 %v7463_v42 }
 0xc46   : > { %7216 = vmatprep.subr.bf16.mxu0 %v7687_v1 }
 0xcd0   : > { %v3481_v23 = vpop.xlane.xlu0 %3480 }
 0xcd1   : > { %v3482_v24 = vmul.f32 0.03125, %v3481_v23 }
 0xcd3   : > { %v3483_v25 = vsub.f32 %v3478_v19, %v3482_v24  ;;  %v3588_v24 = vld [vmem:[%s9398_s17 + $0x8] sm:$0xff] }
 0xcd5   : > { %v3484_v5 = vmul.f32 %v3483_v25, %v3483_v25 }
 0xcd7   : > { %v3485_v27 = vsel %vm866_vm1, %v3484_v5, 0.0 }
 0xcd8   : > { %3486 = vadd.xlane.f32.xlu1 %v3485_v27  ;;  %v3587_v27 = vld [vmem:[%s9398_s17] sm:$0xff] }
 0xd65   : > { %v3487_v29 = vpop.xlane.xlu1 %3486 }
 0xd66   : > { %v3488_v30 = vmul.f32 0.03125, %v3487_v29 }
 0xd68   : > { %v3489_v31 = vadd.f32 1e-05, %v3488_v30 }
 0xd6a   : > { %7603 = vrsqrt.f32 %v3489_v31 }
 0xd74   : > { %v7604_v32 = vpop.eup %7603 }
 0xd75   : > { %v3491_v33 = vmul.f32 %v7604_v32, %v3483_v25 }
 0xd77   : > { %v3496_v38 = vmul.f32 %v3495_v2, %v3491_v33 }
 0xd79   : > { %v3501_v39 = vadd.f32 %v6524_v34, %v3496_v38 }
 0xd7b   : > { %7195 = vmatprep.subr.mxu1 %v3501_v39 }
 0xd7c   : > { %7196 = vmatpush3.msra.mxu1 %v3501_v39 }
 0xd7d   : > { %7198 = vmatmul.mubr.msk.f32.vlgmr.msra.gmra.mrb[14].mxu1 %vm1309_vm2, %v3503_v40  ;;  %7208 = vmatprep.subr.bf16.mxu1 %v7687_v1 }
 0xd7e   : > { %7209 = vmatpush3.bf16.msra.mxu1 %v7462_v41  ;;  %7212 = vmatprep.mubr.msk.bf16.mxu1 %vm7688_vm0, %v7687_v1 }
 0xd7f   : > { %7210 = vmatprep.subr.bf16.mxu1 %v7687_v1 }
 0xd82   : > { %7211 = vmatpush3.bf16.msra.mxu1 %v7464_v43 }
 0xe50   : > { %v7199_v36 = vpop.f32.mrb[14].mxu1 }
 0xe51   : > { %v8652_v37 = vadd.f32 %v7199_v36, %v3505_v44  ;;  %v3578_v46 = vpop.f32.mrb[15].mxu1  ;;  %v7467_v44 = vld [vmem:[%s9402_s21] sm:$0xff]  }
 0xe52   : > { %v8654_v47 = vadd.f32 %v3578_v46, %v3504_v45 }
 0xe54   : > { %v3591_v50 = vpack.c.bf16 %v8652_v37, %v8654_v47 }
 0xe56   : > { %7205 = vmatmul.mubr.msk.bf16.vlgmr.msra.gmra.mrb[52].mxu0 %vm866_vm1, %v3591_v50  ;;  %7213 = vmatmul.mubr.msk.bf16.vlgmr.msra.gmra.mrb[48].mxu1 %vm866_vm1, %v3591_v50 }
 0xe57   : > { %7217 = vmatpush3.bf16.msra.mxu0 %v7465_v49  ;;  %7220 = vmatprep.mubr.msk.bf16.mxu0 %vm7688_vm0, %v7687_v1 }
 0xe58   : > { %7218 = vmatprep.subr.bf16.mxu0 %v7687_v1 }
 0xe5b   : > { %7219 = vmatpush3.bf16.msra.mxu0 %v7466_v51 }
 0xe5c   : > { %7238 = vmatprep.subr.bf16.mxu0 %v7687_v1 }
 0xe5e   : > { %7221 = vmatmul.mubr.msk.bf16.vlgmr.msra.gmra.mrb[56].mxu0 %vm866_vm1, %v3591_v50 }
 0xe5f   : > { %7242 = vmatprep.mubr.msk.bf16.mxu0 %vm7688_vm0, %v7687_v1  ;;  %7239 = vmatpush3.bf16.msra.mxu0 %v7467_v44 }
 0xe60   : > { %7240 = vmatprep.subr.bf16.mxu0 %v7687_v1 }
 0xf29   : > { %v3710_v53 = vpop.f32.mrb[48].mxu1  ;;  %v3649_v54 = vpop.f32.mrb[52].mxu0 }
 0xf2a   : > { %v7214_v55 = vpop.f32.mrb[49].mxu1  ;;  %v3650_v56 = vadd.f32 %v3649_v54, %v3599_v52  ;;  %v7206_v57 = vpop.f32.mrb[53].mxu0  ;;  %v3711_v61 = vadd.f32 %v3710_v53, %v3663_v6  ;;  %v3981_v54 = vrot.slane %v8676_v48, %v8018_v26 }
 0xf2b   : > { %v3713_v58 = vpop.f32.mrb[50].mxu1  ;;  %v3652_v60 = vpop.f32.mrb[54].mxu0 }
 0xf2c   : > { %v3714_v62 = vadd.f32 %v3713_v58, %v3663_v6  ;;  %v7207_v3 = vpop.f32.mrb[55].mxu0  ;;  %v7215_v4 = vpop.f32.mrb[51].mxu1  ;;  %7228 = vmatprep.mubr.msk.f32.mxu1 %vm866_vm1, %v3650_v56  ;;  %v3653_v19 = vadd.f32 %v3652_v60, %v3599_v52  ;;  %v7468_v52 = vld [vmem:[%s9402_s21 + $0x8] sm:$0xff]  }
 0xf2d   : > { %7241 = vmatpush3.bf16.msra.mxu0 %v7468_v52 }
 0xf2e   : > { %v7257_v11 = vpack.c.bf16 %v3714_v62, %v3711_v61 }
 0xf30   : > { %7259 = vmatprep.subr.msk.bf16.mxu1 %vm7258_vm3, %v7257_v11 }
 0xf31   : > { %v3771_v13 = vpop.f32.mrb[56].mxu0  ;;  %7262 = vmatpush3.bf16.xpose.msk.msra.mxu1 %vm7258_vm3, %v7257_v11 }
 0xf32   : > { %v7222_v14 = vpop.f32.mrb[57].mxu0  ;;  %v3772_v16 = vadd.f32 %v3771_v13, %v3724_v12 }
 0xf33   : > { %v3774_v15 = vpop.f32.mrb[58].mxu0 }
 0xf34   : > { %v3775_v17 = vadd.f32 %v3774_v15, %v3724_v12  ;;  %v7223_v18 = vpop.f32.mrb[59].mxu0 }
 0xf36   : > { %v7263_v21 = vpack.c.bf16 %v3775_v17, %v3772_v16 }
 0xf38   : > { %7229 = vmatmul.mubr.msk.f32.vlgmr.msra.gmra.mrb[52].mxu1 %vm866_vm1, %v3653_v19  ;;  %7264 = vmatprep.subr.bf16.mxu1 %v7263_v21 }
 0xf39   : > { %7266 = vmatpush3.bf16.msra.mxu1 %v7263_v21 }
0x100b   : > { %v7230_v23 = vpop.f32.mrb[52].mxu1 }
0x100c   : > { %v3866_v25 = vmul.f32 0.17677669, %v7230_v23  ;;  %v3856_v5 = vpop.f32.mrb[53].mxu1  ;;  %v4081_v23 = vld [vmem:[%s9404_s23 + $0x40] sm:$0xff] }
0x100d   : > { %v3865_v28 = vmul.f32 0.17677669, %v3856_v5  ;;  %v4082_v5 = vld [vmem:[%s9404_s23 + $0x48] sm:$0xff] }
0x100e   : > { %v3868_v20 = vadd.f32 %v3866_v25, %v3588_v24  ;;  %v4080_v24 = vld [vmem:[%s9404_s23 + $0x8] sm:$0xff] }
0x100f   : > { %v3867_v29 = vadd.f32 %v3865_v28, %v3587_v27  ;;  %v6547_v28 = vcombine.low %v4080_v24, %v4082_v5 }
0x1010   : > { %v3873_v30 = vsel %vm3869_vm4, %v3868_v20, -inf }
0x1011   : > { %3874 = vmax.xlane.f32.xlu1 %v3873_v30  ;;  %v3870_v31 = vsel %vm3869_vm4, %v3867_v29, -inf  ;;  %v4085_v30 = vld [vmem:[%s9404_s23 + $0xc0] sm:$0xff] }
0x1012   : > { %3871 = vmax.xlane.f32.xlu0 %v3870_v31  ;;  %v4084_v31 = vld [vmem:[%s9404_s23 + $0x88] sm:$0xff] }
0x109e   : > { %v3875_v2 = vpop.xlane.xlu1 %3874 }
0x109f   : > { %v3877_v32 = vsub.f32 %v3868_v20, %v3875_v2  ;;  %v3872_v33 = vpop.xlane.xlu0 %3871  ;;  %v6548_v20 = vcombine.high %v4080_v24, %v4082_v5  ;;  %v7478_v24 = vld [vmem:[%s9406_s25 + $0x1d0] sm:$0xff]  }
0x10a0   : > { %v3876_v34 = vsub.f32 %v3867_v29, %v3872_v33  ;;  %v4083_v29 = vld [vmem:[%s9404_s23 + $0x80] sm:$0xff]  ;;  %v7480_v5 = vld [vmem:[%s9406_s25 + $0x190] sm:$0xff]  }
0x10a1   : > { %v3880_v38 = vmul.f32 1.442695, %v3877_v32  ;;  %4195 = vmatprep.subr.bf16.mxu0 %v6548_v20  ;;  %v6550_v2 = vcombine.high %v4083_v29, %v4085_v30  ;;  %v4086_v32 = vld [vmem:[%s9404_s23 + $0xc8] sm:$0xff]  ;;  %v6549_v33 = vcombine.low %v4083_v29, %v4085_v30  ;;  %v7483_v20 = vld [vmem:[%s9406_s25 + $0x118] sm:$0xff]   ;;  %v7485_v30 = vld [vmem:[%s9406_s25 + $0x160] sm:$0xff]  }
0x10a2   : > { %v3878_v39 = vmul.f32 1.442695, %v3876_v34  ;;  %v6551_v34 = vcombine.low %v4084_v31, %v4086_v32  ;;  %v7484_v29 = vld [vmem:[%s9406_s25 + $0x198] sm:$0xff]  }
0x10a3   : > { %7605 = vpow2.f32 %v3880_v38  ;;  %v6552_v38 = vcombine.high %v4084_v31, %v4086_v32  ;;  %v7486_v31 = vld [vmem:[%s9406_s25 + $0x1e0] sm:$0xff]  }
0x10a4   : > { %7607 = vpow2.f32 %v3878_v39  ;;  %v4314_v39 = vld [vmem:[%s9404_s23 + $0x10] sm:$0xff]  ;;  %v7488_v32 = vld [vmem:[%s9406_s25 + $0x1a0] sm:$0xff]  }
0x10ad   : > { %v7606_v40 = vpop.eup %7605 }
0x10ae   : > { %v7608_v41 = vpop.eup %7607  ;;  %v3885_v42 = vsel %vm3869_vm4, %v7606_v40, 0.0 }
0x10af   : > { %3886 = vadd.xlane.f32.xlu1 %v3885_v42  ;;  %v3882_v43 = vsel %vm3869_vm4, %v7608_v41, 0.0 }
0x10b0   : > { %3883 = vadd.xlane.f32.xlu0 %v3882_v43  ;;  %v4317_v43 = vld [vmem:[%s9404_s23 + $0x58] sm:$0xff] }
0x113c   : > { %v3887_v45 = vpop.xlane.xlu1 %3886 }
0x113d   : > { %7609 = vrcp.f32 %v3887_v45  ;;  %v3884_v36 = vpop.xlane.xlu0 %3883 }
0x113e   : > { %7611 = vrcp.f32 %v3884_v36 }
0x1147   : > { %v7610_v46 = vpop.eup %7609 }
0x1148   : > { %v7612_v49 = vpop.eup %7611  ;;  %v3891_v51 = vmul.f32 %v7610_v46, %v7606_v40  ;;  %v4316_v40 = vld [vmem:[%s9404_s23 + $0x50] sm:$0xff] }
0x1149   : > { %v3890_v50 = vmul.f32 %v7612_v49, %v7608_v41  ;;  %v4315_v41 = vld [vmem:[%s9404_s23 + $0x18] sm:$0xff]  ;;  %v6556_v42 = vcombine.high %v4314_v39, %v4316_v40  ;;  %v6555_v44 = vcombine.low %v4314_v39, %v4316_v40  ;;  %v7492_v39 = vld [vmem:[%s9406_s25 + $0x1a8] sm:$0xff]   ;;  %v7493_v40 = vld [vmem:[%s9406_s25 + $0x170] sm:$0xff]  }
0x114a   : > { %v6557_v45 = vcombine.low %v4315_v41, %v4317_v43  ;;  %v6558_v36 = vcombine.high %v4315_v41, %v4317_v43  ;;  %v7494_v41 = vld [vmem:[%s9406_s25 + $0x1f0] sm:$0xff]  }
0x114b   : > { %7235 = vmatprep.mubr.msk.f32.mxu1 %vm3869_vm4, %v3890_v50  ;;  %v7496_v43 = vld [vmem:[%s9406_s25 + $0x1b0] sm:$0xff]  }
0x114c   : > { %7236 = vmatmul.mubr.msk.f32.vlgmr.msra.gmra.mrb[54].mxu1 %vm3869_vm4, %v3891_v51 }
0x114d   : > { %4184 = vmatprep.mubr.bf16.mxu1 %v7689_v63 }
0x121f   : > { %v7237_v1 = vpop.f32.mrb[54].mxu1 }
0x1220   : > { %v3964_v6 = vpop.f32.mrb[55].mxu1 }
0x1221   : > { %v3973_v53 = vpack.c.bf16 %v7237_v1, %v3964_v6  ;;  %v4069_v6 = vrot.slane %v8676_v48, %v1475_v7  ;;  %v4319_v7 = vld [vmem:[%s9404_s23 + $0x98] sm:$0xff] }
0x1223   : > { %7243 = vmatmul.mubr.msk.bf16.vlgmr.msra.gmra.mrb[60].mxu0 %vm866_vm1, %v3973_v53 }
0x1224   : > { %4227 = vmatprep.mubr.bf16.mxu0 %v7689_v63  ;;  %4196 = vmatpush1.bf16.msra.mxu0 %v6547_v28  ;;  %v7482_v28 = vld [vmem:[%s9406_s25 + $0x1d8] sm:$0xff]  }
0x1225   : > { %4197 = vmatprep.subr.bf16.mxu0 %v6552_v38  ;;  %v7491_v38 = vld [vmem:[%s9406_s25 + $0x128] sm:$0xff]  }
0x1228   : > { %4198 = vmatpush1.bf16.msra.mxu0 %v6551_v34  ;;  %v7490_v34 = vld [vmem:[%s9406_s25 + $0x1e8] sm:$0xff]  }
0x1229   : > { %4427 = vmatprep.subr.bf16.mxu0 %v6558_v36  ;;  %v7499_v36 = vld [vmem:[%s9406_s25 + $0x138] sm:$0xff]  }
0x12f6   : > { %v4031_v55 = vpop.f32.mrb[60].mxu0 }
0x12f7   : > { %v4032_v56 = vadd.f32 %v4031_v55, %v3981_v54  ;;  %v7244_v57 = vpop.f32.mrb[61].mxu0 }
0x12f8   : > { %v4034_v58 = vpop.f32.mrb[62].mxu0 }
0x12f9   : > { %v4035_v60 = vadd.f32 %v4034_v58, %v3981_v54  ;;  %v7245_v61 = vpop.f32.mrb[63].mxu0  ;;  %v4038_v62 = vadd.f32 %v4032_v56, %v8654_v47  ;;  %v4075_v56 = vrot.slane %v8676_v48, %v1480_v10 }
0x12fa   : > { %v4318_v61 = vld [vmem:[%s9404_s23 + $0x90] sm:$0xff] }
0x12fb   : > { %v4040_v3 = vsel %vm866_vm1, %v4038_v62, 0.0  ;;  %v4039_v4 = vadd.f32 %v4035_v60, %v8652_v37  ;;  %v4079_v37 = vld [vmem:[%s9404_s23] sm:$0xff] }
0x12fc   : > { %4041 = vadd.xlane.f32.xlu0 %v4040_v3  ;;  %v6546_v25 = vcombine.high %v4079_v37, %v4081_v23  ;;  %v6545_v27 = vcombine.low %v4079_v37, %v4081_v23  ;;  %v4321_v3 = vld [vmem:[%s9404_s23 + $0xd8] sm:$0xff]  ;;  %v7476_v37 = vld [vmem:[%s9406_s25 + $0x188] sm:$0xff]   ;;  %v7477_v23 = vld [vmem:[%s9406_s25 + $0x150] sm:$0xff]  }
0x12fd   : > { %v4043_v11 = vsel %vm866_vm1, %v4039_v4, 0.0 }
0x12fe   : > { %4044 = vadd.xlane.f32.xlu1 %v4043_v11  ;;  %4152 = vmatprep.subr.bf16.mxu1 %v6546_v25  ;;  %v7479_v25 = vld [vmem:[%s9406_s25 + $0x110] sm:$0xff]  }
0x12ff   : > { %4153 = vmatpush1.bf16.msra.mxu1 %v6545_v27  ;;  %v7481_v27 = vld [vmem:[%s9406_s25 + $0x158] sm:$0xff]  }
0x1300   : > { %4154 = vmatprep.subr.bf16.mxu1 %v6550_v2  ;;  %v7487_v2 = vld [vmem:[%s9406_s25 + $0x120] sm:$0xff]  }
0x1303   : > { %4155 = vmatpush1.bf16.msra.mxu1 %v6549_v33  ;;  %v7489_v33 = vld [vmem:[%s9406_s25 + $0x168] sm:$0xff]  }
0x1304   : > { %4384 = vmatprep.subr.bf16.mxu1 %v6556_v42  ;;  %v7495_v42 = vld [vmem:[%s9406_s25 + $0x130] sm:$0xff]  }
0x1389   : > { %v4042_v12 = vpop.xlane.xlu0 %4041 }
0x138a   : > { %v4046_v13 = vmul.f32 0.03125, %v4042_v12  ;;  %v6562_v12 = vcombine.high %v4319_v7, %v4321_v3 }
0x138b   : > { %v4045_v14 = vpop.xlane.xlu1 %4044 }
0x138c   : > { %v4048_v15 = vsub.f32 %v4038_v62, %v4046_v13  ;;  %v4047_v16 = vmul.f32 0.03125, %v4045_v14  ;;  %v4320_v62 = vld [vmem:[%s9404_s23 + $0xd0] sm:$0xff]  ;;  %v6561_v14 = vcombine.low %v4319_v7, %v4321_v3 }
0x138d   : > { %v6560_v11 = vcombine.high %v4318_v61, %v4320_v62  ;;  %v6559_v13 = vcombine.low %v4318_v61, %v4320_v62 }
0x138e   : > { %v4049_v17 = vsub.f32 %v4039_v4, %v4047_v16  ;;  %v4050_v18 = vmul.f32 %v4048_v15, %v4048_v15  ;;  %v7470_v16 = vld [vmem:[%s9406_s25 + $0x1c0] sm:$0xff]  }
0x1390   : > { %v4052_v19 = vsel %vm866_vm1, %v4050_v18, 0.0  ;;  %v4051_v21 = vmul.f32 %v4049_v17, %v4049_v17  ;;  %v7472_v18 = vld [vmem:[%s9406_s25 + $0x180] sm:$0xff]  }
0x1391   : > { %4053 = vadd.xlane.f32.xlu0 %v4052_v19  ;;  %v7473_v19 = vld [vmem:[%s9406_s25 + $0x148] sm:$0xff]  }
0x1392   : > { %v4055_v47 = vsel %vm866_vm1, %v4051_v21, 0.0  ;;  %v7474_v21 = vld [vmem:[%s9406_s25 + $0x1c8] sm:$0xff]  }
0x1393   : > { %4056 = vadd.xlane.f32.xlu1 %v4055_v47  ;;  %v7475_v47 = vld [vmem:[%s9406_s25 + $0x108] sm:$0xff]  }
0x141e   : > { %v4054_v46 = vpop.xlane.xlu0 %4053 }
0x141f   : > { %v4058_v49 = vmul.f32 0.03125, %v4054_v46  ;;  %v7500_v46 = vld [vmem:[%s9406_s25 + $0x1b8] sm:$0xff]  }
0x1420   : > { %v4057_v50 = vpop.xlane.xlu1 %4056 }
0x1421   : > { %v4060_v51 = vadd.f32 1e-05, %v4058_v49  ;;  %v4059_v52 = vmul.f32 0.03125, %v4057_v50  ;;  %v7501_v49 = vld [vmem:[%s9406_s25 + $0x40] sm:$0xff]  }
0x1422   : > { %v7502_v50 = vld [vmem:[%s9406_s25 + $0xc0] sm:$0xff]  }
0x1423   : > { %7613 = vrsqrt.f32 %v4060_v51  ;;  %v4061_v1 = vadd.f32 1e-05, %v4059_v52  ;;  %v4087_v51 = vld [vmem:[%s9405_s24] sm:$0xf] }
0x1424   : > { %v4092_v52 = vrot.slane %v4087_v51, %v7919_v9 }
0x1425   : > { %7615 = vrsqrt.f32 %v4061_v1  ;;  %v4100_v1 = vrot.slane %v4087_v51, %v7963_v35 }
0x142d   : > { %v7614_v53 = vpop.eup %7613 }
0x142e   : > { %v4064_v54 = vmul.f32 %v7614_v53, %v4048_v15  ;;  %v7469_v15 = vld [vmem:[%s9406_s25 + $0x140] sm:$0xff]   ;;  %v4104_v53 = vrot.slane %v4087_v51, %v8018_v26 }
0x142f   : > { %v7616_v55 = vpop.eup %7615 }
0x1430   : > { %v4070_v57 = vmul.f32 %v4069_v6, %v4064_v54  ;;  %v4065_v58 = vmul.f32 %v7616_v55, %v4049_v17  ;;  %v7471_v17 = vld [vmem:[%s9406_s25 + $0x100] sm:$0xff]  }
0x1432   : > { %v4071_v60 = vmul.f32 %v4069_v6, %v4065_v58  ;;  %v8772_v10 = vadd.f32 %v4075_v56, %v4070_v57  ;;  %v4096_v6 = vrot.slane %v4087_v51, %v7940_v22 }
0x1434   : > { %v8774_v48 = vadd.f32 %v4075_v56, %v4071_v60  ;;  %v4322_v56 = vld [vmem:[%s9405_s24 + $0x4] sm:$0xf] }
0x1436   : > { %v8778_v4 = vpack.c.bf16 %v8774_v48, %v8772_v10 }
0x1438   : > { %6553 = vmatmul.mubr.msk.bf16.vlgmr.msra.gmra.mrb[56].mxu1 %vm866_vm1, %v8778_v4  ;;  %6554 = vmatmul.mubr.msk.bf16.vlgmr.msra.gmra.mrb[64].mxu0 %vm866_vm1, %v8778_v4 }
0x1439   : > { %4385 = vmatpush1.bf16.msra.mxu1 %v6555_v44  ;;  %4428 = vmatpush1.bf16.msra.mxu0 %v6557_v45  ;;  %v7497_v44 = vld [vmem:[%s9406_s25 + $0x178] sm:$0xff]  }
0x143a   : > { %4386 = vmatprep.subr.bf16.mxu1 %v6560_v11  ;;  %4429 = vmatprep.subr.bf16.mxu0 %v6562_v12  ;;  %v7498_v45 = vld [vmem:[%s9406_s25 + $0x1f8] sm:$0xff]  }
0x143b   : > { %4416 = vmatprep.mubr.bf16.mxu1 %v7689_v63  ;;  %4459 = vmatprep.mubr.bf16.mxu0 %v7689_v63 }
0x143d   : > { %4387 = vmatpush1.bf16.msra.mxu1 %v6559_v13  ;;  %4430 = vmatpush1.bf16.msra.mxu0 %v6561_v14 }
0x143e   : > { %6947 = vmatprep.subr.bf16.mxu1 %v7469_v15  ;;  %6969 = vmatprep.subr.bf16.mxu0 %v7470_v16  ;;  %v4327_v16 = vrot.slane %v4322_v56, %v7919_v9 }
0x1440   : > { %6563 = vmatmul.mubr.msk.bf16.vlgmr.msra.gmra.mrb[60].mxu1 %vm866_vm1, %v8778_v4  ;;  %6564 = vmatmul.mubr.msk.bf16.vlgmr.msra.gmra.mrb[68].mxu0 %vm866_vm1, %v8778_v4 }
0x1441   : > { %6948 = vmatpush3.bf16.msra.mxu1 %v7471_v17  ;;  %6970 = vmatpush3.bf16.msra.mxu0 %v7472_v18  ;;  %v4335_v17 = vrot.slane %v4322_v56, %v7963_v35 }
0x1442   : > { %6949 = vmatprep.subr.bf16.mxu1 %v7473_v19  ;;  %6971 = vmatprep.subr.bf16.mxu0 %v7474_v21  ;;  %v4331_v21 = vrot.slane %v4322_v56, %v7940_v22 }
0x1445   : > { %6950 = vmatpush3.bf16.msra.mxu1 %v7475_v47  ;;  %6972 = vmatpush3.bf16.msra.mxu0 %v7476_v37  ;;  %v4339_v47 = vrot.slane %v4322_v56, %v8018_v26 }
0x1446   : > { %6951 = vmatprep.subr.bf16.mxu1 %v7477_v23  ;;  %6973 = vmatprep.subr.bf16.mxu0 %v7478_v24 }
0x1449   : > { %6952 = vmatpush3.bf16.msra.mxu1 %v7479_v25  ;;  %6974 = vmatpush3.bf16.msra.mxu0 %v7480_v5 }
0x144a   : > { %6953 = vmatprep.subr.bf16.mxu1 %v7481_v27  ;;  %6975 = vmatprep.subr.bf16.mxu0 %v7482_v28 }
0x144d   : > { %6954 = vmatpush3.bf16.msra.mxu1 %v7483_v20  ;;  %6976 = vmatpush3.bf16.msra.mxu0 %v7484_v29 }
0x144e   : > { %6955 = vmatprep.subr.bf16.mxu1 %v7485_v30  ;;  %6977 = vmatprep.subr.bf16.mxu0 %v7486_v31 }
0x1451   : > { %6956 = vmatpush3.bf16.msra.mxu1 %v7487_v2  ;;  %6978 = vmatpush3.bf16.msra.mxu0 %v7488_v32 }
0x1452   : > { %6957 = vmatprep.subr.bf16.mxu1 %v7489_v33  ;;  %6979 = vmatprep.subr.bf16.mxu0 %v7490_v34 }
0x1455   : > { %6958 = vmatpush3.bf16.msra.mxu1 %v7491_v38  ;;  %6980 = vmatpush3.bf16.msra.mxu0 %v7492_v39 }
0x1456   : > { %6959 = vmatprep.subr.bf16.mxu1 %v7493_v40  ;;  %6981 = vmatprep.subr.bf16.mxu0 %v7494_v41 }
0x1459   : > { %6960 = vmatpush3.bf16.msra.mxu1 %v7495_v42  ;;  %6982 = vmatpush3.bf16.msra.mxu0 %v7496_v43 }
0x145a   : > { %6961 = vmatprep.subr.bf16.mxu1 %v7497_v44  ;;  %6983 = vmatprep.subr.bf16.mxu0 %v7498_v45 }
0x145d   : > { %6962 = vmatpush3.bf16.msra.mxu1 %v7499_v36  ;;  %6984 = vmatpush3.bf16.msra.mxu0 %v7500_v46 }
0x145e   : > { %6991 = vmatprep.subr.bf16.mxu1 %v7501_v49  ;;  %7013 = vmatprep.subr.bf16.mxu0 %v7502_v50 }
0x150b   : > { %v4186_v54 = vpop.f32.mrb[56].mxu1  ;;  %v4229_v55 = vpop.f32.mrb[64].mxu0 }
0x150c   : > { %v4187_v57 = vadd.f32 %v4186_v54, %v4092_v52  ;;  %v4230_v58 = vadd.f32 %v4229_v55, %v4100_v1  ;;  %v4188_v60 = vpop.f32.mrb[57].mxu1  ;;  %v4231_v61 = vpop.f32.mrb[65].mxu0 }
0x150d   : > { %v4189_v62 = vadd.f32 %v4188_v60, %v4096_v6  ;;  %v4232_v7 = vadd.f32 %v4231_v61, %v4104_v53  ;;  %v4190_v3 = vpop.f32.mrb[58].mxu1  ;;  %v4233_v11 = vpop.f32.mrb[66].mxu0 }
0x150e   : > { %v4191_v12 = vadd.f32 %v4190_v3, %v4092_v52  ;;  %v4234_v13 = vadd.f32 %v4233_v11, %v4100_v1  ;;  %v4192_v14 = vpop.f32.mrb[59].mxu1  ;;  %v4235_v15 = vpop.f32.mrb[67].mxu0  ;;  %v4238_v37 = vmax.f32 %v4187_v57, 0.0  ;;  %v4240_v23 = vmax.f32 %v4230_v58, 0.0  ;;  %v7504_v3 = vld [vmem:[%s9406_s25 + $0x80] sm:$0xff]   ;;  %v7505_v11 = vld [vmem:[%s9406_s25 + $0x48] sm:$0xff]  }
0x150f   : > { %v4193_v18 = vadd.f32 %v4192_v14, %v4096_v6  ;;  %v4236_v19 = vadd.f32 %v4235_v15, %v4104_v53  ;;  %v4239_v5 = vmax.f32 %v4189_v62, 0.0  ;;  %v4241_v27 = vmax.f32 %v4232_v7, 0.0  ;;  %v7503_v7 = vld [vmem:[%s9406_s25] sm:$0xff]   ;;  %v7508_v14 = vld [vmem:[%s9406_s25 + $0x88] sm:$0xff]   ;;  %v7509_v15 = vld [vmem:[%s9406_s25 + $0x50] sm:$0xff]  }
0x1510   : > { %v4242_v24 = vmax.f32 %v4191_v12, 0.0  ;;  %v4244_v25 = vmax.f32 %v4234_v13, 0.0  ;;  %v7506_v12 = vld [vmem:[%s9406_s25 + $0xc8] sm:$0xff]  }
0x1511   : > { %v4243_v28 = vmax.f32 %v4193_v18, 0.0  ;;  %v4245_v20 = vmax.f32 %v4236_v19, 0.0  ;;  %v7507_v13 = vld [vmem:[%s9406_s25 + $0x8] sm:$0xff]   ;;  %v7512_v18 = vld [vmem:[%s9406_s25 + $0x90] sm:$0xff]   ;;  %v7513_v19 = vld [vmem:[%s9406_s25 + $0x58] sm:$0xff]  }
0x1512   : > { %v8906_v29 = vpack.c.bf16 %v4242_v24, %v4238_v37  ;;  %v8908_v30 = vpack.c.bf16 %v4244_v25, %v4240_v23  ;;  %v7516_v37 = vld [vmem:[%s9406_s25 + $0x98] sm:$0xff]   ;;  %v7517_v23 = vld [vmem:[%s9406_s25 + $0x60] sm:$0xff]  }
0x1513   : > { %v4247_v31 = vpack.c.bf16 %v4243_v28, %v4239_v5  ;;  %v4249_v2 = vpack.c.bf16 %v4245_v20, %v4241_v27  ;;  %v4418_v32 = vpop.f32.mrb[60].mxu1  ;;  %v4461_v33 = vpop.f32.mrb[68].mxu0  ;;  %v7518_v24 = vld [vmem:[%s9406_s25 + $0xe0] sm:$0xff]   ;;  %v7521_v27 = vld [vmem:[%s9406_s25 + $0x68] sm:$0xff]  }
0x1514   : > { %v4419_v34 = vadd.f32 %v4418_v32, %v4327_v16  ;;  %v4462_v38 = vadd.f32 %v4461_v33, %v4335_v17  ;;  %v4420_v39 = vpop.f32.mrb[61].mxu1  ;;  %v4463_v40 = vpop.f32.mrb[69].mxu0  ;;  %v7519_v25 = vld [vmem:[%s9406_s25 + $0x20] sm:$0xff]   ;;  %v7522_v28 = vld [vmem:[%s9406_s25 + $0xe8] sm:$0xff]   ;;  %v7526_v32 = vld [vmem:[%s9406_s25 + $0xf0] sm:$0xff]  }
0x1515   : > { %v4421_v41 = vadd.f32 %v4420_v39, %v4331_v21  ;;  %v4464_v42 = vadd.f32 %v4463_v40, %v4339_v47  ;;  %v4422_v43 = vpop.f32.mrb[62].mxu1  ;;  %v4465_v44 = vpop.f32.mrb[70].mxu0  ;;  %v7520_v5 = vld [vmem:[%s9406_s25 + $0xa0] sm:$0xff]   ;;  %v7523_v20 = vld [vmem:[%s9406_s25 + $0x28] sm:$0xff]   ;;  %v7527_v33 = vld [vmem:[%s9406_s25 + $0x30] sm:$0xff]  }
0x1516   : > { %v4423_v45 = vadd.f32 %v4422_v43, %v4327_v16  ;;  %v4466_v36 = vadd.f32 %v4465_v44, %v4335_v17  ;;  %v4424_v46 = vpop.f32.mrb[63].mxu1  ;;  %v4467_v49 = vpop.f32.mrb[71].mxu0  ;;  %v4470_v52 = vmax.f32 %v4419_v34, 0.0  ;;  %v4472_v1 = vmax.f32 %v4462_v38, 0.0  ;;  %v7510_v16 = vld [vmem:[%s9406_s25 + $0xd0] sm:$0xff]   ;;  %v7529_v38 = vld [vmem:[%s9406_s25 + $0x78] sm:$0xff]  }
0x1517   : > { %v4425_v50 = vadd.f32 %v4424_v46, %v4331_v21  ;;  %v4468_v51 = vadd.f32 %v4467_v49, %v4339_v47  ;;  %v4471_v54 = vmax.f32 %v4421_v41, 0.0  ;;  %v4473_v55 = vmax.f32 %v4464_v42, 0.0  ;;  %v7511_v17 = vld [vmem:[%s9406_s25 + $0x10] sm:$0xff]   ;;  %v7514_v21 = vld [vmem:[%s9406_s25 + $0xd8] sm:$0xff]   ;;  %v5094_v40 = vld [vmem:[%s9404_s23 + $0x20] sm:$0xff] }
0x1518   : > { %v4474_v6 = vmax.f32 %v4423_v45, 0.0  ;;  %v4476_v53 = vmax.f32 %v4466_v36, 0.0  ;;  %v7515_v47 = vld [vmem:[%s9406_s25 + $0x18] sm:$0xff]   ;;  %v7528_v34 = vld [vmem:[%s9406_s25 + $0xb0] sm:$0xff]   ;;  %v5096_v41 = vld [vmem:[%s9404_s23 + $0x60] sm:$0xff] }
0x1519   : > { %v4475_v56 = vmax.f32 %v4425_v50, 0.0  ;;  %v4477_v57 = vmax.f32 %v4468_v51, 0.0  ;;  %v7530_v39 = vld [vmem:[%s9406_s25 + $0xf8] sm:$0xff]   ;;  %v5095_v42 = vld [vmem:[%s9404_s23 + $0x28] sm:$0xff]  ;;  %v6630_v36 = vcombine.high %v5094_v40, %v5096_v41  ;;  %v5098_v49 = vld [vmem:[%s9404_s23 + $0xa0] sm:$0xff] }
0x151a   : > { %v4478_v58 = vpack.c.bf16 %v4474_v6, %v4470_v52  ;;  %v4480_v60 = vpack.c.bf16 %v4476_v53, %v4472_v1  ;;  %v5097_v43 = vld [vmem:[%s9404_s23 + $0x68] sm:$0xff]  ;;  %v7531_v44 = vld [vmem:[%s9406_s25 + $0x38] sm:$0xff]   ;;  %v5100_v50 = vld [vmem:[%s9404_s23 + $0xe0] sm:$0xff]  ;;  %v6629_v1 = vcombine.low %v5094_v40, %v5096_v41 }
0x151b   : > { %v4479_v61 = vpack.c.bf16 %v4475_v56, %v4471_v54  ;;  %v4481_v62 = vpack.c.bf16 %v4477_v57, %v4473_v55  ;;  %v7532_v45 = vld [vmem:[%s9406_s25 + $0xb8] sm:$0xff]   ;;  %v6632_v46 = vcombine.high %v5095_v42, %v5097_v43  ;;  %v5099_v51 = vld [vmem:[%s9404_s23 + $0xa8] sm:$0xff]  ;;  %v6631_v6 = vcombine.low %v5095_v42, %v5097_v43  ;;  %v7535_v57 = vld [vmem:[%s9406_s25 + $0x200] sm:$0xff]  }
0x151c   : > { %v5101_v52 = vld [vmem:[%s9404_s23 + $0xe8] sm:$0xff]  ;;  %v6634_v53 = vcombine.high %v5098_v49, %v5100_v50  ;;  %v6633_v55 = vcombine.low %v5098_v49, %v5100_v50  ;;  %v9148_v41 = vld [vmem:[%s9404_s23 + $0x78] sm:$0xff] }
0x151d   : > { %4770 = vmatprep.mubr.bf16.mxu1 %v4479_v61  ;;  %4811 = vmatprep.mubr.bf16.mxu0 %v4481_v62  ;;  %v6636_v54 = vcombine.high %v5099_v51, %v5101_v52  ;;  %v6635_v56 = vcombine.low %v5099_v51, %v5101_v52  ;;  %v7538_v61 = vld [vmem:[%s9406_s25 + $0x2c8] sm:$0xff]  }
0x151e   : > { %4771 = vmatmul.mubr.bf16.vlgmr.msra.gmra.mrb[64].mxu1 %v4478_v58  ;;  %4812 = vmatmul.mubr.bf16.vlgmr.msra.gmra.mrb[72].mxu0 %v4480_v60  ;;  %v7536_v58 = vld [vmem:[%s9406_s25 + $0x280] sm:$0xff]   ;;  %v7537_v60 = vld [vmem:[%s9406_s25 + $0x248] sm:$0xff]  }
0x151f   : > { %6992 = vmatpush3.bf16.msra.mxu1 %v7503_v7  ;;  %7014 = vmatpush3.bf16.msra.mxu0 %v7504_v3  ;;  %v7539_v62 = vld [vmem:[%s9406_s25 + $0x208] sm:$0xff]   ;;  %v7541_v3 = vld [vmem:[%s9406_s25 + $0x250] sm:$0xff]  }
0x1520   : > { %5044 = vmatprep.mubr.bf16.mxu1 %v4247_v31  ;;  %5085 = vmatprep.mubr.bf16.mxu0 %v4249_v2  ;;  %v7524_v31 = vld [vmem:[%s9406_s25 + $0xa8] sm:$0xff]   ;;  %v7525_v2 = vld [vmem:[%s9406_s25 + $0x70] sm:$0xff]  }
0x1521   : > { %6993 = vmatprep.subr.bf16.mxu1 %v7505_v11  ;;  %7015 = vmatprep.subr.bf16.mxu0 %v7506_v12  ;;  %v7540_v7 = vld [vmem:[%s9406_s25 + $0x288] sm:$0xff]   ;;  %v7542_v11 = vld [vmem:[%s9406_s25 + $0x2d0] sm:$0xff]  }
0x1522   : > { %v7543_v12 = vld [vmem:[%s9406_s25 + $0x210] sm:$0xff]  }
0x1523   : > { %6994 = vmatpush3.bf16.msra.mxu1 %v7507_v13  ;;  %7016 = vmatpush3.bf16.msra.mxu0 %v7508_v14  ;;  %v7544_v13 = vld [vmem:[%s9406_s25 + $0x290] sm:$0xff]   ;;  %v7545_v14 = vld [vmem:[%s9406_s25 + $0x258] sm:$0xff]  }
0x1524   : > { %6995 = vmatprep.subr.bf16.mxu1 %v7509_v15  ;;  %7017 = vmatprep.subr.bf16.mxu0 %v7510_v16  ;;  %v7546_v15 = vld [vmem:[%s9406_s25 + $0x2d8] sm:$0xff]  }
0x1525   : > { %v7547_v16 = vld [vmem:[%s9406_s25 + $0x218] sm:$0xff]  }
0x1527   : > { %6996 = vmatpush3.bf16.msra.mxu1 %v7511_v17  ;;  %7018 = vmatpush3.bf16.msra.mxu0 %v7512_v18  ;;  %v7548_v17 = vld [vmem:[%s9406_s25 + $0x298] sm:$0xff]   ;;  %v7549_v18 = vld [vmem:[%s9406_s25 + $0x260] sm:$0xff]  }
0x1528   : > { %6997 = vmatprep.subr.bf16.mxu1 %v7513_v19  ;;  %7019 = vmatprep.subr.bf16.mxu0 %v7514_v21  ;;  %v7550_v19 = vld [vmem:[%s9406_s25 + $0x2e0] sm:$0xff]  }
0x1529   : > { %v7551_v21 = vld [vmem:[%s9406_s25 + $0x220] sm:$0xff]  }
0x152b   : > { %6998 = vmatpush3.bf16.msra.mxu1 %v7515_v47  ;;  %7020 = vmatpush3.bf16.msra.mxu0 %v7516_v37  ;;  %v7552_v47 = vld [vmem:[%s9406_s25 + $0x2a0] sm:$0xff]   ;;  %v7553_v37 = vld [vmem:[%s9406_s25 + $0x268] sm:$0xff]  }
0x152c   : > { %6999 = vmatprep.subr.bf16.mxu1 %v7517_v23  ;;  %7021 = vmatprep.subr.bf16.mxu0 %v7518_v24  ;;  %v7554_v23 = vld [vmem:[%s9406_s25 + $0x2e8] sm:$0xff]  }
0x152d   : > { %v7555_v24 = vld [vmem:[%s9406_s25 + $0x228] sm:$0xff]  }
0x152f   : > { %7000 = vmatpush3.bf16.msra.mxu1 %v7519_v25  ;;  %7022 = vmatpush3.bf16.msra.mxu0 %v7520_v5  ;;  %v7556_v25 = vld [vmem:[%s9406_s25 + $0x2a8] sm:$0xff]   ;;  %v7557_v5 = vld [vmem:[%s9406_s25 + $0x270] sm:$0xff]  }
0x1530   : > { %7001 = vmatprep.subr.bf16.mxu1 %v7521_v27  ;;  %7023 = vmatprep.subr.bf16.mxu0 %v7522_v28  ;;  %v7558_v27 = vld [vmem:[%s9406_s25 + $0x2f0] sm:$0xff]  }
0x1531   : > { %v7559_v28 = vld [vmem:[%s9406_s25 + $0x230] sm:$0xff]  }
0x1533   : > { %7002 = vmatpush3.bf16.msra.mxu1 %v7523_v20  ;;  %7024 = vmatpush3.bf16.msra.mxu0 %v7524_v31  ;;  %v7560_v20 = vld [vmem:[%s9406_s25 + $0x2b0] sm:$0xff]   ;;  %v7561_v31 = vld [vmem:[%s9406_s25 + $0x278] sm:$0xff]  }
0x1534   : > { %7003 = vmatprep.subr.bf16.mxu1 %v7525_v2  ;;  %7025 = vmatprep.subr.bf16.mxu0 %v7526_v32  ;;  %v7562_v2 = vld [vmem:[%s9406_s25 + $0x2f8] sm:$0xff]  }
0x1535   : > { %v7563_v32 = vld [vmem:[%s9406_s25 + $0x238] sm:$0xff]  }
0x1537   : > { %7004 = vmatpush3.bf16.msra.mxu1 %v7527_v33  ;;  %7026 = vmatpush3.bf16.msra.mxu0 %v7528_v34  ;;  %v7564_v33 = vld [vmem:[%s9406_s25 + $0x2b8] sm:$0xff]   ;;  %v9131_v34 = vld [vmem:[%s9404_s23 + $0x30] sm:$0xff] }
0x1538   : > { %7005 = vmatprep.subr.bf16.mxu1 %v7529_v38  ;;  %7027 = vmatprep.subr.bf16.mxu0 %v7530_v39  ;;  %v9136_v38 = vld [vmem:[%s9404_s23 + $0x70] sm:$0xff]  ;;  %v9141_v39 = vld [vmem:[%s9404_s23 + $0x38] sm:$0xff] }
0x1539   : > { %v6672_v40 = vcombine.high %v9131_v34, %v9136_v38  ;;  %v6671_v42 = vcombine.low %v9131_v34, %v9136_v38  ;;  %v6673_v43 = vcombine.low %v9141_v39, %v9148_v41  ;;  %v7567_v34 = vld [vmem:[%s9406_s25 + $0x300] sm:$0xff]  }
0x153a   : > { %v7568_v38 = vld [vmem:[%s9406_s25 + $0x380] sm:$0xff]  }
0x153b   : > { %7006 = vmatpush3.bf16.msra.mxu1 %v7531_v44  ;;  %7028 = vmatpush3.bf16.msra.mxu0 %v7532_v45  ;;  %v6674_v44 = vcombine.high %v9141_v39, %v9148_v41  ;;  %v7569_v39 = vld [vmem:[%s9406_s25 + $0x348] sm:$0xff]  }
0x153c   : > { %5164 = vmatprep.subr.bf16.mxu1 %v6630_v36  ;;  %5207 = vmatprep.subr.bf16.mxu0 %v6632_v46  ;;  %v7571_v41 = vld [vmem:[%s9406_s25 + $0x308] sm:$0xff]  }
0x153e   : > { %5045 = vmatmul.mubr.bf16.vlgmr.msra.gmra.mrb[68].mxu1 %v8906_v29  ;;  %5086 = vmatmul.mubr.bf16.vlgmr.msra.gmra.mrb[76].mxu0 %v8908_v30  ;;  %v7533_v29 = vld [vmem:[%s9406_s25 + $0x240] sm:$0xff]  }
0x153f   : > { %5165 = vmatpush1.bf16.msra.mxu1 %v6629_v1  ;;  %5208 = vmatpush1.bf16.msra.mxu0 %v6631_v6  ;;  %v7534_v30 = vld [vmem:[%s9406_s25 + $0x2c0] sm:$0xff]  }
0x1540   : > { %5166 = vmatprep.subr.bf16.mxu1 %v6634_v53  ;;  %5209 = vmatprep.subr.bf16.mxu0 %v6636_v54 }
0x1541   : > { %5196 = vmatprep.mubr.bf16.mxu1 %v7689_v63  ;;  %5239 = vmatprep.mubr.bf16.mxu0 %v7689_v63 }
0x1543   : > { %5167 = vmatpush1.bf16.msra.mxu1 %v6633_v55  ;;  %5210 = vmatpush1.bf16.msra.mxu0 %v6635_v56 }
0x1544   : > { %7035 = vmatprep.subr.bf16.mxu1 %v7533_v29  ;;  %7057 = vmatprep.subr.bf16.mxu0 %v7534_v30 }
0x1546   : > { %6637 = vmatmul.mubr.msk.bf16.vlgmr.msra.gmra.mrb[72].mxu1 %vm866_vm1, %v8778_v4  ;;  %6638 = vmatmul.mubr.msk.bf16.vlgmr.msra.gmra.mrb[80].mxu0 %vm866_vm1, %v8778_v4 }
0x1547   : > { %7036 = vmatpush3.bf16.msra.mxu1 %v7535_v57  ;;  %7058 = vmatpush3.bf16.msra.mxu0 %v7536_v58 }
0x1548   : > { %7037 = vmatprep.subr.bf16.mxu1 %v7537_v60  ;;  %7059 = vmatprep.subr.bf16.mxu0 %v7538_v61 }
0x154b   : > { %7038 = vmatpush3.bf16.msra.mxu1 %v7539_v62  ;;  %7060 = vmatpush3.bf16.msra.mxu0 %v7540_v7 }
0x154c   : > { %7039 = vmatprep.subr.bf16.mxu1 %v7541_v3  ;;  %7061 = vmatprep.subr.bf16.mxu0 %v7542_v11  ;;  %v5102_v11 = vld [vmem:[%s9405_s24 + $0x8] sm:$0xf] }
0x154f   : > { %7040 = vmatpush3.bf16.msra.mxu1 %v7543_v12  ;;  %7062 = vmatpush3.bf16.msra.mxu0 %v7544_v13 }
0x1550   : > { %7041 = vmatprep.subr.bf16.mxu1 %v7545_v14  ;;  %7063 = vmatprep.subr.bf16.mxu0 %v7546_v15 }
0x1553   : > { %7042 = vmatpush3.bf16.msra.mxu1 %v7547_v16  ;;  %7064 = vmatpush3.bf16.msra.mxu0 %v7548_v17  ;;  %v5107_v17 = vrot.slane %v5102_v11, %v7919_v9 }
0x1554   : > { %7043 = vmatprep.subr.bf16.mxu1 %v7549_v18  ;;  %7065 = vmatprep.subr.bf16.mxu0 %v7550_v19  ;;  %v5115_v18 = vrot.slane %v5102_v11, %v7963_v35 }
0x1557   : > { %7044 = vmatpush3.bf16.msra.mxu1 %v7551_v21  ;;  %7066 = vmatpush3.bf16.msra.mxu0 %v7552_v47  ;;  %v5111_v47 = vrot.slane %v5102_v11, %v7940_v22 }
0x1558   : > { %7045 = vmatprep.subr.bf16.mxu1 %v7553_v37  ;;  %7067 = vmatprep.subr.bf16.mxu0 %v7554_v23  ;;  %v5119_v37 = vrot.slane %v5102_v11, %v8018_v26 }
0x155b   : > { %7046 = vmatpush3.bf16.msra.mxu1 %v7555_v24  ;;  %7068 = vmatpush3.bf16.msra.mxu0 %v7556_v25 }
0x155c   : > { %7047 = vmatprep.subr.bf16.mxu1 %v7557_v5  ;;  %7069 = vmatprep.subr.bf16.mxu0 %v7558_v27 }
0x155f   : > { %7048 = vmatpush3.bf16.msra.mxu1 %v7559_v28  ;;  %7070 = vmatpush3.bf16.msra.mxu0 %v7560_v20 }
0x1560   : > { %7049 = vmatprep.subr.bf16.mxu1 %v7561_v31  ;;  %7071 = vmatprep.subr.bf16.mxu0 %v7562_v2 }
0x1563   : > { %7050 = vmatpush3.bf16.msra.mxu1 %v7563_v32  ;;  %7072 = vmatpush3.bf16.msra.mxu0 %v7564_v33 }
0x1564   : > { %5672 = vmatprep.subr.bf16.mxu1 %v6672_v40  ;;  %5715 = vmatprep.subr.bf16.mxu0 %v6674_v44 }
0x15f1   : > { %v6963_v45 = vpop.f32.mrb[64].mxu1  ;;  %v6985_v36 = vpop.f32.mrb[72].mxu0 }
0x15f2   : > { %v6964_v46 = vpop.f32.mrb[65].mxu1  ;;  %v6986_v49 = vpop.f32.mrb[73].mxu0 }
0x15f3   : > { %v6965_v50 = vadd.f32 %v6964_v46, %v6963_v45  ;;  %v6987_v51 = vadd.f32 %v6986_v49, %v6985_v36  ;;  %v6966_v52 = vpop.f32.mrb[66].mxu1  ;;  %v6988_v1 = vpop.f32.mrb[74].mxu0 }
0x15f4   : > { %v6967_v6 = vpop.f32.mrb[67].mxu1  ;;  %v6989_v53 = vpop.f32.mrb[75].mxu0 }
0x15f5   : > { %v4814_v54 = vadd.f32 %v6987_v51, %v6965_v50  ;;  %v6968_v55 = vadd.f32 %v6967_v6, %v6966_v52  ;;  %v6990_v56 = vadd.f32 %v6989_v53, %v6988_v1  ;;  %v5606_v6 = vld [vmem:[%s9404_s23 + $0xb0] sm:$0xff] }
0x15f6   : > { %v5608_v53 = vld [vmem:[%s9404_s23 + $0xf0] sm:$0xff] }
0x15f7   : > { %v4817_v29 = vadd.f32 %v6990_v56, %v6968_v55  ;;  %v6675_v11 = vcombine.low %v5606_v6, %v5608_v53 }
0x1611   : > { %v7007_v30 = vpop.f32.mrb[68].mxu1  ;;  %v7029_v57 = vpop.f32.mrb[76].mxu0 }
0x1612   : > { %v7008_v58 = vpop.f32.mrb[69].mxu1  ;;  %v7030_v60 = vpop.f32.mrb[77].mxu0 }
0x1613   : > { %v7009_v61 = vadd.f32 %v7008_v58, %v7007_v30  ;;  %v7031_v62 = vadd.f32 %v7030_v60, %v7029_v57  ;;  %v7010_v7 = vpop.f32.mrb[70].mxu1  ;;  %v7032_v3 = vpop.f32.mrb[78].mxu0  ;;  %v5607_v30 = vld [vmem:[%s9404_s23 + $0xb8] sm:$0xff] }
0x1614   : > { %v7011_v12 = vpop.f32.mrb[71].mxu1  ;;  %v7033_v13 = vpop.f32.mrb[79].mxu0  ;;  %v5609_v57 = vld [vmem:[%s9404_s23 + $0xf8] sm:$0xff] }
0x1615   : > { %v5047_v14 = vadd.f32 %v7009_v61, %v4814_v54  ;;  %v7012_v15 = vadd.f32 %v7011_v12, %v7010_v7  ;;  %v7034_v16 = vadd.f32 %v7033_v13, %v7032_v3  ;;  %v6676_v7 = vcombine.high %v5606_v6, %v5608_v53  ;;  %v7565_v13 = vld [vmem:[%s9406_s25 + $0x340] sm:$0xff]  }
0x1616   : > { %v6678_v3 = vcombine.high %v5607_v30, %v5609_v57  ;;  %v6677_v12 = vcombine.low %v5607_v30, %v5609_v57 }
0x1617   : > { %v9161_v19 = vadd.f32 %v7031_v62, %v5047_v14  ;;  %v5050_v21 = vadd.f32 %v7012_v15, %v4817_v29  ;;  %v7566_v14 = vld [vmem:[%s9406_s25 + $0x3c0] sm:$0xff]   ;;  %v7575_v15 = vld [vmem:[%s9406_s25 + $0x310] sm:$0xff]  }
0x1619   : > { %v9165_v23 = vadd.f32 %v7034_v16, %v5050_v21  ;;  %v5198_v24 = vpop.f32.mrb[72].mxu1  ;;  %v5241_v25 = vpop.f32.mrb[80].mxu0  ;;  %v7576_v16 = vld [vmem:[%s9406_s25 + $0x390] sm:$0xff]   ;;  %v7579_v21 = vld [vmem:[%s9406_s25 + $0x318] sm:$0xff]  }
0x161a   : > { %v5199_v5 = vadd.f32 %v5198_v24, %v5107_v17  ;;  %v5242_v27 = vadd.f32 %v5241_v25, %v5115_v18  ;;  %v5200_v28 = vpop.f32.mrb[73].mxu1  ;;  %v5243_v20 = vpop.f32.mrb[81].mxu0  ;;  %v7582_v24 = vld [vmem:[%s9406_s25 + $0x3e0] sm:$0xff]  }
0x161b   : > { %v5201_v31 = vadd.f32 %v5200_v28, %v5111_v47  ;;  %v5244_v2 = vadd.f32 %v5243_v20, %v5119_v37  ;;  %v5202_v32 = vpop.f32.mrb[74].mxu1  ;;  %v5245_v33 = vpop.f32.mrb[82].mxu0  ;;  %v7583_v25 = vld [vmem:[%s9406_s25 + $0x320] sm:$0xff]   ;;  %v7586_v28 = vld [vmem:[%s9406_s25 + $0x3e8] sm:$0xff]  }
0x161c   : > { %v5203_v40 = vadd.f32 %v5202_v32, %v5107_v17  ;;  %v5246_v44 = vadd.f32 %v5245_v33, %v5115_v18  ;;  %v5204_v45 = vpop.f32.mrb[75].mxu1  ;;  %v5247_v36 = vpop.f32.mrb[83].mxu0  ;;  %v5250_v50 = vmax.f32 %v5199_v5, 0.0  ;;  %v5252_v51 = vmax.f32 %v5242_v27, 0.0  ;;  %v7577_v17 = vld [vmem:[%s9406_s25 + $0x358] sm:$0xff]   ;;  %v7584_v5 = vld [vmem:[%s9406_s25 + $0x3a0] sm:$0xff]  }
0x161d   : > { %v5205_v46 = vadd.f32 %v5204_v45, %v5111_v47  ;;  %v5248_v49 = vadd.f32 %v5247_v36, %v5119_v37  ;;  %v5251_v54 = vmax.f32 %v5201_v31, 0.0  ;;  %v5253_v55 = vmax.f32 %v5244_v2, 0.0  ;;  %v7578_v18 = vld [vmem:[%s9406_s25 + $0x3d8] sm:$0xff]   ;;  %v7581_v37 = vld [vmem:[%s9406_s25 + $0x360] sm:$0xff]   ;;  %v7585_v27 = vld [vmem:[%s9406_s25 + $0x368] sm:$0xff]  }
0x161e   : > { %v5254_v52 = vmax.f32 %v5203_v40, 0.0  ;;  %v5256_v1 = vmax.f32 %v5246_v44, 0.0  ;;  %v7580_v47 = vld [vmem:[%s9406_s25 + $0x398] sm:$0xff]   ;;  %v7587_v20 = vld [vmem:[%s9406_s25 + $0x328] sm:$0xff]   ;;  %v7589_v2 = vld [vmem:[%s9406_s25 + $0x370] sm:$0xff]  }
0x161f   : > { %v5255_v56 = vmax.f32 %v5205_v46, 0.0  ;;  %v5257_v29 = vmax.f32 %v5248_v49, 0.0  ;;  %v7588_v31 = vld [vmem:[%s9406_s25 + $0x3a8] sm:$0xff]   ;;  %v7590_v32 = vld [vmem:[%s9406_s25 + $0x3f0] sm:$0xff]   ;;  %v7593_v44 = vld [vmem:[%s9406_s25 + $0x378] sm:$0xff]  }
0x1620   : > { %v5258_v58 = vpack.c.bf16 %v5254_v52, %v5250_v50  ;;  %v5260_v60 = vpack.c.bf16 %v5256_v1, %v5252_v51  ;;  %v7591_v33 = vld [vmem:[%s9406_s25 + $0x330] sm:$0xff]   ;;  %v7594_v45 = vld [vmem:[%s9406_s25 + $0x3f8] sm:$0xff]  }
0x1621   : > { %v5259_v61 = vpack.c.bf16 %v5255_v56, %v5251_v54  ;;  %v5261_v62 = vpack.c.bf16 %v5257_v29, %v5253_v55  ;;  %v7592_v40 = vld [vmem:[%s9406_s25 + $0x3b0] sm:$0xff]   ;;  %v7595_v36 = vld [vmem:[%s9406_s25 + $0x338] sm:$0xff]   ;;  %v5610_v55 = vld [vmem:[%s9405_s24 + $0xc] sm:$0xf] }
0x1622   : > { %v7596_v46 = vld [vmem:[%s9406_s25 + $0x3b8] sm:$0xff]  }
0x1623   : > { %5550 = vmatprep.mubr.bf16.mxu1 %v5259_v61  ;;  %5591 = vmatprep.mubr.bf16.mxu0 %v5261_v62  ;;  %v5623_v61 = vrot.slane %v5610_v55, %v7963_v35 }
0x1624   : > { %5551 = vmatmul.mubr.bf16.vlgmr.msra.gmra.mrb[76].mxu1 %v5258_v58  ;;  %5592 = vmatmul.mubr.bf16.vlgmr.msra.gmra.mrb[84].mxu0 %v5260_v60  ;;  %v5615_v60 = vrot.slane %v5610_v55, %v7919_v9 }
0x1625   : > { %5673 = vmatpush1.bf16.msra.mxu1 %v6671_v42  ;;  %5716 = vmatpush1.bf16.msra.mxu0 %v6673_v43  ;;  %v7572_v42 = vld [vmem:[%s9406_s25 + $0x388] sm:$0xff]   ;;  %v7573_v43 = vld [vmem:[%s9406_s25 + $0x350] sm:$0xff]  }
0x1626   : > { %5674 = vmatprep.subr.bf16.mxu1 %v6676_v7  ;;  %5717 = vmatprep.subr.bf16.mxu0 %v6678_v3  ;;  %v5619_v3 = vrot.slane %v5610_v55, %v7940_v22 }
0x1627   : > { %5704 = vmatprep.mubr.bf16.mxu1 %v7689_v63  ;;  %5747 = vmatprep.mubr.bf16.mxu0 %v7689_v63  ;;  %v7570_v63 = vld [vmem:[%s9406_s25 + $0x3c8] sm:$0xff]  }
0x1629   : > { %5675 = vmatpush1.bf16.msra.mxu1 %v6675_v11  ;;  %5718 = vmatpush1.bf16.msra.mxu0 %v6677_v12  ;;  %v5627_v11 = vrot.slane %v5610_v55, %v8018_v26 }
0x162a   : > { %7079 = vmatprep.subr.bf16.mxu1 %v7565_v13  ;;  %7101 = vmatprep.subr.bf16.mxu0 %v7566_v14 }
0x162c   : > { %6679 = vmatmul.mubr.msk.bf16.vlgmr.msra.gmra.mrb[80].mxu1 %vm866_vm1, %v8778_v4  ;;  %6680 = vmatmul.mubr.msk.bf16.vlgmr.msra.gmra.mrb[88].mxu0 %vm866_vm1, %v8778_v4  ;;  %v7574_v4 = vld [vmem:[%s9406_s25 + $0x3d0] sm:$0xff]  }
0x162d   : > { %7080 = vmatpush3.bf16.msra.mxu1 %v7567_v34  ;;  %7102 = vmatpush3.bf16.msra.mxu0 %v7568_v38 }
0x162e   : > { %7081 = vmatprep.subr.bf16.mxu1 %v7569_v39  ;;  %7103 = vmatprep.subr.bf16.mxu0 %v7570_v63 }
0x1631   : > { %7082 = vmatpush3.bf16.msra.mxu1 %v7571_v41  ;;  %7104 = vmatpush3.bf16.msra.mxu0 %v7572_v42 }
0x1632   : > { %7083 = vmatprep.subr.bf16.mxu1 %v7573_v43  ;;  %7105 = vmatprep.subr.bf16.mxu0 %v7574_v4 }
0x1635   : > { %7084 = vmatpush3.bf16.msra.mxu1 %v7575_v15  ;;  %7106 = vmatpush3.bf16.msra.mxu0 %v7576_v16 }
0x1636   : > { %7085 = vmatprep.subr.bf16.mxu1 %v7577_v17  ;;  %7107 = vmatprep.subr.bf16.mxu0 %v7578_v18 }
0x1639   : > { %7086 = vmatpush3.bf16.msra.mxu1 %v7579_v21  ;;  %7108 = vmatpush3.bf16.msra.mxu0 %v7580_v47 }
0x163a   : > { %7087 = vmatprep.subr.bf16.mxu1 %v7581_v37  ;;  %7109 = vmatprep.subr.bf16.mxu0 %v7582_v24 }
0x163d   : > { %7088 = vmatpush3.bf16.msra.mxu1 %v7583_v25  ;;  %7110 = vmatpush3.bf16.msra.mxu0 %v7584_v5 }
0x163e   : > { %7089 = vmatprep.subr.bf16.mxu1 %v7585_v27  ;;  %7111 = vmatprep.subr.bf16.mxu0 %v7586_v28 }
0x1641   : > { %7090 = vmatpush3.bf16.msra.mxu1 %v7587_v20  ;;  %7112 = vmatpush3.bf16.msra.mxu0 %v7588_v31 }
0x1642   : > { %7091 = vmatprep.subr.bf16.mxu1 %v7589_v2  ;;  %7113 = vmatprep.subr.bf16.mxu0 %v7590_v32 }
0x1645   : > { %7092 = vmatpush3.bf16.msra.mxu1 %v7591_v33  ;;  %7114 = vmatpush3.bf16.msra.mxu0 %v7592_v40 }
0x1646   : > { %7093 = vmatprep.subr.bf16.mxu1 %v7593_v44  ;;  %7115 = vmatprep.subr.bf16.mxu0 %v7594_v45 }
0x1649   : > { %7094 = vmatpush3.bf16.msra.mxu1 %v7595_v36  ;;  %7116 = vmatpush3.bf16.msra.mxu0 %v7596_v46 }
0x16f7   : > { %v7051_v49 = vpop.f32.mrb[76].mxu1  ;;  %v7073_v50 = vpop.f32.mrb[84].mxu0 }
0x16f8   : > { %v7052_v51 = vpop.f32.mrb[77].mxu1  ;;  %v7074_v52 = vpop.f32.mrb[85].mxu0 }
0x16f9   : > { %v7053_v1 = vadd.f32 %v7052_v51, %v7051_v49  ;;  %v7075_v6 = vadd.f32 %v7074_v52, %v7073_v50  ;;  %v7054_v53 = vpop.f32.mrb[78].mxu1  ;;  %v7076_v54 = vpop.f32.mrb[86].mxu0  ;;  %v7622_v52 = vld [vmem:[%s9403_s22] sm:$0xff] }
0x16fa   : > { %v7055_v56 = vpop.f32.mrb[79].mxu1  ;;  %v7077_v29 = vpop.f32.mrb[87].mxu0 }
0x16fb   : > { %v5594_v30 = vadd.f32 %v7075_v6, %v7053_v1  ;;  %v7056_v57 = vadd.f32 %v7055_v56, %v7054_v53  ;;  %v7078_v58 = vadd.f32 %v7077_v29, %v7076_v54  ;;  %v6113_v1 = vrot.slane %v7622_v52, %v3475_v59 }
0x16fd   : > { %v5600_v62 = vadd.f32 %v5594_v30, %v9161_v19  ;;  %v5597_v7 = vadd.f32 %v7078_v58, %v7056_v57 }
0x16ff   : > { %v5601_v12 = vadd.f32 %v5597_v7, %v9165_v23  ;;  %v5706_v13 = vpop.f32.mrb[80].mxu1  ;;  %v5749_v14 = vpop.f32.mrb[88].mxu0 }
0x1700   : > { %v5707_v34 = vadd.f32 %v5706_v13, %v5615_v60  ;;  %v5750_v38 = vadd.f32 %v5749_v14, %v5623_v61  ;;  %v5708_v39 = vpop.f32.mrb[81].mxu1  ;;  %v5751_v63 = vpop.f32.mrb[89].mxu0  ;;  %v6157_v14 = vld [vmem:[%s9407_s26 + $0x8] sm:$0xff] }
0x1701   : > { %v5709_v41 = vadd.f32 %v5708_v39, %v5619_v3  ;;  %v5752_v42 = vadd.f32 %v5751_v63, %v5627_v11  ;;  %v5710_v9 = vpop.f32.mrb[82].mxu1  ;;  %v5753_v43 = vpop.f32.mrb[90].mxu0  ;;  %v6159_v39 = vld [vmem:[%s9407_s26 + $0x18] sm:$0xff] }
0x1702   : > { %v5711_v35 = vadd.f32 %v5710_v9, %v5615_v60  ;;  %v5754_v4 = vadd.f32 %v5753_v43, %v5623_v61  ;;  %v5712_v19 = vpop.f32.mrb[83].mxu1  ;;  %v5755_v15 = vpop.f32.mrb[91].mxu0  ;;  %v5758_v17 = vmax.f32 %v5707_v34, 0.0  ;;  %v5760_v26 = vmax.f32 %v5750_v38, 0.0  ;;  %v6158_v38 = vld [vmem:[%s9407_s26 + $0x10] sm:$0xff] }
0x1703   : > { %v5713_v16 = vadd.f32 %v5712_v19, %v5619_v3  ;;  %v5756_v22 = vadd.f32 %v5755_v15, %v5627_v11  ;;  %v5759_v21 = vmax.f32 %v5709_v41, 0.0  ;;  %v5761_v47 = vmax.f32 %v5752_v42, 0.0 }
0x1704   : > { %v5762_v18 = vmax.f32 %v5711_v35, 0.0  ;;  %v5764_v23 = vmax.f32 %v5754_v4, 0.0  ;;  %v7271_v63 = vpack.c.bf16 %v6159_v39, %v6158_v38  ;;  %v6147_v19 = vrot.slane %v7622_v52, %v3494_v0 }
0x1705   : > { %v5763_v37 = vmax.f32 %v5713_v16, 0.0  ;;  %v5765_v24 = vmax.f32 %v5756_v22, 0.0 }
0x1706   : > { %v5766_v25 = vpack.c.bf16 %v5762_v18, %v5758_v17  ;;  %v5768_v5 = vpack.c.bf16 %v5764_v23, %v5760_v26  ;;  %v6713_v17 = vld [vmem:[%s9403_s22 + $0x8] ss:$0 sm:$0xff] }
0x1707   : > { %v5767_v27 = vpack.c.bf16 %v5763_v37, %v5759_v21  ;;  %v5769_v28 = vpack.c.bf16 %v5765_v24, %v5761_v47 }
0x1709   : > { %6058 = vmatprep.mubr.bf16.mxu1 %v5767_v27  ;;  %6099 = vmatprep.mubr.bf16.mxu0 %v5769_v28 }
0x170a   : > { %6059 = vmatmul.mubr.bf16.vlgmr.msra.gmra.mrb[84].mxu1 %v5766_v25  ;;  %6100 = vmatmul.mubr.bf16.vlgmr.msra.gmra.mrb[92].mxu0 %v5768_v5 }
0x17dd   : > { %v7095_v20 = vpop.f32.mrb[84].mxu1  ;;  %v7117_v31 = vpop.f32.mrb[92].mxu0 }
0x17de   : > { %v7096_v2 = vpop.f32.mrb[85].mxu1  ;;  %v7118_v32 = vpop.f32.mrb[93].mxu0 }
0x17df   : > { %v7097_v33 = vadd.f32 %v7096_v2, %v7095_v20  ;;  %v7119_v40 = vadd.f32 %v7118_v32, %v7117_v31  ;;  %v7098_v44 = vpop.f32.mrb[86].mxu1  ;;  %v7120_v45 = vpop.f32.mrb[94].mxu0 }
0x17e0   : > { %v7099_v36 = vpop.f32.mrb[87].mxu1  ;;  %v7121_v46 = vpop.f32.mrb[95].mxu0 }
0x17e1   : > { %v6102_v49 = vadd.f32 %v7119_v40, %v7097_v33  ;;  %v7100_v50 = vadd.f32 %v7099_v36, %v7098_v44  ;;  %v7122_v51 = vadd.f32 %v7121_v46, %v7120_v45 }
0x17e3   : > { %v6108_v6 = vadd.f32 %v6102_v49, %v5600_v62  ;;  %v6105_v53 = vadd.f32 %v7122_v51, %v7100_v50 }
0x17e5   : > { %v6109_v54 = vadd.f32 %v6105_v53, %v5601_v12  ;;  %v6114_v55 = vadd.f32 %v6113_v1, %v6108_v6 }
0x17e7   : > { %v6116_v56 = vadd.f32 %v6114_v55, %v8772_v10  ;;  %v6115_v29 = vadd.f32 %v6113_v1, %v6109_v54 }
0x17e9   : > { %v6118_v30 = vsel %vm866_vm1, %v6116_v56, 0.0  ;;  %v6117_v57 = vadd.f32 %v6115_v29, %v8774_v48  ;;  %v6156_v48 = vld [vmem:[%s9407_s26] sm:$0xff] }
0x17ea   : > { %6119 = vadd.xlane.f32.xlu0 %v6118_v30  ;;  %v7267_v34 = vpack.c.bf16 %v6157_v14, %v6156_v48 }
0x17eb   : > { %v6121_v58 = vsel %vm866_vm1, %v6117_v57, 0.0 }
0x17ec   : > { %6122 = vadd.xlane.f32.xlu1 %v6121_v58  ;;  %7268 = vmatprep.subr.bf16.mxu1 %v7267_v34 }
0x17ed   : > { %7270 = vmatpush3.bf16.msra.mxu1 %v7267_v34 }
0x17ee   : > { %7272 = vmatprep.subr.bf16.mxu1 %v7271_v63 }
0x17f1   : > { %7274 = vmatpush3.bf16.msra.mxu1 %v7271_v63 }
0x1877   : > { %v6120_v60 = vpop.xlane.xlu0 %6119 }
0x1878   : > { %v6124_v61 = vmul.f32 0.03125, %v6120_v60 }
0x1879   : > { %v6123_v7 = vpop.xlane.xlu1 %6122 }
0x187a   : > { %v6126_v3 = vsub.f32 %v6116_v56, %v6124_v61  ;;  %v6125_v59 = vmul.f32 0.03125, %v6123_v7 }
0x187c   : > { %v6127_v62 = vsub.f32 %v6117_v57, %v6125_v59  ;;  %v6128_v11 = vmul.f32 %v6126_v3, %v6126_v3 }
0x187e   : > { %v6130_v12 = vsel %vm866_vm1, %v6128_v11, 0.0  ;;  %v6129_v13 = vmul.f32 %v6127_v62, %v6127_v62 }
0x187f   : > { %6131 = vadd.xlane.f32.xlu0 %v6130_v12 }
0x1880   : > { %v6133_v10 = vsel %vm866_vm1, %v6129_v13, 0.0 }
0x1881   : > { %6134 = vadd.xlane.f32.xlu1 %v6133_v10 }
0x190c   : > { %v6132_v41 = vpop.xlane.xlu0 %6131 }
0x190d   : > { %v6136_v42 = vmul.f32 0.03125, %v6132_v41 }
0x190e   : > { %v6135_v9 = vpop.xlane.xlu1 %6134 }
0x190f   : > { %v6138_v43 = vadd.f32 1e-05, %v6136_v42  ;;  %v6137_v35 = vmul.f32 0.03125, %v6135_v9 }
0x1911   : > { %7617 = vrsqrt.f32 %v6138_v43  ;;  %v6139_v4 = vadd.f32 1e-05, %v6137_v35 }
0x1913   : > { %7619 = vrsqrt.f32 %v6139_v4 }
0x191b   : > { %v7618_v15 = vpop.eup %7617 }
0x191c   : > { %v6142_v16 = vmul.f32 %v7618_v15, %v6126_v3 }
0x191d   : > { %v7620_v22 = vpop.eup %7619 }
0x191e   : > { %v6143_v26 = vmul.f32 %v7620_v22, %v6127_v62  ;;  %v6148_v18 = vmul.f32 %v6147_v19, %v6142_v16 }
0x1920   : > { %v6149_v23 = vmul.f32 %v6147_v19, %v6143_v26  ;;  %v6154_v21 = vadd.f32 %v6713_v17, %v6148_v18 }
0x1922   : > { %v6155_v47 = vadd.f32 %v6713_v17, %v6149_v23  ;;  %7254 = vmatprep.mubr.msk.f32.mxu1 %vm866_vm1, %v6154_v21 }
0x1924   : > { %7255 = vmatmul.mubr.msk.f32.vlgmr.msra.gmra.mrb[88].mxu1 %vm866_vm1, %v6155_v47 }
0x19f7   : > { %v7256_v0 = vpop.f32.mrb[88].mxu1 }
0x19f8   : > { %v6245_v37 = vadd.f32 %v7256_v0, %v6714_v8  ;;  %v6239_v24 = vpop.f32.mrb[89].mxu1 }
0x19f9   : > { %v6240_v25 = vadd.f32 %v6714_v8, %v6239_v24 }
0x19fa   : > { %6249 = vst.msk [vmem:[%s836_s4 + $0x8] sm:$0xff] %vm866_vm1, %v6245_v37 }
0x19fb   : > { %6248 = vst.msk [vmem:[%s836_s4] sm:$0xff] %vm866_vm1, %v6240_v25 }
0x19fc   : > { %7636 = shalt.err (!%p7633_p3)
}
0x19fd   : > { %s7637_s28 = scalar_lea.hbm %s9336_s1, 256  ;;  %s7641_s6 = scalar_lea.hbm %s9478_s7, 512 }
0x19fe   : > { %p7638_p4 = scmp.ne.s32.totalorder %s9336_s1, %s7637_s28  ;;  %p7642_p9 = scmp.lt.u32.totalorder %s9336_s1, %s9478_s7 }
0x19ff   : > { %p7643_p10 = scmp.lt.u32.totalorder %s7641_s6, %s7637_s28  ;;  %p7645_p12 = scmp.lt.u32.totalorder %s7637_s28, %s9336_s1 }
0x1a00   : > { %p7639_p7 = pnand %p7638_p4, %p7876_p5 }
0x1a01   : > { %p7644_p11 = por %p7643_p10, %p7642_p9 }
0x1a02   : > { %p7640_p8 = pneg %p7639_p7 }
0x1a03   : > { %p7646_p13 = por %p7645_p12, %p7644_p11 }
0x1a05   : > { %p7647_p0 = pnand %p7646_p13, %p7640_p8 }
0x1a07   : > { %7650 = shalt.err (!%p7647_p0)
}
0x1a08   : > { %s7691_s13 = smov 128   ;;  %s7692_s3 = smov 8  }
0x1a09   : > { %7275 = dma.vmem_to_hbm [thread:$0]  (%p7876_p5), %s9331_s11, 256, %s9336_s1, %s9340_s2, %s7691_s13, %s7691_s13, %s7692_s3  }
0x1a0a PF: > { %s9479_s8 = sld [smem:[#allocation7_spill]]  ;;  %s9480_s30 = sld [smem:[#allocation5_spill]] }
0x1a10   : > { %p7281_p1 = scmp.ge.s32.totalorder %s9479_s8, 2  ;;  %s6279_s12 = sand.u32 1, %s9480_s30  }
0x1a11   : > { %s6280_s28 = scalar_lea.sflag [#allocation3], %s6279_s12 }
0x1a12   : > { %p7278_p2 = pnand %p7281_p1, %p7880_p6 }
0x1a14   : > { %7668 = dma.done.wait (!%p7278_p2), %s6280_s28, 256  }
0x1a15   : > { %7670 = vsyncadd (!%p7278_p2), %s6280_s28, 4294967040  ;;  %s9482_s30 = sld [smem:[#allocation8_spill]]  ;;  %s9483_s6 = sld [smem:[#allocation6_spill]] }
0x1a16   : > { %s9484_s9 = sld [smem:[#allocation9_spill]]  ;;  %s9485_s8 = smov %s7677_s5 }
0x1a1b   : > { %p38_p3 = scmp.ge.s32.totalorder %s9482_s30, 4   ;;  %s9486_s5 = smov %s9483_s6 }
0x1a1d   :  { %40 = sbr.rel (!%p38_p3) target bundleno = 19 (0x13), region = 167 }
0x1a24   :  { %6285 = vsyncpa [#allocation3], 1 }
0x1a25   :  { %6287 = vsyncpa [#allocation3 + $0x1], 1 }

</bundles_post_ra>
